<compile_context>
chip_gen: v7x
topology: tpu7x:2x2x1
jax: 0.10.0
libtpu: 0.0.40
codegen_flags: <defaults>
</compile_context>

<pallas_src>
import numpy as np

import jax
import jax.numpy as jnp
from jax.experimental import pallas as pl
from jax.experimental.pallas import tpu as pltpu


# ----------------------------- static geometry ----------------------------- #
CIN, H0, W0 = 3, 32, 32          # input image (PyTorch default input_shape=(32, 32))
C0P = 4                          # input channels padded 3 -> 4  (W0 * C0P = 128 lanes)
K = 5                            # conv kernel size
C1, C1P = 6, 8                   # conv1 out channels, padded to 8 lanes / pixel
H1, W1 = H0 - K + 1, W0 - K + 1          # 28, 28
H1P, W1P = H1 // 2, W1 // 2              # 14, 14
C2, C2P = 16, 16                 # conv2 out channels (16 is already lane friendly)
H2, W2 = H1P - K + 1, W1P - K + 1        # 10, 10
H2P, W2P = H2 // 2, W2 // 2              # 5, 5
F1, F2 = 256, 128                # fc hidden sizes
NUM_CLASSES = 100
NCP = 128                        # classifier outputs padded to one full 128-lane slab


# ------------------------------ fused kernel ------------------------------- #

def _lenet_kernel(x_ref,                       # (32, 128)  = (H0, W0*C0P), one image
                  b1_ref, bias1_ref,           # (5, 128, 224), (1, 224)
                  s1_ref, c1_ref,              # (2, 14, 28), (2, 224, 112)
                  b2_ref, bias2_ref,           # (5, 112, 160), (1, 160)
                  s2_ref, c2_ref,              # (2, 5, 10), (2, 160, 80)
                  w3_ref, b3_ref,              # (5, 80, 256), (1, 256)
                  w4_ref, b4_ref,              # (256, 128), (1, 128)
                  w5_ref, b5_ref,              # (128, 128), (1, 128)
                  out_ref,                     # (1, 128)
                  p1_ref, p2_ref):             # scratch: (14, 112), (5, 80)
    f32 = jnp.float32

    # ---- conv1 (banded-Toeplitz matmuls) + bias + ReLU --------------------- #
    acc1 = jnp.zeros((H1, W1 * C1P), f32)                       # (28, 224)
    for i in range(K):
        xi = x_ref[pl.ds(i, H1), :]                             # (28, 128)
        acc1 += jnp.dot(xi, b1_ref[i], preferred_element_type=f32)
    a1 = jnp.maximum(acc1 + bias1_ref[...], 0.0)                # (28, 224)

    # ---- maxpool1: row-select matmuls + col-select matmuls + elementwise max
    rmax1 = jnp.maximum(jnp.dot(s1_ref[0], a1, preferred_element_type=f32),
                        jnp.dot(s1_ref[1], a1, preferred_element_type=f32))   # (14, 224)
    p1 = jnp.maximum(jnp.dot(rmax1, c1_ref[0], preferred_element_type=f32),
                     jnp.dot(rmax1, c1_ref[1], preferred_element_type=f32))   # (14, 112)
    p1_ref[...] = p1

    # ---- conv2 + bias + ReLU ----------------------------------------------- #
    acc2 = jnp.zeros((H2, W2 * C2P), f32)                       # (10, 160)
    for i in range(K):
        pi = p1_ref[pl.ds(i, H2), :]                            # (10, 112)
        acc2 += jnp.dot(pi, b2_ref[i], preferred_element_type=f32)
    a2 = jnp.maximum(acc2 + bias2_ref[...], 0.0)                # (10, 160)

    # ---- maxpool2 ----------------------------------------------------------- #
    rmax2 = jnp.maximum(jnp.dot(s2_ref[0], a2, preferred_element_type=f32),
                        jnp.dot(s2_ref[1], a2, preferred_element_type=f32))   # (5, 160)
    p2 = jnp.maximum(jnp.dot(rmax2, c2_ref[0], preferred_element_type=f32),
                     jnp.dot(rmax2, c2_ref[1], preferred_element_type=f32))   # (5, 80)
    p2_ref[...] = p2

    # ---- fc1 (NCHW flatten permutation baked into w3 row slabs) + ReLU ------ #
    fc1 = jnp.zeros((1, F1), f32)
    for h in range(H2P):
        row = p2_ref[pl.ds(h, 1), :]                            # (1, 80)
        fc1 += jnp.dot(row, w3_ref[h], preferred_element_type=f32)
    h1 = jnp.maximum(fc1 + b3_ref[...], 0.0)                    # (1, 256)

    # ---- fc2 + ReLU, fc3 (no ReLU, padded to 128 lanes) ---------------------- #
    h2 = jnp.maximum(jnp.dot(h1, w4_ref[...], preferred_element_type=f32)
                     + b4_ref[...], 0.0)                        # (1, 128)
    out_ref[...] = (jnp.dot(h2, w5_ref[...], preferred_element_type=f32)
                    + b5_ref[...])                              # (1, 128)


def _const_spec(shape):
    zero = (0,) * len(shape)
    return pl.BlockSpec(tuple(shape), lambda i, _z=zero: _z)


@jax.jit
def _lenet_pallas(x_nchw, packed):
    n = x_nchw.shape[0]
    # Pack the image into a lane-dense (H, W*Cpad) layout (tiny XLA glue).
    x = jnp.transpose(x_nchw, (0, 2, 3, 1)).astype(jnp.float32)        # NHWC
    x = jnp.pad(x, ((0, 0), (0, 0), (0, 0), (0, C0P - CIN)))           # pad C 3->4
    x = x.reshape(n, H0, W0 * C0P)                                     # (n, 32, 128)

    weight_args = (packed["b1"], packed["bias1"], packed["s1"], packed["c1"],
                   packed["b2"], packed["bias2"], packed["s2"], packed["c2"],
                   packed["w3"], packed["bias3"], packed["w4"], packed["bias4"],
                   packed["w5"], packed["bias5"])

    in_specs = [pl.BlockSpec((None, H0, W0 * C0P), lambda i: (i, 0, 0))]
    in_specs += [_const_spec(w.shape) for w in weight_args]

    out = pl.pallas_call(
        _lenet_kernel,
        out_shape=jax.ShapeDtypeStruct((n, 1, NCP), jnp.float32),
        grid=(n,),
        in_specs=in_specs,
        out_specs=pl.BlockSpec((None, 1, NCP), lambda i: (i, 0, 0)),
        scratch_shapes=[pltpu.VMEM((H1P, W1P * C1P), jnp.float32),
                        pltpu.VMEM((H2P, W2P * C2P), jnp.float32)],
        compiler_params=pltpu.CompilerParams(
            dimension_semantics=("parallel",)),
    )(x, *weight_args)
    return out.reshape(n, NCP)[:, :NUM_CLASSES]


def lenet_forward(x_nchw, packed):
    logits = _lenet_pallas(x_nchw, packed)
    n = x_nchw.shape[0]
    shape_dict = {1: [n, C1, H1P, W1P],
                  2: [n, C2, H2P, W2P],
                  3: [n, C2 * H2P * W2P],
                  4: [n, F1],
                  5: [n, F2],
                  6: [n, NUM_CLASSES]}
    return logits, shape_dict


# -------------------------- host-side weight packing ------------------------ #

def pack_params(params):
    """Pre-pack all PyTorch-layout weights once (banded conv weights, pooling
    selection matrices, flatten-permuted / transposed FC weights, lane padding)."""
    f = lambda a: np.asarray(a, np.float32)
    w1, b1 = f(params["w1"]), f(params["b1"])       # (6,3,5,5), (6,)
    w2, b2 = f(params["w2"]), f(params["b2"])       # (16,6,5,5), (16,)
    w3, b3 = f(params["w3"]), f(params["b3"])       # (256,400), (256,)
    w4, b4 = f(params["w4"]), f(params["b4"])       # (128,256), (128,)
    w5, b5 = f(params["w5"]), f(params["b5"])       # (100,128), (100,)

    # conv1 band:  B1[i, (wo+j)*C0P + c, wo*C1P + co] = w1[co, c, i, j]
    B1 = np.zeros((K, W0 * C0P, W1 * C1P), np.float32)
    for i in range(K):
        for j in range(K):
            blk = w1[:, :, i, j].T                               # (Cin=3, Cout=6)
            for wo in range(W1):
                B1[i, (wo + j) * C0P:(wo + j) * C0P + CIN,
                      wo * C1P:wo * C1P + C1] = blk
    t = np.zeros((W1, C1P), np.float32); t[:, :C1] = b1
    bias1 = t.reshape(1, -1)

    # pool1 selection matrices (0/1)
    S1 = np.zeros((2, H1P, H1), np.float32)
    for dh in range(2):
        for h in range(H1P):
            S1[dh, h, 2 * h + dh] = 1.0
    C1sel = np.zeros((2, W1 * C1P, W1P * C1P), np.float32)
    for dw in range(2):
        for w in range(W1P):
            for c in range(C1P):
                C1sel[dw, (2 * w + dw) * C1P + c, w * C1P + c] = 1.0

    # conv2 band:  B2[i, (wo+j)*C1P + c, wo*C2P + co] = w2[co, c, i, j]
    B2 = np.zeros((K, W1P * C1P, W2 * C2P), np.float32)
    for i in range(K):
        for j in range(K):
            blk = w2[:, :, i, j].T                               # (6, 16)
            for wo in range(W2):
                B2[i, (wo + j) * C1P:(wo + j) * C1P + C1,
                      wo * C2P:wo * C2P + C2] = blk
    t = np.zeros((W2, C2P), np.float32); t[:, :C2] = b2
    bias2 = t.reshape(1, -1)

    # pool2 selection matrices
    S2 = np.zeros((2, H2P, H2), np.float32)
    for dh in range(2):
        for h in range(H2P):
            S2[dh, h, 2 * h + dh] = 1.0
    C2sel = np.zeros((2, W2 * C2P, W2P * C2P), np.float32)
    for dw in range(2):
        for w in range(W2P):
            for c in range(C2P):
                C2sel[dw, (2 * w + dw) * C2P + c, w * C2P + c] = 1.0

    # fc1: bake the NCHW flatten (co*25 + h*5 + w) into per-row (h) weight slabs:
    #   W3s[h, w*C2P + co, o] = w3[o, co*25 + h*5 + w]
    w3r = w3.reshape(F1, C2, H2P, W2P)
    W3s = np.zeros((H2P, W2P * C2P, F1), np.float32)
    for h in range(H2P):
        for w in range(W2P):
            W3s[h, w * C2P:(w + 1) * C2P, :] = w3r[:, :, h, w].T   # (16, 256)
    bias3 = b3.reshape(1, F1)

    W4p = w4.T.copy()                                            # (256, 128)
    bias4 = b4.reshape(1, F2)

    nc = w5.shape[0]
    W5p = np.zeros((F2, NCP), np.float32); W5p[:, :nc] = w5.T    # (128, 128)
    bias5 = np.zeros((1, NCP), np.float32); bias5[0, :nc] = b5

    packed = dict(b1=B1, bias1=bias1, s1=S1, c1=C1sel,
                  b2=B2, bias2=bias2, s2=S2, c2=C2sel,
                  w3=W3s, bias3=bias3, w4=W4p, bias4=bias4,
                  w5=W5p, bias5=bias5)
    return jax.tree_util.tree_map(jnp.asarray, packed)


# ------------------------------ param init --------------------------------- #

def init_params(key, num_classes=NUM_CLASSES):
    def _init(key, shape, fan_in):
        bound = 1.0 / jnp.sqrt(jnp.float32(fan_in))
        return jax.random.uniform(key, shape, jnp.float32, -bound, bound)

    ks = jax.random.split(key, 10)
    return {
        "w1": _init(ks[0], (6, 3, 5, 5), 3 * 5 * 5),
        "b1": _init(ks[1], (6,), 3 * 5 * 5),
        "w2": _init(ks[2], (16, 6, 5, 5), 6 * 5 * 5),
        "b2": _init(ks[3], (16,), 6 * 5 * 5),
        "w3": _init(ks[4], (256, 400), 400),
        "b3": _init(ks[5], (256,), 400),
        "w4": _init(ks[6], (128, 256), 256),
        "b4": _init(ks[7], (128,), 256),
        "w5": _init(ks[8], (num_classes, 128), 128),
        "b5": _init(ks[9], (num_classes,), 128),
    }


# ------------------------- pure-JAX reference (check) ----------------------- #

def lenet_reference(x_nchw, params):
    hp = jax.lax.Precision.HIGHEST
    x = jnp.transpose(x_nchw, (0, 2, 3, 1)).astype(jnp.float32)        # NHWC

    def conv(x, w, b):
        k = jnp.transpose(w, (2, 3, 1, 0))                             # HWIO
        y = jax.lax.conv_general_dilated(
            x, k, (1, 1), "VALID",
            dimension_numbers=("NHWC", "HWIO", "NHWC"), precision=hp)
        return jnp.maximum(y + b, 0.0)

    def pool(x):
        return jax.lax.reduce_window(x, -jnp.inf, jax.lax.max,
                                     (1, 2, 2, 1), (1, 2, 2, 1), "VALID")

    x = pool(conv(x, params["w1"], params["b1"]))
    x = pool(conv(x, params["w2"], params["b2"]))
    x = jnp.transpose(x, (0, 3, 1, 2)).reshape(x.shape[0], -1)         # NCHW flatten
    x = jnp.maximum(jnp.dot(x, params["w3"].T, precision=hp) + params["b3"], 0.0)
    x = jnp.maximum(jnp.dot(x, params["w4"].T, precision=hp) + params["b4"], 0.0)
    return jnp.dot(x, params["w5"].T, precision=hp) + params["b5"]


# --------------------------------- main ------------------------------------ #

if __name__ == "__main__":
    key = jax.random.PRNGKey(0)
    k_params, k_x = jax.random.split(key)
    params = init_params(k_params, num_classes=NUM_CLASSES)
    packed = pack_params(params)

    # LeNet with input_shape=(32, 32) needs 3x32x32 inputs (400-dim flatten).
    x = jax.random.normal(k_x, (2, 3, 32, 32), dtype=jnp.float32)

    logits, shape_dict = lenet_forward(x, packed)
    logits = jax.block_until_ready(logits)

    assert logits.shape == (2, NUM_CLASSES), logits.shape
    assert shape_dict[1] == [2, 6, 14, 14], shape_dict[1]
    assert shape_dict[2] == [2, 16, 5, 5], shape_dict[2]
    assert shape_dict[3] == [2, 400], shape_dict[3]
    assert shape_dict[4] == [2, 256], shape_dict[4]
    assert shape_dict[5] == [2, 128], shape_dict[5]
    assert shape_dict[6] == [2, 100], shape_dict[6]

    # Numerical check against a pure-JAX reference of the PyTorch module.
    ref = jax.block_until_ready(lenet_reference(x, params))
    np.testing.assert_allclose(np.asarray(logits), np.asarray(ref),
                               atol=5e-2, rtol=5e-2)

    print("KERNEL_OK")
</pallas_src>

<mosaic_0001>
module attributes {stable_mosaic.version = 11 : i64} {
  func.func @_lenet_kernel(%arg0: i32, %arg1: memref<1x32x128xf32, #tpu.memory_space<vmem>>, %arg2: memref<5x128x224xf32, #tpu.memory_space<vmem>>, %arg3: memref<1x224xf32, #tpu.memory_space<vmem>>, %arg4: memref<2x14x28xf32, #tpu.memory_space<vmem>>, %arg5: memref<2x224x112xf32, #tpu.memory_space<vmem>>, %arg6: memref<5x112x160xf32, #tpu.memory_space<vmem>>, %arg7: memref<1x160xf32, #tpu.memory_space<vmem>>, %arg8: memref<2x5x10xf32, #tpu.memory_space<vmem>>, %arg9: memref<2x160x80xf32, #tpu.memory_space<vmem>>, %arg10: memref<5x80x256xf32, #tpu.memory_space<vmem>>, %arg11: memref<1x256xf32, #tpu.memory_space<vmem>>, %arg12: memref<256x128xf32, #tpu.memory_space<vmem>>, %arg13: memref<1x128xf32, #tpu.memory_space<vmem>>, %arg14: memref<128x128xf32, #tpu.memory_space<vmem>>, %arg15: memref<1x128xf32, #tpu.memory_space<vmem>>, %arg16: memref<1x1x128xf32, #tpu.memory_space<vmem>>, %arg17: memref<14x112xf32, #tpu.memory_space<vmem>>, %arg18: memref<5x80xf32, #tpu.memory_space<vmem>>) attributes {dimension_semantics = [#tpu.dimension_semantics<parallel>], iteration_bounds = array<i64: 2>, scalar_prefetch = 0 : i64, scratch_operands = 2 : i64, tpu.core_type = #tpu.core_type<tc>, window_params = [{transform_indices = @transform_0, window_bounds = array<i64: 1, 32, 128>}, {pipeline_mode = #tpu.pipeline_mode<synchronous>, transform_indices = @transform_1, window_bounds = array<i64: 5, 128, 224>}, {pipeline_mode = #tpu.pipeline_mode<synchronous>, transform_indices = @transform_2, window_bounds = array<i64: 1, 224>}, {pipeline_mode = #tpu.pipeline_mode<synchronous>, transform_indices = @transform_3, window_bounds = array<i64: 2, 14, 28>}, {pipeline_mode = #tpu.pipeline_mode<synchronous>, transform_indices = @transform_4, window_bounds = array<i64: 2, 224, 112>}, {pipeline_mode = #tpu.pipeline_mode<synchronous>, transform_indices = @transform_5, window_bounds = array<i64: 5, 112, 160>}, {pipeline_mode = #tpu.pipeline_mode<synchronous>, transform_indices = @transform_6, window_bounds = array<i64: 1, 160>}, {pipeline_mode = #tpu.pipeline_mode<synchronous>, transform_indices = @transform_7, window_bounds = array<i64: 2, 5, 10>}, {pipeline_mode = #tpu.pipeline_mode<synchronous>, transform_indices = @transform_8, window_bounds = array<i64: 2, 160, 80>}, {pipeline_mode = #tpu.pipeline_mode<synchronous>, transform_indices = @transform_9, window_bounds = array<i64: 5, 80, 256>}, {pipeline_mode = #tpu.pipeline_mode<synchronous>, transform_indices = @transform_10, window_bounds = array<i64: 1, 256>}, {pipeline_mode = #tpu.pipeline_mode<synchronous>, transform_indices = @transform_11, window_bounds = array<i64: 256, 128>}, {pipeline_mode = #tpu.pipeline_mode<synchronous>, transform_indices = @transform_12, window_bounds = array<i64: 1, 128>}, {pipeline_mode = #tpu.pipeline_mode<synchronous>, transform_indices = @transform_13, window_bounds = array<i64: 128, 128>}, {pipeline_mode = #tpu.pipeline_mode<synchronous>, transform_indices = @transform_14, window_bounds = array<i64: 1, 128>}, {transform_indices = @transform_15, window_bounds = array<i64: 1, 1, 128>}]} {
    %cst = arith.constant 0.000000e+00 : f32
    %0 = vector.broadcast %cst : f32 to vector<28x224xf32>
    %c0 = arith.constant 0 : index
    %c0_0 = arith.constant 0 : index
    %c0_1 = arith.constant 0 : index
    %1 = vector.load %arg1[%c0, %c0_0, %c0_1] : memref<1x32x128xf32, #tpu.memory_space<vmem>>, vector<1x28x128xf32>
    %2 = vector.shape_cast %1 : vector<1x28x128xf32> to vector<28x128xf32>
    %c0_2 = arith.constant 0 : index
    %c0_3 = arith.constant 0 : index
    %c0_4 = arith.constant 0 : index
    %3 = vector.load %arg2[%c0_2, %c0_3, %c0_4] : memref<5x128x224xf32, #tpu.memory_space<vmem>>, vector<1x128x224xf32>
    %4 = vector.shape_cast %3 : vector<1x128x224xf32> to vector<128x224xf32>
    %cst_5 = arith.constant dense<0.000000e+00> : vector<28x224xf32>
    %5 = tpu.matmul %2, %4, %cst_5 {dimension_numbers = #tpu.dot_dimension_numbers<[1], [0], [0], [1], [0, 0, 1, 1], [], []>} : vector<28x128xf32>, vector<128x224xf32>, vector<28x224xf32> -> vector<28x224xf32>
    %6 = arith.addf %0, %5 : vector<28x224xf32>
    %c0_6 = arith.constant 0 : index
    %c1 = arith.constant 1 : index
    %c0_7 = arith.constant 0 : index
    %7 = vector.load %arg1[%c0_6, %c1, %c0_7] : memref<1x32x128xf32, #tpu.memory_space<vmem>>, vector<1x28x128xf32>
    %8 = vector.shape_cast %7 : vector<1x28x128xf32> to vector<28x128xf32>
    %c1_8 = arith.constant 1 : index
    %c0_9 = arith.constant 0 : index
    %c0_10 = arith.constant 0 : index
    %9 = vector.load %arg2[%c1_8, %c0_9, %c0_10] : memref<5x128x224xf32, #tpu.memory_space<vmem>>, vector<1x128x224xf32>
    %10 = vector.shape_cast %9 : vector<1x128x224xf32> to vector<128x224xf32>
    %cst_11 = arith.constant dense<0.000000e+00> : vector<28x224xf32>
    %11 = tpu.matmul %8, %10, %cst_11 {dimension_numbers = #tpu.dot_dimension_numbers<[1], [0], [0], [1], [0, 0, 1, 1], [], []>} : vector<28x128xf32>, vector<128x224xf32>, vector<28x224xf32> -> vector<28x224xf32>
    %12 = arith.addf %6, %11 : vector<28x224xf32>
    %c0_12 = arith.constant 0 : index
    %c2 = arith.constant 2 : index
    %c0_13 = arith.constant 0 : index
    %13 = vector.load %arg1[%c0_12, %c2, %c0_13] : memref<1x32x128xf32, #tpu.memory_space<vmem>>, vector<1x28x128xf32>
    %14 = vector.shape_cast %13 : vector<1x28x128xf32> to vector<28x128xf32>
    %c2_14 = arith.constant 2 : index
    %c0_15 = arith.constant 0 : index
    %c0_16 = arith.constant 0 : index
    %15 = vector.load %arg2[%c2_14, %c0_15, %c0_16] : memref<5x128x224xf32, #tpu.memory_space<vmem>>, vector<1x128x224xf32>
    %16 = vector.shape_cast %15 : vector<1x128x224xf32> to vector<128x224xf32>
    %cst_17 = arith.constant dense<0.000000e+00> : vector<28x224xf32>
    %17 = tpu.matmul %14, %16, %cst_17 {dimension_numbers = #tpu.dot_dimension_numbers<[1], [0], [0], [1], [0, 0, 1, 1], [], []>} : vector<28x128xf32>, vector<128x224xf32>, vector<28x224xf32> -> vector<28x224xf32>
    %18 = arith.addf %12, %17 : vector<28x224xf32>
    %c0_18 = arith.constant 0 : index
    %c3 = arith.constant 3 : index
    %c0_19 = arith.constant 0 : index
    %19 = vector.load %arg1[%c0_18, %c3, %c0_19] : memref<1x32x128xf32, #tpu.memory_space<vmem>>, vector<1x28x128xf32>
    %20 = vector.shape_cast %19 : vector<1x28x128xf32> to vector<28x128xf32>
    %c3_20 = arith.constant 3 : index
    %c0_21 = arith.constant 0 : index
    %c0_22 = arith.constant 0 : index
    %21 = vector.load %arg2[%c3_20, %c0_21, %c0_22] : memref<5x128x224xf32, #tpu.memory_space<vmem>>, vector<1x128x224xf32>
    %22 = vector.shape_cast %21 : vector<1x128x224xf32> to vector<128x224xf32>
    %cst_23 = arith.constant dense<0.000000e+00> : vector<28x224xf32>
    %23 = tpu.matmul %20, %22, %cst_23 {dimension_numbers = #tpu.dot_dimension_numbers<[1], [0], [0], [1], [0, 0, 1, 1], [], []>} : vector<28x128xf32>, vector<128x224xf32>, vector<28x224xf32> -> vector<28x224xf32>
    %24 = arith.addf %18, %23 : vector<28x224xf32>
    %c0_24 = arith.constant 0 : index
    %c4 = arith.constant 4 : index
    %c0_25 = arith.constant 0 : index
    %25 = vector.load %arg1[%c0_24, %c4, %c0_25] : memref<1x32x128xf32, #tpu.memory_space<vmem>>, vector<1x28x128xf32>
    %26 = vector.shape_cast %25 : vector<1x28x128xf32> to vector<28x128xf32>
    %c4_26 = arith.constant 4 : index
    %c0_27 = arith.constant 0 : index
    %c0_28 = arith.constant 0 : index
    %27 = vector.load %arg2[%c4_26, %c0_27, %c0_28] : memref<5x128x224xf32, #tpu.memory_space<vmem>>, vector<1x128x224xf32>
    %28 = vector.shape_cast %27 : vector<1x128x224xf32> to vector<128x224xf32>
    %cst_29 = arith.constant dense<0.000000e+00> : vector<28x224xf32>
    %29 = tpu.matmul %26, %28, %cst_29 {dimension_numbers = #tpu.dot_dimension_numbers<[1], [0], [0], [1], [0, 0, 1, 1], [], []>} : vector<28x128xf32>, vector<128x224xf32>, vector<28x224xf32> -> vector<28x224xf32>
    %30 = arith.addf %24, %29 : vector<28x224xf32>
    %c0_30 = arith.constant 0 : index
    %c0_31 = arith.constant 0 : index
    %31 = vector.load %arg3[%c0_30, %c0_31] : memref<1x224xf32, #tpu.memory_space<vmem>>, vector<1x224xf32>
    %32 = vector.broadcast %31 : vector<1x224xf32> to vector<28x224xf32>
    %33 = arith.addf %30, %32 : vector<28x224xf32>
    %cst_32 = arith.constant 0.000000e+00 : f32
    %34 = vector.broadcast %cst_32 : f32 to vector<28x224xf32>
    %35 = arith.maximumf %33, %34 : vector<28x224xf32>
    %c0_33 = arith.constant 0 : index
    %c0_34 = arith.constant 0 : index
    %c0_35 = arith.constant 0 : index
    %36 = vector.load %arg4[%c0_33, %c0_34, %c0_35] : memref<2x14x28xf32, #tpu.memory_space<vmem>>, vector<1x14x28xf32>
    %37 = vector.shape_cast %36 : vector<1x14x28xf32> to vector<14x28xf32>
    %cst_36 = arith.constant dense<0.000000e+00> : vector<14x224xf32>
    %38 = tpu.matmul %37, %35, %cst_36 {dimension_numbers = #tpu.dot_dimension_numbers<[1], [0], [0], [1], [0, 0, 1, 1], [], []>} : vector<14x28xf32>, vector<28x224xf32>, vector<14x224xf32> -> vector<14x224xf32>
    %c1_37 = arith.constant 1 : index
    %c0_38 = arith.constant 0 : index
    %c0_39 = arith.constant 0 : index
    %39 = vector.load %arg4[%c1_37, %c0_38, %c0_39] : memref<2x14x28xf32, #tpu.memory_space<vmem>>, vector<1x14x28xf32>
    %40 = vector.shape_cast %39 : vector<1x14x28xf32> to vector<14x28xf32>
    %cst_40 = arith.constant dense<0.000000e+00> : vector<14x224xf32>
    %41 = tpu.matmul %40, %35, %cst_40 {dimension_numbers = #tpu.dot_dimension_numbers<[1], [0], [0], [1], [0, 0, 1, 1], [], []>} : vector<14x28xf32>, vector<28x224xf32>, vector<14x224xf32> -> vector<14x224xf32>
    %42 = arith.maximumf %38, %41 : vector<14x224xf32>
    %c0_41 = arith.constant 0 : index
    %c0_42 = arith.constant 0 : index
    %c0_43 = arith.constant 0 : index
    %43 = vector.load %arg5[%c0_41, %c0_42, %c0_43] : memref<2x224x112xf32, #tpu.memory_space<vmem>>, vector<1x224x112xf32>
    %44 = vector.shape_cast %43 : vector<1x224x112xf32> to vector<224x112xf32>
    %cst_44 = arith.constant dense<0.000000e+00> : vector<14x112xf32>
    %45 = tpu.matmul %42, %44, %cst_44 {dimension_numbers = #tpu.dot_dimension_numbers<[1], [0], [0], [1], [0, 0, 1, 1], [], []>} : vector<14x224xf32>, vector<224x112xf32>, vector<14x112xf32> -> vector<14x112xf32>
    %c1_45 = arith.constant 1 : index
    %c0_46 = arith.constant 0 : index
    %c0_47 = arith.constant 0 : index
    %46 = vector.load %arg5[%c1_45, %c0_46, %c0_47] : memref<2x224x112xf32, #tpu.memory_space<vmem>>, vector<1x224x112xf32>
    %47 = vector.shape_cast %46 : vector<1x224x112xf32> to vector<224x112xf32>
    %cst_48 = arith.constant dense<0.000000e+00> : vector<14x112xf32>
    %48 = tpu.matmul %42, %47, %cst_48 {dimension_numbers = #tpu.dot_dimension_numbers<[1], [0], [0], [1], [0, 0, 1, 1], [], []>} : vector<14x224xf32>, vector<224x112xf32>, vector<14x112xf32> -> vector<14x112xf32>
    %49 = arith.maximumf %45, %48 : vector<14x112xf32>
    %c0_49 = arith.constant 0 : index
    %c0_50 = arith.constant 0 : index
    %50 = vector.load %arg17[%c0_49, %c0_50] : memref<14x112xf32, #tpu.memory_space<vmem>>, vector<14x112xf32>
    tpu.vector_store %arg17[%c0_49, %c0_50], %49 {strides = array<i32>} : memref<14x112xf32, #tpu.memory_space<vmem>>, vector<14x112xf32>,
    %cst_51 = arith.constant 0.000000e+00 : f32
    %51 = vector.broadcast %cst_51 : f32 to vector<10x160xf32>
    %c0_52 = arith.constant 0 : index
    %c0_53 = arith.constant 0 : index
    %52 = vector.load %arg17[%c0_52, %c0_53] : memref<14x112xf32, #tpu.memory_space<vmem>>, vector<10x112xf32>
    %c0_54 = arith.constant 0 : index
    %c0_55 = arith.constant 0 : index
    %c0_56 = arith.constant 0 : index
    %53 = vector.load %arg6[%c0_54, %c0_55, %c0_56] : memref<5x112x160xf32, #tpu.memory_space<vmem>>, vector<1x112x160xf32>
    %54 = vector.shape_cast %53 : vector<1x112x160xf32> to vector<112x160xf32>
    %cst_57 = arith.constant dense<0.000000e+00> : vector<10x160xf32>
    %55 = tpu.matmul %52, %54, %cst_57 {dimension_numbers = #tpu.dot_dimension_numbers<[1], [0], [0], [1], [0, 0, 1, 1], [], []>} : vector<10x112xf32>, vector<112x160xf32>, vector<10x160xf32> -> vector<10x160xf32>
    %56 = arith.addf %51, %55 : vector<10x160xf32>
    %c1_58 = arith.constant 1 : index
    %c0_59 = arith.constant 0 : index
    %57 = vector.load %arg17[%c1_58, %c0_59] : memref<14x112xf32, #tpu.memory_space<vmem>>, vector<10x112xf32>
    %c1_60 = arith.constant 1 : index
    %c0_61 = arith.constant 0 : index
    %c0_62 = arith.constant 0 : index
    %58 = vector.load %arg6[%c1_60, %c0_61, %c0_62] : memref<5x112x160xf32, #tpu.memory_space<vmem>>, vector<1x112x160xf32>
    %59 = vector.shape_cast %58 : vector<1x112x160xf32> to vector<112x160xf32>
    %cst_63 = arith.constant dense<0.000000e+00> : vector<10x160xf32>
    %60 = tpu.matmul %57, %59, %cst_63 {dimension_numbers = #tpu.dot_dimension_numbers<[1], [0], [0], [1], [0, 0, 1, 1], [], []>} : vector<10x112xf32>, vector<112x160xf32>, vector<10x160xf32> -> vector<10x160xf32>
    %61 = arith.addf %56, %60 : vector<10x160xf32>
    %c2_64 = arith.constant 2 : index
    %c0_65 = arith.constant 0 : index
    %62 = vector.load %arg17[%c2_64, %c0_65] : memref<14x112xf32, #tpu.memory_space<vmem>>, vector<10x112xf32>
    %c2_66 = arith.constant 2 : index
    %c0_67 = arith.constant 0 : index
    %c0_68 = arith.constant 0 : index
    %63 = vector.load %arg6[%c2_66, %c0_67, %c0_68] : memref<5x112x160xf32, #tpu.memory_space<vmem>>, vector<1x112x160xf32>
    %64 = vector.shape_cast %63 : vector<1x112x160xf32> to vector<112x160xf32>
    %cst_69 = arith.constant dense<0.000000e+00> : vector<10x160xf32>
    %65 = tpu.matmul %62, %64, %cst_69 {dimension_numbers = #tpu.dot_dimension_numbers<[1], [0], [0], [1], [0, 0, 1, 1], [], []>} : vector<10x112xf32>, vector<112x160xf32>, vector<10x160xf32> -> vector<10x160xf32>
    %66 = arith.addf %61, %65 : vector<10x160xf32>
    %c3_70 = arith.constant 3 : index
    %c0_71 = arith.constant 0 : index
    %67 = vector.load %arg17[%c3_70, %c0_71] : memref<14x112xf32, #tpu.memory_space<vmem>>, vector<10x112xf32>
    %c3_72 = arith.constant 3 : index
    %c0_73 = arith.constant 0 : index
    %c0_74 = arith.constant 0 : index
    %68 = vector.load %arg6[%c3_72, %c0_73, %c0_74] : memref<5x112x160xf32, #tpu.memory_space<vmem>>, vector<1x112x160xf32>
    %69 = vector.shape_cast %68 : vector<1x112x160xf32> to vector<112x160xf32>
    %cst_75 = arith.constant dense<0.000000e+00> : vector<10x160xf32>
    %70 = tpu.matmul %67, %69, %cst_75 {dimension_numbers = #tpu.dot_dimension_numbers<[1], [0], [0], [1], [0, 0, 1, 1], [], []>} : vector<10x112xf32>, vector<112x160xf32>, vector<10x160xf32> -> vector<10x160xf32>
    %71 = arith.addf %66, %70 : vector<10x160xf32>
    %c4_76 = arith.constant 4 : index
    %c0_77 = arith.constant 0 : index
    %72 = vector.load %arg17[%c4_76, %c0_77] : memref<14x112xf32, #tpu.memory_space<vmem>>, vector<10x112xf32>
    %c4_78 = arith.constant 4 : index
    %c0_79 = arith.constant 0 : index
    %c0_80 = arith.constant 0 : index
    %73 = vector.load %arg6[%c4_78, %c0_79, %c0_80] : memref<5x112x160xf32, #tpu.memory_space<vmem>>, vector<1x112x160xf32>
    %74 = vector.shape_cast %73 : vector<1x112x160xf32> to vector<112x160xf32>
    %cst_81 = arith.constant dense<0.000000e+00> : vector<10x160xf32>
    %75 = tpu.matmul %72, %74, %cst_81 {dimension_numbers = #tpu.dot_dimension_numbers<[1], [0], [0], [1], [0, 0, 1, 1], [], []>} : vector<10x112xf32>, vector<112x160xf32>, vector<10x160xf32> -> vector<10x160xf32>
    %76 = arith.addf %71, %75 : vector<10x160xf32>
    %c0_82 = arith.constant 0 : index
    %c0_83 = arith.constant 0 : index
    %77 = vector.load %arg7[%c0_82, %c0_83] : memref<1x160xf32, #tpu.memory_space<vmem>>, vector<1x160xf32>
    %78 = vector.broadcast %77 : vector<1x160xf32> to vector<10x160xf32>
    %79 = arith.addf %76, %78 : vector<10x160xf32>
    %cst_84 = arith.constant 0.000000e+00 : f32
    %80 = vector.broadcast %cst_84 : f32 to vector<10x160xf32>
    %81 = arith.maximumf %79, %80 : vector<10x160xf32>
    %c0_85 = arith.constant 0 : index
    %c0_86 = arith.constant 0 : index
    %c0_87 = arith.constant 0 : index
    %82 = vector.load %arg8[%c0_85, %c0_86, %c0_87] : memref<2x5x10xf32, #tpu.memory_space<vmem>>, vector<1x5x10xf32>
    %83 = vector.shape_cast %82 : vector<1x5x10xf32> to vector<5x10xf32>
    %cst_88 = arith.constant dense<0.000000e+00> : vector<5x160xf32>
    %84 = tpu.matmul %83, %81, %cst_88 {dimension_numbers = #tpu.dot_dimension_numbers<[1], [0], [0], [1], [0, 0, 1, 1], [], []>} : vector<5x10xf32>, vector<10x160xf32>, vector<5x160xf32> -> vector<5x160xf32>
    %c1_89 = arith.constant 1 : index
    %c0_90 = arith.constant 0 : index
    %c0_91 = arith.constant 0 : index
    %85 = vector.load %arg8[%c1_89, %c0_90, %c0_91] : memref<2x5x10xf32, #tpu.memory_space<vmem>>, vector<1x5x10xf32>
    %86 = vector.shape_cast %85 : vector<1x5x10xf32> to vector<5x10xf32>
    %cst_92 = arith.constant dense<0.000000e+00> : vector<5x160xf32>
    %87 = tpu.matmul %86, %81, %cst_92 {dimension_numbers = #tpu.dot_dimension_numbers<[1], [0], [0], [1], [0, 0, 1, 1], [], []>} : vector<5x10xf32>, vector<10x160xf32>, vector<5x160xf32> -> vector<5x160xf32>
    %88 = arith.maximumf %84, %87 : vector<5x160xf32>
    %c0_93 = arith.constant 0 : index
    %c0_94 = arith.constant 0 : index
    %c0_95 = arith.constant 0 : index
    %89 = vector.load %arg9[%c0_93, %c0_94, %c0_95] : memref<2x160x80xf32, #tpu.memory_space<vmem>>, vector<1x160x80xf32>
    %90 = vector.shape_cast %89 : vector<1x160x80xf32> to vector<160x80xf32>
    %cst_96 = arith.constant dense<0.000000e+00> : vector<5x80xf32>
    %91 = tpu.matmul %88, %90, %cst_96 {dimension_numbers = #tpu.dot_dimension_numbers<[1], [0], [0], [1], [0, 0, 1, 1], [], []>} : vector<5x160xf32>, vector<160x80xf32>, vector<5x80xf32> -> vector<5x80xf32>
    %c1_97 = arith.constant 1 : index
    %c0_98 = arith.constant 0 : index
    %c0_99 = arith.constant 0 : index
    %92 = vector.load %arg9[%c1_97, %c0_98, %c0_99] : memref<2x160x80xf32, #tpu.memory_space<vmem>>, vector<1x160x80xf32>
    %93 = vector.shape_cast %92 : vector<1x160x80xf32> to vector<160x80xf32>
    %cst_100 = arith.constant dense<0.000000e+00> : vector<5x80xf32>
    %94 = tpu.matmul %88, %93, %cst_100 {dimension_numbers = #tpu.dot_dimension_numbers<[1], [0], [0], [1], [0, 0, 1, 1], [], []>} : vector<5x160xf32>, vector<160x80xf32>, vector<5x80xf32> -> vector<5x80xf32>
    %95 = arith.maximumf %91, %94 : vector<5x80xf32>
    %c0_101 = arith.constant 0 : index
    %c0_102 = arith.constant 0 : index
    %96 = vector.load %arg18[%c0_101, %c0_102] : memref<5x80xf32, #tpu.memory_space<vmem>>, vector<5x80xf32>
    tpu.vector_store %arg18[%c0_101, %c0_102], %95 {strides = array<i32>} : memref<5x80xf32, #tpu.memory_space<vmem>>, vector<5x80xf32>,
    %cst_103 = arith.constant 0.000000e+00 : f32
    %97 = vector.broadcast %cst_103 : f32 to vector<1x256xf32>
    %c0_104 = arith.constant 0 : index
    %c0_105 = arith.constant 0 : index
    %98 = vector.load %arg18[%c0_104, %c0_105] : memref<5x80xf32, #tpu.memory_space<vmem>>, vector<1x80xf32>
    %c0_106 = arith.constant 0 : index
    %c0_107 = arith.constant 0 : index
    %c0_108 = arith.constant 0 : index
    %99 = vector.load %arg10[%c0_106, %c0_107, %c0_108] : memref<5x80x256xf32, #tpu.memory_space<vmem>>, vector<1x80x256xf32>
    %100 = vector.shape_cast %99 : vector<1x80x256xf32> to vector<80x256xf32>
    %cst_109 = arith.constant dense<0.000000e+00> : vector<1x256xf32>
    %101 = tpu.matmul %98, %100, %cst_109 {dimension_numbers = #tpu.dot_dimension_numbers<[1], [0], [0], [1], [0, 0, 1, 1], [], []>} : vector<1x80xf32>, vector<80x256xf32>, vector<1x256xf32> -> vector<1x256xf32>
    %102 = arith.addf %97, %101 : vector<1x256xf32>
    %c1_110 = arith.constant 1 : index
    %c0_111 = arith.constant 0 : index
    %103 = vector.load %arg18[%c1_110, %c0_111] : memref<5x80xf32, #tpu.memory_space<vmem>>, vector<1x80xf32>
    %c1_112 = arith.constant 1 : index
    %c0_113 = arith.constant 0 : index
    %c0_114 = arith.constant 0 : index
    %104 = vector.load %arg10[%c1_112, %c0_113, %c0_114] : memref<5x80x256xf32, #tpu.memory_space<vmem>>, vector<1x80x256xf32>
    %105 = vector.shape_cast %104 : vector<1x80x256xf32> to vector<80x256xf32>
    %cst_115 = arith.constant dense<0.000000e+00> : vector<1x256xf32>
    %106 = tpu.matmul %103, %105, %cst_115 {dimension_numbers = #tpu.dot_dimension_numbers<[1], [0], [0], [1], [0, 0, 1, 1], [], []>} : vector<1x80xf32>, vector<80x256xf32>, vector<1x256xf32> -> vector<1x256xf32>
    %107 = arith.addf %102, %106 : vector<1x256xf32>
    %c2_116 = arith.constant 2 : index
    %c0_117 = arith.constant 0 : index
    %108 = vector.load %arg18[%c2_116, %c0_117] : memref<5x80xf32, #tpu.memory_space<vmem>>, vector<1x80xf32>
    %c2_118 = arith.constant 2 : index
    %c0_119 = arith.constant 0 : index
    %c0_120 = arith.constant 0 : index
    %109 = vector.load %arg10[%c2_118, %c0_119, %c0_120] : memref<5x80x256xf32, #tpu.memory_space<vmem>>, vector<1x80x256xf32>
    %110 = vector.shape_cast %109 : vector<1x80x256xf32> to vector<80x256xf32>
    %cst_121 = arith.constant dense<0.000000e+00> : vector<1x256xf32>
    %111 = tpu.matmul %108, %110, %cst_121 {dimension_numbers = #tpu.dot_dimension_numbers<[1], [0], [0], [1], [0, 0, 1, 1], [], []>} : vector<1x80xf32>, vector<80x256xf32>, vector<1x256xf32> -> vector<1x256xf32>
    %112 = arith.addf %107, %111 : vector<1x256xf32>
    %c3_122 = arith.constant 3 : index
    %c0_123 = arith.constant 0 : index
    %113 = vector.load %arg18[%c3_122, %c0_123] : memref<5x80xf32, #tpu.memory_space<vmem>>, vector<1x80xf32>
    %c3_124 = arith.constant 3 : index
    %c0_125 = arith.constant 0 : index
    %c0_126 = arith.constant 0 : index
    %114 = vector.load %arg10[%c3_124, %c0_125, %c0_126] : memref<5x80x256xf32, #tpu.memory_space<vmem>>, vector<1x80x256xf32>
    %115 = vector.shape_cast %114 : vector<1x80x256xf32> to vector<80x256xf32>
    %cst_127 = arith.constant dense<0.000000e+00> : vector<1x256xf32>
    %116 = tpu.matmul %113, %115, %cst_127 {dimension_numbers = #tpu.dot_dimension_numbers<[1], [0], [0], [1], [0, 0, 1, 1], [], []>} : vector<1x80xf32>, vector<80x256xf32>, vector<1x256xf32> -> vector<1x256xf32>
    %117 = arith.addf %112, %116 : vector<1x256xf32>
    %c4_128 = arith.constant 4 : index
    %c0_129 = arith.constant 0 : index
    %118 = vector.load %arg18[%c4_128, %c0_129] : memref<5x80xf32, #tpu.memory_space<vmem>>, vector<1x80xf32>
    %c4_130 = arith.constant 4 : index
    %c0_131 = arith.constant 0 : index
    %c0_132 = arith.constant 0 : index
    %119 = vector.load %arg10[%c4_130, %c0_131, %c0_132] : memref<5x80x256xf32, #tpu.memory_space<vmem>>, vector<1x80x256xf32>
    %120 = vector.shape_cast %119 : vector<1x80x256xf32> to vector<80x256xf32>
    %cst_133 = arith.constant dense<0.000000e+00> : vector<1x256xf32>
    %121 = tpu.matmul %118, %120, %cst_133 {dimension_numbers = #tpu.dot_dimension_numbers<[1], [0], [0], [1], [0, 0, 1, 1], [], []>} : vector<1x80xf32>, vector<80x256xf32>, vector<1x256xf32> -> vector<1x256xf32>
    %122 = arith.addf %117, %121 : vector<1x256xf32>
    %c0_134 = arith.constant 0 : index
    %c0_135 = arith.constant 0 : index
    %123 = vector.load %arg11[%c0_134, %c0_135] : memref<1x256xf32, #tpu.memory_space<vmem>>, vector<1x256xf32>
    %124 = arith.addf %122, %123 : vector<1x256xf32>
    %cst_136 = arith.constant 0.000000e+00 : f32
    %125 = vector.broadcast %cst_136 : f32 to vector<1x256xf32>
    %126 = arith.maximumf %124, %125 : vector<1x256xf32>
    %c0_137 = arith.constant 0 : index
    %c0_138 = arith.constant 0 : index
    %127 = vector.load %arg12[%c0_137, %c0_138] : memref<256x128xf32, #tpu.memory_space<vmem>>, vector<256x128xf32>
    %cst_139 = arith.constant dense<0.000000e+00> : vector<1x128xf32>
    %128 = tpu.matmul %126, %127, %cst_139 {dimension_numbers = #tpu.dot_dimension_numbers<[1], [0], [0], [1], [0, 0, 1, 1], [], []>} : vector<1x256xf32>, vector<256x128xf32>, vector<1x128xf32> -> vector<1x128xf32>
    %c0_140 = arith.constant 0 : index
    %c0_141 = arith.constant 0 : index
    %129 = vector.load %arg13[%c0_140, %c0_141] : memref<1x128xf32, #tpu.memory_space<vmem>>, vector<1x128xf32>
    %130 = arith.addf %128, %129 : vector<1x128xf32>
    %cst_142 = arith.constant 0.000000e+00 : f32
    %131 = vector.broadcast %cst_142 : f32 to vector<1x128xf32>
    %132 = arith.maximumf %130, %131 : vector<1x128xf32>
    %c0_143 = arith.constant 0 : index
    %c0_144 = arith.constant 0 : index
    %133 = vector.load %arg14[%c0_143, %c0_144] : memref<128x128xf32, #tpu.memory_space<vmem>>, vector<128x128xf32>
    %cst_145 = arith.constant dense<0.000000e+00> : vector<1x128xf32>
    %134 = tpu.matmul %132, %133, %cst_145 {dimension_numbers = #tpu.dot_dimension_numbers<[1], [0], [0], [1], [0, 0, 1, 1], [], []>} : vector<1x128xf32>, vector<128x128xf32>, vector<1x128xf32> -> vector<1x128xf32>
    %c0_146 = arith.constant 0 : index
    %c0_147 = arith.constant 0 : index
    %135 = vector.load %arg15[%c0_146, %c0_147] : memref<1x128xf32, #tpu.memory_space<vmem>>, vector<1x128xf32>
    %136 = arith.addf %134, %135 : vector<1x128xf32>
    %c0_148 = arith.constant 0 : index
    %c0_149 = arith.constant 0 : index
    %c0_150 = arith.constant 0 : index
    %137 = vector.load %arg16[%c0_148, %c0_149, %c0_150] : memref<1x1x128xf32, #tpu.memory_space<vmem>>, vector<1x1x128xf32>
    %138 = vector.shape_cast %137 : vector<1x1x128xf32> to vector<1x128xf32>
    %139 = vector.shape_cast %136 : vector<1x128xf32> to vector<1x1x128xf32>
    tpu.vector_store %arg16[%c0_148, %c0_149, %c0_150], %139 {strides = array<i32>} : memref<1x1x128xf32, #tpu.memory_space<vmem>>, vector<1x1x128xf32>,
    return
  }
  func.func @transform_0(%arg0: i32) -> (i32, i32, i32) {
    %c0_i32 = arith.constant 0 : i32
    %c0_i32_0 = arith.constant 0 : i32
    %c0_i32_1 = arith.constant 0 : i32
    return %arg0, %c0_i32, %c0_i32_0 : i32, i32, i32
  }
  func.func @transform_1(%arg0: i32) -> (i32, i32, i32) {
    %c0_i32 = arith.constant 0 : i32
    %c0_i32_0 = arith.constant 0 : i32
    %c0_i32_1 = arith.constant 0 : i32
    %c0_i32_2 = arith.constant 0 : i32
    return %c0_i32, %c0_i32_0, %c0_i32_1 : i32, i32, i32
  }
  func.func @transform_2(%arg0: i32) -> (i32, i32) {
    %c0_i32 = arith.constant 0 : i32
    %c0_i32_0 = arith.constant 0 : i32
    %c0_i32_1 = arith.constant 0 : i32
    return %c0_i32, %c0_i32_0 : i32, i32
  }
  func.func @transform_3(%arg0: i32) -> (i32, i32, i32) {
    %c0_i32 = arith.constant 0 : i32
    %c0_i32_0 = arith.constant 0 : i32
    %c0_i32_1 = arith.constant 0 : i32
    %c0_i32_2 = arith.constant 0 : i32
    return %c0_i32, %c0_i32_0, %c0_i32_1 : i32, i32, i32
  }
  func.func @transform_4(%arg0: i32) -> (i32, i32, i32) {
    %c0_i32 = arith.constant 0 : i32
    %c0_i32_0 = arith.constant 0 : i32
    %c0_i32_1 = arith.constant 0 : i32
    %c0_i32_2 = arith.constant 0 : i32
    return %c0_i32, %c0_i32_0, %c0_i32_1 : i32, i32, i32
  }
  func.func @transform_5(%arg0: i32) -> (i32, i32, i32) {
    %c0_i32 = arith.constant 0 : i32
    %c0_i32_0 = arith.constant 0 : i32
    %c0_i32_1 = arith.constant 0 : i32
    %c0_i32_2 = arith.constant 0 : i32
    return %c0_i32, %c0_i32_0, %c0_i32_1 : i32, i32, i32
  }
  func.func @transform_6(%arg0: i32) -> (i32, i32) {
    %c0_i32 = arith.constant 0 : i32
    %c0_i32_0 = arith.constant 0 : i32
    %c0_i32_1 = arith.constant 0 : i32
    return %c0_i32, %c0_i32_0 : i32, i32
  }
  func.func @transform_7(%arg0: i32) -> (i32, i32, i32) {
    %c0_i32 = arith.constant 0 : i32
    %c0_i32_0 = arith.constant 0 : i32
    %c0_i32_1 = arith.constant 0 : i32
    %c0_i32_2 = arith.constant 0 : i32
    return %c0_i32, %c0_i32_0, %c0_i32_1 : i32, i32, i32
  }
  func.func @transform_8(%arg0: i32) -> (i32, i32, i32) {
    %c0_i32 = arith.constant 0 : i32
    %c0_i32_0 = arith.constant 0 : i32
    %c0_i32_1 = arith.constant 0 : i32
    %c0_i32_2 = arith.constant 0 : i32
    return %c0_i32, %c0_i32_0, %c0_i32_1 : i32, i32, i32
  }
  func.func @transform_9(%arg0: i32) -> (i32, i32, i32) {
    %c0_i32 = arith.constant 0 : i32
    %c0_i32_0 = arith.constant 0 : i32
    %c0_i32_1 = arith.constant 0 : i32
    %c0_i32_2 = arith.constant 0 : i32
    return %c0_i32, %c0_i32_0, %c0_i32_1 : i32, i32, i32
  }
  func.func @transform_10(%arg0: i32) -> (i32, i32) {
    %c0_i32 = arith.constant 0 : i32
    %c0_i32_0 = arith.constant 0 : i32
    %c0_i32_1 = arith.constant 0 : i32
    return %c0_i32, %c0_i32_0 : i32, i32
  }
  func.func @transform_11(%arg0: i32) -> (i32, i32) {
    %c0_i32 = arith.constant 0 : i32
    %c0_i32_0 = arith.constant 0 : i32
    %c0_i32_1 = arith.constant 0 : i32
    return %c0_i32, %c0_i32_0 : i32, i32
  }
  func.func @transform_12(%arg0: i32) -> (i32, i32) {
    %c0_i32 = arith.constant 0 : i32
    %c0_i32_0 = arith.constant 0 : i32
    %c0_i32_1 = arith.constant 0 : i32
    return %c0_i32, %c0_i32_0 : i32, i32
  }
  func.func @transform_13(%arg0: i32) -> (i32, i32) {
    %c0_i32 = arith.constant 0 : i32
    %c0_i32_0 = arith.constant 0 : i32
    %c0_i32_1 = arith.constant 0 : i32
    return %c0_i32, %c0_i32_0 : i32, i32
  }
  func.func @transform_14(%arg0: i32) -> (i32, i32) {
    %c0_i32 = arith.constant 0 : i32
    %c0_i32_0 = arith.constant 0 : i32
    %c0_i32_1 = arith.constant 0 : i32
    return %c0_i32, %c0_i32_0 : i32, i32
  }
  func.func @transform_15(%arg0: i32) -> (i32, i32, i32) {
    %c0_i32 = arith.constant 0 : i32
    %c0_i32_0 = arith.constant 0 : i32
    %c0_i32_1 = arith.constant 0 : i32
    return %arg0, %c0_i32, %c0_i32_0 : i32, i32, i32
  }
}

</mosaic_0001>

<bundles_post_ra>
// kernel: _lenet_pallas.1
= control target key start
LH: loop header
LB: loop body
LE: loop exit
PB: predicated region body
PF: predicated region fallthrough
CT: control target
= control target key end

     0   :  { %20 = vsyncpa [#allocation5], 0  ;;  %s6604_s0 = inlined_call_operand.vmem [shape: f32[2,32,128], index: 0, kind: input, shape index: {}]   ;;  %s6605_s1 = inlined_call_operand.vmem [shape: f32[5,128,224], index: 1, kind: input, shape index: {}]   ;;  %s6606_s2 = inlined_call_operand.vmem [shape: f32[1,224], index: 2, kind: input, shape index: {}]   ;;  %s6607_s3 = inlined_call_operand.vmem [shape: f32[2,14,28], index: 3, kind: input, shape index: {}]   ;;  %s6608_s4 = inlined_call_operand.vmem [shape: f32[2,224,112], index: 4, kind: input, shape index: {}]   ;;  %s6609_s5 = inlined_call_operand.vmem [shape: f32[5,112,160], index: 5, kind: input, shape index: {}]   ;;  %s6610_s6 = inlined_call_operand.vmem [shape: f32[1,160], index: 6, kind: input, shape index: {}]   ;;  %s6611_s7 = inlined_call_operand.vmem [shape: f32[2,5,10], index: 7, kind: input, shape index: {}]   ;;  %s6612_s8 = inlined_call_operand.vmem [shape: f32[2,160,80], index: 8, kind: input, shape index: {}]   ;;  %s6613_s9 = inlined_call_operand.vmem [shape: f32[5,80,256], index: 9, kind: input, shape index: {}]   ;;  %s6614_s10 = inlined_call_operand.vmem [shape: f32[1,256], index: 10, kind: input, shape index: {}]   ;;  %s6615_s11 = inlined_call_operand.vmem [shape: f32[256,128], index: 11, kind: input, shape index: {}]   ;;  %s6616_s12 = inlined_call_operand.vmem [shape: f32[1,128], index: 12, kind: input, shape index: {}]   ;;  %s6617_s13 = inlined_call_operand.vmem [shape: f32[128,128], index: 13, kind: input, shape index: {}]   ;;  %s6618_s14 = inlined_call_operand.vmem [shape: f32[1,128], index: 14, kind: input, shape index: {}]   ;;  %s6619_s15 = inlined_call_operand.hbm [shape: f32[2,1,128], index: 15, kind: output, shape index: {}]  }
   0x1   :  { %22 = vsyncpa [#allocation5 + $0x1], 0  ;;  %s4671_s18 = smov 0   ;;  %s4673_s19 = smov 0  }
   0x2   :  { %s4675_s20 = smov 0   ;;  %s4677_s21 = smov 0  }
   0x3 LB: > { %6626 = sst [smem:[#allocation7_spill]] %s4572_s18  ;;  %s4692_s22 = sadd.s32 4294967295, %s4584_s21   ;;  %s4584_s21 = sphi %s4677_s21, %s6637_s21   ;;  %s4580_s20 = sphi %s4675_s20, %s6639_s20   ;;  %s4576_s19 = sphi %s4673_s19, %s6641_s19   ;;  %s4572_s18 = sphi %s4671_s18, %s6640_s18  }
   0x4   : > { %6627 = sst [smem:[#allocation8_spill]] %s4580_s20  ;;  %s3288_s23 = sadd.s32 4294967294, %s4584_s21  }
   0x5   : > { %6628 = sst [smem:[#allocation9_spill]] %s4584_s21  ;;  %s4696_s24 = sadd.s32 1, %s4584_s21  }
   0x6   : > { %6629 = sst [smem:[#allocation10_spill]] %s4696_s24  ;;  %s355_s25 = sadd.s32 1, %s4580_s20 }
   0x7   : > { %s352_s26 = ssub.s32 %s4584_s21, %s4696_s24  ;;  %p365_p0 = scmp.ne.s32.totalorder %s4580_s20, %s4576_s19 }
   0x8   : > { %p353_p1 = scmp.eq.s32.totalorder %s352_s26, 0  ;;  %p366_p2 = scmp.eq.s32.totalorder %s4692_s22, 1 }
   0x9   : > { %p371_p3 = scmp.ne.s32.totalorder %s4576_s19, %s4572_s18  ;;  %p372_p4 = scmp.eq.s32.totalorder %s3288_s23, 1 }
   0xa   : > { %s4707_s27 = scalar_select %p353_p1, %s4580_s20, %s355_s25  }
   0xb   : > { %p4709_p5 = por %p366_p2, %p365_p0  ;;  %p4713_p6 = por %p372_p4, %p371_p3 }
   0xc   : > { %6630 = sst [smem:[#allocation11_spill]] %s4707_s27  ;;  %p3291_p7 = scmp.ge.s32.totalorder %s4584_s21, 1 }
   0xd   : > { %s6632_s29 = scalar_select %p4713_p6, 1, 0 }
   0xe   : > { %p440_p8 = scmp.lt.s32.totalorder %s4584_s21, 3 }
   0xf   : > { %6633 = sst [smem:[#allocation12_spill]] %s6632_s29 }
  0x10   : > { %p441_p9 = pnand %p3291_p7, %p440_p8 }
  0x11   : > { %v3295_v0 = vld [vmem:[%s6605_s1 + $0x108] sm:$0xff] (!%p441_p9)  ;;  %v3297_v1 = vld [vmem:[%s6605_s1 + $0x118] sm:$0xff] (!%p441_p9)  ;;  %v3294_v2 = vld [vmem:[%s6605_s1 + $0x100] sm:$0xff] (!%p441_p9)  ;;  %v4586_v7 = vmov (!%p441_p9), 0.0   ;;  %p487_p10 = scmp.lt.s32.totalorder (!%p441_p9), %s4692_s22, 1  ;;  %vm1182_vm0 = vcmask (!%p441_p9), 1043456  }
  0x12   : > { %444 = sbr.rel (%p441_p9) target bundleno = 2461 (0x99d), region = 80  ;;  %v3791_v3 = vpack.c.bf16 (!%p441_p9), %v3297_v1, %v3295_v0  ;;  %v3296_v4 = vld [vmem:[%s6605_s1 + $0x110] sm:$0xff] (!%p441_p9)  ;;  %v3299_v5 = vld [vmem:[%s6605_s1 + $0x128] sm:$0xff] (!%p441_p9)  ;;  %v3301_v6 = vld [vmem:[%s6605_s1 + $0x138] sm:$0xff] (!%p441_p9)  ;;  %629 = vmatprep.mubr.f32.mxu0 (!%p441_p9), %v4586_v7  ;;  %1339 = vmatprep.mubr.f32.mxu1 (!%p441_p9), %v4586_v7  ;;  %vm4587_vm1 = vmmov (!%p441_p9), 1   ;;  %vm1175_vm3 = vcmask (!%p441_p9), 228352  }
  0x13   : > { %v3793_v8 = vpack.c.bf16 (!%p441_p9), %v3296_v4, %v3294_v2  ;;  %v3795_v9 = vpack.c.bf16 (!%p441_p9), %v3301_v6, %v3299_v5  ;;  %v3298_v10 = vld [vmem:[%s6605_s1 + $0x120] sm:$0xff] (!%p441_p9)  ;;  %v3300_v11 = vld [vmem:[%s6605_s1 + $0x130] sm:$0xff] (!%p441_p9)  ;;  %v3303_v12 = vld [vmem:[%s6605_s1 + $0x148] sm:$0xff] (!%p441_p9)  ;;  %vm1384_vm4 = vcmask (!%p441_p9), 785408   ;;  %vm1572_vm5 = vcmask (!%p441_p9), 916480   ;;  %s3700_s27 = sshll.u32 (!%p441_p9), %s4692_s22, 4 }
  0x14   : > { %3792 = vmatprep.subr.bf16.mxu0 (!%p441_p9), %v3791_v3  ;;  %v3305_v13 = vld [vmem:[%s6605_s1 + $0x158] sm:$0xff] (!%p441_p9)  ;;  %v3797_v14 = vpack.c.bf16 (!%p441_p9), %v3300_v11, %v3298_v10  ;;  %v3302_v16 = vld [vmem:[%s6605_s1 + $0x140] sm:$0xff] (!%p441_p9)  ;;  %v3304_v17 = vld [vmem:[%s6605_s1 + $0x150] sm:$0xff] (!%p441_p9)  ;;  %vm1574_vm6 = vcmask (!%p441_p9), 914432   ;;  %vm2182_vm7 = vcmask (!%p441_p9), 1041408   ;;  %vm2178_vm9 = vcmask (!%p441_p9), 80896   ;;  %s6562_s26 = scalar_lea.hbm (!%p441_p9), %s6619_s15, %s3700_s27 }
  0x15   : > { %3794 = vmatpush1.bf16.msra.mxu0 (!%p441_p9), %v3793_v8  ;;  %v3799_v15 = vpack.c.bf16 (!%p441_p9), %v3305_v13, %v3303_v12  ;;  %v3307_v18 = vld [vmem:[%s6605_s1 + $0x168] sm:$0xff] (!%p441_p9)  ;;  %v3309_v19 = vld [vmem:[%s6605_s1 + $0x178] sm:$0xff] (!%p441_p9)  ;;  %v3801_v20 = vpack.c.bf16 (!%p441_p9), %v3304_v17, %v3302_v16  ;;  %v3306_v22 = vld [vmem:[%s6605_s1 + $0x160] sm:$0xff] (!%p441_p9)  ;;  %vm2358_vm10 = vcmask (!%p441_p9), 261120   ;;  %vm2524_vm11 = vcmask (!%p441_p9), 651264  }
  0x16   : > { %3796 = vmatprep.subr.bf16.mxu0 (!%p441_p9), %v3795_v9  ;;  %v3803_v21 = vpack.c.bf16 (!%p441_p9), %v3309_v19, %v3307_v18  ;;  %v3308_v23 = vld [vmem:[%s6605_s1 + $0x170] sm:$0xff] (!%p441_p9)  ;;  %v3311_v24 = vld [vmem:[%s6605_s1 + $0x188] sm:$0xff] (!%p441_p9)  ;;  %v3313_v25 = vld [vmem:[%s6605_s1 + $0x198] sm:$0xff] (!%p441_p9)  ;;  %vm2569_vm12 = vcmask (!%p441_p9), 654336   ;;  %vm4589_vm13 = vmmov (!%p441_p9), 0  }
  0x17   : > { %v3805_v26 = vpack.c.bf16 (!%p441_p9), %v3308_v23, %v3306_v22  ;;  %v3807_v27 = vpack.c.bf16 (!%p441_p9), %v3313_v25, %v3311_v24  ;;  %v3310_v28 = vld [vmem:[%s6605_s1 + $0x180] sm:$0xff] (!%p441_p9)  ;;  %v3312_v29 = vld [vmem:[%s6605_s1 + $0x190] sm:$0xff] (!%p441_p9)  ;;  %v3315_v30 = vld [vmem:[%s6605_s1 + $0x1a8] sm:$0xff] (!%p441_p9) }
  0x18   : > { %v3317_v31 = vld [vmem:[%s6605_s1 + $0x1b8] sm:$0xff] (!%p441_p9)  ;;  %v3809_v32 = vpack.c.bf16 (!%p441_p9), %v3312_v29, %v3310_v28  ;;  %v3314_v34 = vld [vmem:[%s6605_s1 + $0x1a0] sm:$0xff] (!%p441_p9)  ;;  %v3316_v35 = vld [vmem:[%s6605_s1 + $0x1b0] sm:$0xff] (!%p441_p9) }
  0x19   : > { %3798 = vmatpush1.bf16.msra.mxu0 %v3797_v14  ;;  %v3811_v33 = vpack.c.bf16 %v3317_v31, %v3315_v30  ;;  %v3319_v36 = vld [vmem:[%s6605_s1 + $0x1c8] sm:$0xff]  ;;  %v3321_v37 = vld [vmem:[%s6605_s1 + $0x1d8] sm:$0xff]  ;;  %v3813_v38 = vpack.c.bf16 %v3316_v35, %v3314_v34  ;;  %v3318_v40 = vld [vmem:[%s6605_s1 + $0x1c0] sm:$0xff]  ;;  %s488_s24 = scalar_select %p487_p10, %s4692_s22, 1 }
  0x1a   : > { %3800 = vmatprep.subr.bf16.mxu0 %v3799_v15  ;;  %v3815_v39 = vpack.c.bf16 %v3321_v37, %v3319_v36  ;;  %v3320_v41 = vld [vmem:[%s6605_s1 + $0x1d0] sm:$0xff]  ;;  %v3323_v42 = vld [vmem:[%s6605_s1 + $0x1e8] sm:$0xff]  ;;  %v3325_v43 = vld [vmem:[%s6605_s1 + $0x1f8] sm:$0xff]  ;;  %s4590_s22 = smov [#allocation4]  }
  0x1b   : > { %v3817_v44 = vpack.c.bf16 %v3320_v41, %v3318_v40  ;;  %v3819_v45 = vpack.c.bf16 %v3325_v43, %v3323_v42  ;;  %v3322_v46 = vld [vmem:[%s6605_s1 + $0x1e0] sm:$0xff]  ;;  %v3324_v47 = vld [vmem:[%s6605_s1 + $0x1f0] sm:$0xff]  ;;  %v497_v48 = vld [vmem:[%s6605_s1 + $0x8] sm:$0xff]  ;;  %s3703_s20 = sshll.u32 %s488_s24, 5  ;;  %s485_s24 = sand.u32 1, %s4576_s19  }
  0x1c   : > { %v499_v49 = vld [vmem:[%s6605_s1 + $0x18] sm:$0xff]  ;;  %v3821_v50 = vpack.c.bf16 %v3324_v47, %v3322_v46  ;;  %s4828_s18 = scalar_lea.vmem %s6604_s0, %s3703_s20  ;;  %v496_v52 = vld [vmem:[%s6605_s1] sm:$0xff]  ;;  %v498_v53 = vld [vmem:[%s6605_s1 + $0x10] sm:$0xff]  ;;  %s486_s29 = scalar_lea.vmem [#allocation4], %s485_s24 }
  0x1d   : > { %3802 = vmatpush1.bf16.msra.mxu0 %v3801_v20  ;;  %v3823_v51 = vpack.c.bf16 %v499_v49, %v497_v48  ;;  %v501_v54 = vld [vmem:[%s6605_s1 + $0x28] sm:$0xff]  ;;  %v503_v55 = vld [vmem:[%s6605_s1 + $0x38] sm:$0xff]  ;;  %v3825_v57 = vpack.c.bf16 %v498_v53, %v496_v52  ;;  %v500_v59 = vld [vmem:[%s6605_s1 + $0x20] sm:$0xff]  ;;  %s3233_s23 = sshll.u32 %s486_s29, 4  ;;  %s3221_s30 = scalar_lea.sflag [#allocation5], %s485_s24  ;;  %s6564_s23 = int_to_ptr.vmem [resolvable:$true] %s3233_s23 }
  0x1e   : > { %3804 = vmatprep.subr.bf16.mxu0 %v3803_v21  ;;  %v528_v56 = vld [vmem:[%s4828_s18 + $0x1] sm:$0xff]  ;;  %v3827_v58 = vpack.c.bf16 %v503_v55, %v501_v54  ;;  %v502_v60 = vld [vmem:[%s6605_s1 + $0x30] sm:$0xff]  ;;  %v507_v62 = vld [vmem:[%s6605_s1 + $0x58] sm:$0xff]  ;;  %s4522_s21 = scalar_lea.vmem %s6564_s23, 16  ;;  %s4526_s16 = sshll.u32 %s4590_s22, 4  ;;  %s4527_s16 = int_to_ptr.vmem [resolvable:$false] %s4526_s16 }
  0x1f   : > { %v505_v61 = vld [vmem:[%s6605_s1 + $0x48] sm:$0xff]  ;;  %v3829_v63 = vpack.c.bf16 %v502_v60, %v500_v59  ;;  %v504_v2 = vld [vmem:[%s6605_s1 + $0x40] sm:$0xff]  ;;  %v506_v3 = vld [vmem:[%s6605_s1 + $0x50] sm:$0xff]  ;;  %p4523_p11 = scmp.ne.s32.totalorder %s6564_s23, %s4522_s21  ;;  %s4528_s17 = scalar_lea.vmem %s4527_s16, 32 }
  0x20   : > { %v529_v0 = vld [vmem:[%s4828_s18 + $0x9] sm:$0xff]  ;;  %v3831_v1 = vpack.c.bf16 %v507_v62, %v505_v61  ;;  %v511_v5 = vld [vmem:[%s6605_s1 + $0x78] sm:$0xff]  ;;  %v3833_v6 = vpack.c.bf16 %v506_v3, %v504_v2  ;;  %v508_v10 = vld [vmem:[%s6605_s1 + $0x60] sm:$0xff]  ;;  %p4529_p0 = scmp.lt.s32.totalorder %s6564_s23, %s4527_s16  ;;  %p4530_p1 = scmp.lt.s32.totalorder %s4528_s17, %s4522_s21 }
  0x21   : > { %3806 = vmatpush1.bf16.msra.mxu0 %v3805_v26  ;;  %v509_v4 = vld [vmem:[%s6605_s1 + $0x68] sm:$0xff]  ;;  %v530_v8 = vld [vmem:[%s4828_s18 + $0x11] sm:$0xff]  ;;  %v531_v15 = vld [vmem:[%s4828_s18 + $0x19] sm:$0xf]  ;;  %p4524_p12 = pnand %p4523_p11, %p4709_p5 }
  0x22   : > { %3808 = vmatprep.subr.bf16.mxu0 %v3807_v27  ;;  %v3835_v9 = vpack.c.bf16 %v511_v5, %v509_v4  ;;  %v510_v11 = vld [vmem:[%s6605_s1 + $0x70] sm:$0xff]  ;;  %v513_v12 = vld [vmem:[%s6605_s1 + $0x88] sm:$0xff]  ;;  %v515_v13 = vld [vmem:[%s6605_s1 + $0x98] sm:$0xff]  ;;  %p4531_p2 = por %p4530_p1, %p4529_p0 }
  0x23   : > { %v3837_v14 = vpack.c.bf16 %v510_v11, %v508_v10  ;;  %v3839_v16 = vpack.c.bf16 %v515_v13, %v513_v12  ;;  %v512_v17 = vld [vmem:[%s6605_s1 + $0x80] sm:$0xff]  ;;  %v514_v18 = vld [vmem:[%s6605_s1 + $0x90] sm:$0xff]  ;;  %v517_v19 = vld [vmem:[%s6605_s1 + $0xa8] sm:$0xff]  ;;  %p4525_p13 = pneg %p4524_p12 }
  0x24   : > { %v519_v20 = vld [vmem:[%s6605_s1 + $0xb8] sm:$0xff]  ;;  %v3841_v21 = vpack.c.bf16 %v514_v18, %v512_v17  ;;  %v516_v23 = vld [vmem:[%s6605_s1 + $0xa0] sm:$0xff]  ;;  %v518_v24 = vld [vmem:[%s6605_s1 + $0xb0] sm:$0xff] }
  0x25   : > { %3810 = vmatpush1.bf16.msra.mxu0 %v3809_v32  ;;  %v3843_v22 = vpack.c.bf16 %v519_v20, %v517_v19  ;;  %v521_v25 = vld [vmem:[%s6605_s1 + $0xc8] sm:$0xff]  ;;  %v523_v26 = vld [vmem:[%s6605_s1 + $0xd8] sm:$0xff]  ;;  %v3845_v27 = vpack.c.bf16 %v518_v24, %v516_v23  ;;  %v520_v29 = vld [vmem:[%s6605_s1 + $0xc0] sm:$0xff]  ;;  %p4532_p3 = pnand %p4531_p2, %p4525_p13 }
  0x26   : > { %3812 = vmatprep.subr.bf16.mxu0 %v3811_v33  ;;  %v3847_v28 = vpack.c.bf16 %v523_v26, %v521_v25  ;;  %v522_v30 = vld [vmem:[%s6605_s1 + $0xd0] sm:$0xff]  ;;  %v525_v31 = vld [vmem:[%s6605_s1 + $0xe8] sm:$0xff]  ;;  %v527_v32 = vld [vmem:[%s6605_s1 + $0xf8] sm:$0xff] }
  0x27   : > { %v3849_v33 = vpack.c.bf16 %v522_v30, %v520_v29  ;;  %v3851_v34 = vpack.c.bf16 %v527_v32, %v525_v31  ;;  %v524_v35 = vld [vmem:[%s6605_s1 + $0xe0] sm:$0xff]  ;;  %v526_v36 = vld [vmem:[%s6605_s1 + $0xf0] sm:$0xff]  ;;  %v3327_v37 = vld [vmem:[%s6605_s1 + $0x208] sm:$0xff] }
  0x28   : > { %v3326_v41 = vld [vmem:[%s6605_s1 + $0x200] sm:$0xff]  ;;  %v3328_v42 = vld [vmem:[%s6605_s1 + $0x210] sm:$0xff]  ;;  %v3331_v43 = vld [vmem:[%s6605_s1 + $0x228] sm:$0xff] }
  0x29   : > { %3814 = vmatpush1.bf16.msra.mxu0 %v3813_v38  ;;  %v3329_v38 = vld [vmem:[%s6605_s1 + $0x218] sm:$0xff]  ;;  %v3857_v46 = vpack.c.bf16 %v3328_v42, %v3326_v41  ;;  %v3330_v48 = vld [vmem:[%s6605_s1 + $0x220] sm:$0xff]  ;;  %v3332_v49 = vld [vmem:[%s6605_s1 + $0x230] sm:$0xff] }
  0x2a   : > { %3816 = vmatprep.subr.bf16.mxu0 %v3815_v39  ;;  %v3853_v39 = vpack.c.bf16 %v526_v36, %v524_v35  ;;  %v3855_v40 = vpack.c.bf16 %v3329_v38, %v3327_v37  ;;  %v3861_v52 = vpack.c.bf16 %v3332_v49, %v3330_v48  ;;  %v493_v53 = vld [vmem:[%s4828_s18 + $0x8] sm:$0xff]  ;;  %v3334_v55 = vld [vmem:[%s6605_s1 + $0x240] sm:$0xff]  ;;  %v494_v60 = vld [vmem:[%s4828_s18 + $0x10] sm:$0xff] }
  0x2b   : > { %v3338_v62 = vld [vmem:[%s6605_s1 + $0x260] sm:$0xff]  ;;  %v495_v3 = vld [vmem:[%s4828_s18 + $0x18] sm:$0xf]  ;;  %v3348_v13 = vld [vmem:[%s6605_s1 + $0x2b0] sm:$0xff] }
  0x2c   : > { %v3342_v5 = vld [vmem:[%s6605_s1 + $0x280] sm:$0xff]  ;;  %v3352_v19 = vld [vmem:[%s6605_s1 + $0x2d0] sm:$0xff]  ;;  %v3355_v20 = vld [vmem:[%s6605_s1 + $0x2e8] sm:$0xff] }
  0x2d   : > { %3818 = vmatpush1.bf16.msra.mxu0 %v3817_v44  ;;  %v3333_v44 = vld [vmem:[%s6605_s1 + $0x238] sm:$0xff]  ;;  %v3346_v12 = vld [vmem:[%s6605_s1 + $0x2a0] sm:$0xff]  ;;  %v3356_v25 = vld [vmem:[%s6605_s1 + $0x2f0] sm:$0xff] }
  0x2e   : > { %3820 = vmatprep.subr.bf16.mxu0 %v3819_v45  ;;  %v492_v45 = vld [vmem:[%s4828_s18] sm:$0xff]  ;;  %v3859_v47 = vpack.c.bf16 %v3333_v44, %v3331_v43  ;;  %v3359_v26 = vld [vmem:[%s6605_s1 + $0x308] sm:$0xff]  ;;  %v3360_v31 = vld [vmem:[%s6605_s1 + $0x310] sm:$0xff] }
  0x2f   : > { %v3350_v18 = vld [vmem:[%s6605_s1 + $0x2c0] sm:$0xff]  ;;  %v3363_v32 = vld [vmem:[%s6605_s1 + $0x328] sm:$0xff]  ;;  %v3364_v38 = vld [vmem:[%s6605_s1 + $0x330] sm:$0xff] }
  0x30   : > { %v3354_v24 = vld [vmem:[%s6605_s1 + $0x2e0] sm:$0xff]  ;;  %v744_v42 = vld [vmem:[%s4828_s18 + $0xa] sm:$0xff]  ;;  %v745_v49 = vld [vmem:[%s4828_s18 + $0x12] sm:$0xff] }
  0x31   : > { %3822 = vmatpush1.bf16.msra.mxu0 %v3821_v50  ;;  %v3335_v50 = vld [vmem:[%s6605_s1 + $0x248] sm:$0xff]  ;;  %v3358_v30 = vld [vmem:[%s6605_s1 + $0x300] sm:$0xff]  ;;  %vm3956_vm2 = vmpackc.low %vm1182_vm0, %vm4587_vm1 }
  0x32   : > { %3824 = vmatprep.subr.bf16.mxu0 %v3823_v51  ;;  %v3337_v51 = vld [vmem:[%s6605_s1 + $0x258] sm:$0xff]  ;;  %v3889_v35 = vpack.c.bf16 %v3360_v31, %v3358_v30  ;;  %v3362_v37 = vld [vmem:[%s6605_s1 + $0x320] sm:$0xff]  ;;  %v878_v31 = vld [vmem:[%s4828_s18 + $0xb] sm:$0xff] }
  0x33   : > { %v3863_v54 = vpack.c.bf16 %v3337_v51, %v3335_v50  ;;  %v3893_v41 = vpack.c.bf16 %v3364_v38, %v3362_v37  ;;  %v3366_v44 = vld [vmem:[%s6605_s1 + $0x340] sm:$0xff]  ;;  %v879_v38 = vld [vmem:[%s4828_s18 + $0x13] sm:$0xff]  ;;  %vm4196_vm8 = vmpackc.low %vm2182_vm7, %vm4587_vm1 }
  0x34   : > { %630 = vmatmul.mubr.f32.vlgmr.msra.gmra.mrb[0].mxu0 %v528_v56  ;;  %v3336_v56 = vld [vmem:[%s6605_s1 + $0x250] sm:$0xff]  ;;  %v3370_v51 = vld [vmem:[%s6605_s1 + $0x360] sm:$0xff] }
  0x35   : > { %3826 = vmatpush1.bf16.msra.mxu0 %v3825_v57  ;;  %635 = vmatprep.mubr.f32.mxu0 %v4586_v7  ;;  %v3339_v57 = vld [vmem:[%s6605_s1 + $0x268] sm:$0xff]  ;;  %v3865_v59 = vpack.c.bf16 %v3336_v56, %v3334_v55  ;;  %v746_v56 = vld [vmem:[%s4828_s18 + $0x1a] sm:$0xf] }
  0x36   : > { %3828 = vmatprep.subr.bf16.mxu0 %v3827_v58  ;;  %v3341_v58 = vld [vmem:[%s6605_s1 + $0x278] sm:$0xff] }
  0x37   : > { %v3867_v61 = vpack.c.bf16 %v3341_v58, %v3339_v57  ;;  %v3374_v58 = vld [vmem:[%s6605_s1 + $0x380] sm:$0xff] }
  0x38   : > { %636 = vmatmul.mubr.f32.gmra.mrb[2].mxu0 %v529_v0  ;;  %v3343_v0 = vld [vmem:[%s6605_s1 + $0x288] sm:$0xff] }
  0x39   : > { %3830 = vmatpush1.bf16.msra.mxu0 %v3829_v63  ;;  %641 = vmatprep.mubr.f32.mxu0 %v4586_v7  ;;  %v3340_v63 = vld [vmem:[%s6605_s1 + $0x270] sm:$0xff] }
  0x3a   : > { %3832 = vmatprep.subr.bf16.mxu0 %v3831_v1  ;;  %v3345_v1 = vld [vmem:[%s6605_s1 + $0x298] sm:$0xff]  ;;  %v3869_v2 = vpack.c.bf16 %v3340_v63, %v3338_v62 }
  0x3b   : > { %v3871_v4 = vpack.c.bf16 %v3345_v1, %v3343_v0  ;;  %v3378_v0 = vld [vmem:[%s6605_s1 + $0x3a0] sm:$0xff]  ;;  %v3380_v1 = vld [vmem:[%s6605_s1 + $0x3b0] sm:$0xff] }
  0x3c   : > { %642 = vmatmul.mubr.f32.gmra.mrb[4].mxu0 %v530_v8  ;;  %v3347_v8 = vld [vmem:[%s6605_s1 + $0x2a8] sm:$0xff] }
  0x3d   : > { %3834 = vmatpush1.bf16.msra.mxu0 %v3833_v6  ;;  %647 = vmatprep.mubr.f32.mxu0 %v4586_v7  ;;  %v3344_v6 = vld [vmem:[%s6605_s1 + $0x290] sm:$0xff] }
  0x3e   : > { %3836 = vmatprep.subr.bf16.mxu0 %v3835_v9  ;;  %v3349_v9 = vld [vmem:[%s6605_s1 + $0x2b8] sm:$0xff]  ;;  %v3873_v10 = vpack.c.bf16 %v3344_v6, %v3342_v5  ;;  %v3382_v6 = vld [vmem:[%s6605_s1 + $0x3c0] sm:$0xff] }
  0x3f   : > { %v3875_v11 = vpack.c.bf16 %v3349_v9, %v3347_v8  ;;  %v3384_v8 = vld [vmem:[%s6605_s1 + $0x3d0] sm:$0xff]  ;;  %v3387_v9 = vld [vmem:[%s6605_s1 + $0x3e8] sm:$0xff] }
  0x40   : > { %648 = vmatmul.mubr.f32.gmra.mrb[6].mxu0 %v531_v15  ;;  %v3353_v15 = vld [vmem:[%s6605_s1 + $0x2d8] sm:$0xff] }
  0x41   : > { %3838 = vmatpush1.bf16.msra.mxu0 %v3837_v14  ;;  %718 = vmatprep.mubr.f32.mxu0 %v4586_v7  ;;  %v3351_v14 = vld [vmem:[%s6605_s1 + $0x2c8] sm:$0xff] }
  0x42   : > { %3840 = vmatprep.subr.bf16.mxu0 %v3839_v16  ;;  %v3877_v16 = vpack.c.bf16 %v3348_v13, %v3346_v12  ;;  %v3879_v17 = vpack.c.bf16 %v3353_v15, %v3351_v14  ;;  %v3386_v13 = vld [vmem:[%s6605_s1 + $0x3e0] sm:$0xff]  ;;  %v3388_v14 = vld [vmem:[%s6605_s1 + $0x3f0] sm:$0xff]  ;;  %v3391_v15 = vld [vmem:[%s6605_s1 + $0x408] sm:$0xff] }
  0x45   : > { %3842 = vmatpush1.bf16.msra.mxu0 %v3841_v21  ;;  %v3357_v21 = vld [vmem:[%s6605_s1 + $0x2f8] sm:$0xff] }
  0x46   : > { %3844 = vmatprep.subr.bf16.mxu0 %v3843_v22  ;;  %v3881_v22 = vpack.c.bf16 %v3352_v19, %v3350_v18  ;;  %v3883_v23 = vpack.c.bf16 %v3357_v21, %v3355_v20  ;;  %v3390_v19 = vld [vmem:[%s6605_s1 + $0x400] sm:$0xff]  ;;  %v3392_v20 = vld [vmem:[%s6605_s1 + $0x410] sm:$0xff]  ;;  %v3395_v21 = vld [vmem:[%s6605_s1 + $0x428] sm:$0xff] }
  0x49   : > { %3846 = vmatpush1.bf16.msra.mxu0 %v3845_v27  ;;  %v3361_v27 = vld [vmem:[%s6605_s1 + $0x318] sm:$0xff] }
  0x4a   : > { %3848 = vmatprep.subr.bf16.mxu0 %v3847_v28  ;;  %v3885_v28 = vpack.c.bf16 %v3356_v25, %v3354_v24  ;;  %v3887_v29 = vpack.c.bf16 %v3361_v27, %v3359_v26  ;;  %v3921_v24 = vpack.c.bf16 %v3392_v20, %v3390_v19  ;;  %v3394_v26 = vld [vmem:[%s6605_s1 + $0x420] sm:$0xff]  ;;  %v3396_v27 = vld [vmem:[%s6605_s1 + $0x430] sm:$0xff] }
  0x4b   : > { %v3925_v30 = vpack.c.bf16 %v3396_v27, %v3394_v26 }
  0x4d   : > { %3850 = vmatpush1.bf16.msra.mxu0 %v3849_v33  ;;  %v3365_v33 = vld [vmem:[%s6605_s1 + $0x338] sm:$0xff] }
  0x4e   : > { %3852 = vmatprep.subr.bf16.mxu0 %v3851_v34  ;;  %v743_v34 = vld [vmem:[%s4828_s18 + $0x2] sm:$0xff]  ;;  %v3891_v36 = vpack.c.bf16 %v3365_v33, %v3363_v32 }
  0x4f   : > { %v3398_v33 = vld [vmem:[%s6605_s1 + $0x440] sm:$0xff] }
  0x51   : > { %3854 = vmatpush1.bf16.msra.mxu0 %v3853_v39  ;;  %v3367_v39 = vld [vmem:[%s6605_s1 + $0x348] sm:$0xff] }
  0x52   : > { %3856 = vmatprep.subr.bf16.mxu0 %v3855_v40  ;;  %v3369_v40 = vld [vmem:[%s6605_s1 + $0x358] sm:$0xff] }
  0x53   : > { %v3895_v43 = vpack.c.bf16 %v3369_v40, %v3367_v39  ;;  %v3402_v40 = vld [vmem:[%s6605_s1 + $0x460] sm:$0xff] }
  0x54   : > { %719 = vmatmul.mubr.f32.vlgmr.msra.gmra.mrb[0].mxu0 %v492_v45  ;;  %v3368_v45 = vld [vmem:[%s6605_s1 + $0x350] sm:$0xff] }
  0x55   : > { %3858 = vmatpush1.bf16.msra.mxu0 %v3857_v46  ;;  %724 = vmatprep.mubr.f32.mxu0 %v4586_v7  ;;  %v3371_v46 = vld [vmem:[%s6605_s1 + $0x368] sm:$0xff]  ;;  %v3897_v48 = vpack.c.bf16 %v3368_v45, %v3366_v44  ;;  %v880_v45 = vld [vmem:[%s4828_s18 + $0x1b] sm:$0xf] }
  0x56   : > { %3860 = vmatprep.subr.bf16.mxu0 %v3859_v47  ;;  %v3373_v47 = vld [vmem:[%s6605_s1 + $0x378] sm:$0xff] }
  0x57   : > { %v3899_v50 = vpack.c.bf16 %v3373_v47, %v3371_v46  ;;  %v3406_v47 = vld [vmem:[%s6605_s1 + $0x480] sm:$0xff] }
  0x58   : > { %725 = vmatmul.mubr.f32.gmra.mrb[2].mxu0 %v493_v53  ;;  %v3375_v53 = vld [vmem:[%s6605_s1 + $0x388] sm:$0xff] }
  0x59   : > { %3862 = vmatpush1.bf16.msra.mxu0 %v3861_v52  ;;  %730 = vmatprep.mubr.f32.mxu0 %v4586_v7  ;;  %v3372_v52 = vld [vmem:[%s6605_s1 + $0x370] sm:$0xff] }
  0x5a   : > { %3864 = vmatprep.subr.bf16.mxu0 %v3863_v54  ;;  %v3377_v54 = vld [vmem:[%s6605_s1 + $0x398] sm:$0xff]  ;;  %v3901_v55 = vpack.c.bf16 %v3372_v52, %v3370_v51 }
  0x5b   : > { %v3903_v57 = vpack.c.bf16 %v3377_v54, %v3375_v53  ;;  %v3410_v53 = vld [vmem:[%s6605_s1 + $0x4a0] sm:$0xff]  ;;  %v3412_v54 = vld [vmem:[%s6605_s1 + $0x4b0] sm:$0xff] }
  0x5c   : > { %731 = vmatmul.mubr.f32.gmra.mrb[4].mxu0 %v494_v60  ;;  %v3379_v60 = vld [vmem:[%s6605_s1 + $0x3a8] sm:$0xff] }
  0x5d   : > { %3866 = vmatpush1.bf16.msra.mxu0 %v3865_v59  ;;  %736 = vmatprep.mubr.f32.mxu0 %v4586_v7  ;;  %v3376_v59 = vld [vmem:[%s6605_s1 + $0x390] sm:$0xff] }
  0x5e   : > { %3868 = vmatprep.subr.bf16.mxu0 %v3867_v61  ;;  %v3381_v61 = vld [vmem:[%s6605_s1 + $0x3b8] sm:$0xff]  ;;  %v3905_v62 = vpack.c.bf16 %v3376_v59, %v3374_v58  ;;  %v3414_v59 = vld [vmem:[%s6605_s1 + $0x4c0] sm:$0xff] }
  0x5f   : > { %v3907_v63 = vpack.c.bf16 %v3381_v61, %v3379_v60  ;;  %v3416_v60 = vld [vmem:[%s6605_s1 + $0x4d0] sm:$0xff]  ;;  %v3419_v61 = vld [vmem:[%s6605_s1 + $0x4e8] sm:$0xff] }
  0x60   : > { %737 = vmatmul.mubr.f32.gmra.mrb[6].mxu0 %v495_v3  ;;  %v3385_v3 = vld [vmem:[%s6605_s1 + $0x3d8] sm:$0xff] }
  0x61   : > { %3870 = vmatpush1.bf16.msra.mxu0 %v3869_v2  ;;  %844 = vmatprep.mubr.f32.mxu0 %v4586_v7  ;;  %v3383_v2 = vld [vmem:[%s6605_s1 + $0x3c8] sm:$0xff] }
  0x62   : > { %3872 = vmatprep.subr.bf16.mxu0 %v3871_v4  ;;  %v3909_v4 = vpack.c.bf16 %v3380_v1, %v3378_v0  ;;  %v3911_v5 = vpack.c.bf16 %v3385_v3, %v3383_v2  ;;  %v3418_v1 = vld [vmem:[%s6605_s1 + $0x4e0] sm:$0xff]  ;;  %v3420_v2 = vld [vmem:[%s6605_s1 + $0x4f0] sm:$0xff] }
  0x63   : > { %v3949_v3 = vpack.c.bf16 %v3420_v2, %v3418_v1  ;;  %v1367_v1 = vld [vmem:[%s6608_s4 + $0x58] sm:$0xff] }
  0x65   : > { %3874 = vmatpush1.bf16.msra.mxu0 %v3873_v10  ;;  %v3389_v10 = vld [vmem:[%s6605_s1 + $0x3f8] sm:$0xff] }
  0x66   : > { %3876 = vmatprep.subr.bf16.mxu0 %v3875_v11  ;;  %v3913_v11 = vpack.c.bf16 %v3384_v8, %v3382_v6  ;;  %v3915_v12 = vpack.c.bf16 %v3389_v10, %v3387_v9  ;;  %v1013_v6 = vld [vmem:[%s4828_s18 + $0x14] sm:$0xff]  ;;  %v1014_v8 = vld [vmem:[%s4828_s18 + $0x1c] sm:$0xf]  ;;  %v1147_v9 = vlaneseq }
  0x68   : > { %v1148_v10 = vshrl.u32 %v1147_v9, 7 }
  0x69   : > { %3878 = vmatpush1.bf16.msra.mxu0 %v3877_v16  ;;  %v3393_v16 = vld [vmem:[%s6605_s1 + $0x418] sm:$0xff] }
  0x6a   : > { %3880 = vmatprep.subr.bf16.mxu0 %v3879_v17  ;;  %v3917_v17 = vpack.c.bf16 %v3388_v14, %v3386_v13  ;;  %v3919_v18 = vpack.c.bf16 %v3393_v16, %v3391_v15  ;;  %v5253_v13 = vsub.s32 1, %v1148_v10 }
  0x6d   : > { %3882 = vmatpush1.bf16.msra.mxu0 %v3881_v22  ;;  %v3397_v22 = vld [vmem:[%s6605_s1 + $0x438] sm:$0xff] }
  0x6e   : > { %3884 = vmatprep.subr.bf16.mxu0 %v3883_v23  ;;  %v877_v23 = vld [vmem:[%s4828_s18 + $0x3] sm:$0xff]  ;;  %v3923_v25 = vpack.c.bf16 %v3397_v22, %v3395_v21 }
  0x71   : > { %3886 = vmatpush1.bf16.msra.mxu0 %v3885_v28  ;;  %v3399_v28 = vld [vmem:[%s6605_s1 + $0x448] sm:$0xff] }
  0x72   : > { %3888 = vmatprep.subr.bf16.mxu0 %v3887_v29  ;;  %v3401_v29 = vld [vmem:[%s6605_s1 + $0x458] sm:$0xff] }
  0x73   : > { %v3927_v32 = vpack.c.bf16 %v3401_v29, %v3399_v28 }
  0x74   : > { %845 = vmatmul.mubr.f32.vlgmr.msra.gmra.mrb[0].mxu0 %v743_v34  ;;  %v3400_v34 = vld [vmem:[%s6605_s1 + $0x450] sm:$0xff] }
  0x75   : > { %3890 = vmatpush1.bf16.msra.mxu0 %v3889_v35  ;;  %850 = vmatprep.mubr.f32.mxu0 %v4586_v7  ;;  %v3403_v35 = vld [vmem:[%s6605_s1 + $0x468] sm:$0xff]  ;;  %v3929_v37 = vpack.c.bf16 %v3400_v34, %v3398_v33 }
  0x76   : > { %3892 = vmatprep.subr.bf16.mxu0 %v3891_v36  ;;  %v3405_v36 = vld [vmem:[%s6605_s1 + $0x478] sm:$0xff] }
  0x77   : > { %v3931_v39 = vpack.c.bf16 %v3405_v36, %v3403_v35 }
  0x78   : > { %851 = vmatmul.mubr.f32.gmra.mrb[2].mxu0 %v744_v42  ;;  %v3407_v42 = vld [vmem:[%s6605_s1 + $0x488] sm:$0xff] }
  0x79   : > { %3894 = vmatpush1.bf16.msra.mxu0 %v3893_v41  ;;  %856 = vmatprep.mubr.f32.mxu0 %v4586_v7  ;;  %v3404_v41 = vld [vmem:[%s6605_s1 + $0x470] sm:$0xff] }
  0x7a   : > { %3896 = vmatprep.subr.bf16.mxu0 %v3895_v43  ;;  %v3409_v43 = vld [vmem:[%s6605_s1 + $0x498] sm:$0xff]  ;;  %v3933_v44 = vpack.c.bf16 %v3404_v41, %v3402_v40 }
  0x7b   : > { %v3935_v46 = vpack.c.bf16 %v3409_v43, %v3407_v42 }
  0x7c   : > { %857 = vmatmul.mubr.f32.gmra.mrb[4].mxu0 %v745_v49  ;;  %v3411_v49 = vld [vmem:[%s6605_s1 + $0x4a8] sm:$0xff] }
  0x7d   : > { %3898 = vmatpush1.bf16.msra.mxu0 %v3897_v48  ;;  %862 = vmatprep.mubr.f32.mxu0 %v4586_v7  ;;  %v3408_v48 = vld [vmem:[%s6605_s1 + $0x490] sm:$0xff] }
  0x7e   : > { %3900 = vmatprep.subr.bf16.mxu0 %v3899_v50  ;;  %v3413_v50 = vld [vmem:[%s6605_s1 + $0x4b8] sm:$0xff]  ;;  %v3937_v51 = vpack.c.bf16 %v3408_v48, %v3406_v47  ;;  %v3426_v47 = vld [vmem:[%s6607_s3 + $0x10] sm:$0xff]  ;;  %v4588_v48 = vmov 0.0|0.0  }
  0x7f   : > { %v3939_v52 = vpack.c.bf16 %v3413_v50, %v3411_v49  ;;  %v1358_v50 = vld [vmem:[%s6608_s4 + $0x10] sm:$0xff] }
  0x80   : > { %863 = vmatmul.mubr.f32.gmra.mrb[6].mxu0 %v746_v56  ;;  %v3417_v56 = vld [vmem:[%s6605_s1 + $0x4d8] sm:$0xff] }
  0x81   : > { %3902 = vmatpush1.bf16.msra.mxu0 %v3901_v55  ;;  %978 = vmatprep.mubr.f32.mxu0 %v4586_v7  ;;  %v3415_v55 = vld [vmem:[%s6605_s1 + $0x4c8] sm:$0xff] }
  0x82   : > { %3904 = vmatprep.subr.bf16.mxu0 %v3903_v57  ;;  %v3941_v57 = vpack.c.bf16 %v3412_v54, %v3410_v53  ;;  %v3943_v58 = vpack.c.bf16 %v3417_v56, %v3415_v55  ;;  %v3427_v53 = vld [vmem:[%s6607_s3 + $0x18] sm:$0x3f]  ;;  %v1360_v55 = vld [vmem:[%s6608_s4 + $0x20] sm:$0xff]  ;;  %v1361_v56 = vld [vmem:[%s6608_s4 + $0x28] sm:$0xff] }
  0x85   : > { %3906 = vmatpush1.bf16.msra.mxu0 %v3905_v62  ;;  %v3421_v62 = vld [vmem:[%s6605_s1 + $0x4f8] sm:$0xff] }
  0x86   : > { %3908 = vmatprep.subr.bf16.mxu0 %v3907_v63  ;;  %v3945_v63 = vpack.c.bf16 %v3416_v60, %v3414_v59  ;;  %v3947_v0 = vpack.c.bf16 %v3421_v62, %v3419_v61  ;;  %v1363_v59 = vld [vmem:[%s6608_s4 + $0x38] sm:$0xff]  ;;  %v1364_v61 = vld [vmem:[%s6608_s4 + $0x40] sm:$0xff]  ;;  %v1365_v62 = vld [vmem:[%s6608_s4 + $0x48] sm:$0xff] }
  0x89   : > { %3910 = vmatpush1.bf16.msra.mxu0 %v3909_v4  ;;  %v1011_v4 = vld [vmem:[%s4828_s18 + $0x4] sm:$0xff] }
  0x8a   : > { %3912 = vmatprep.subr.bf16.mxu0 %v3911_v5  ;;  %v1012_v5 = vld [vmem:[%s4828_s18 + $0xc] sm:$0xff] }
  0x8d   : > { %3914 = vmatpush1.bf16.msra.mxu0 %v3913_v11  ;;  %v5248_v11 = vsub.s32 0, %v1148_v10  ;;  %v1372_v10 = vld [vmem:[%s6608_s4 + $0x80] sm:$0xff] }
  0x8e   : > { %3916 = vmatprep.subr.bf16.mxu0 %v3915_v12  ;;  %v1145_v12 = vld [vmem:[%s6606_s2] sm:$0x3] }
  0x8f   : > { %v1150_v14 = vrot.slane %v1145_v12, %v5248_v11  ;;  %v1154_v16 = vrot.slane %v1145_v12, %v5253_v13  ;;  %v1373_v12 = vld [vmem:[%s6608_s4 + $0x88] sm:$0xff] }
  0x91   : > { %3918 = vmatpush1.bf16.msra.mxu0 %v3917_v17 }
  0x92   : > { %3920 = vmatprep.subr.bf16.mxu0 %v3919_v18 }
  0x94   : > { %979 = vmatmul.mubr.f32.vlgmr.msra.gmra.mrb[0].mxu0 %v877_v23 }
  0x95   : > { %3922 = vmatpush1.bf16.msra.mxu0 %v3921_v24  ;;  %984 = vmatprep.mubr.f32.mxu0 %v4586_v7 }
  0x96   : > { %3924 = vmatprep.subr.bf16.mxu0 %v3923_v25 }
  0x98   : > { %985 = vmatmul.mubr.f32.gmra.mrb[2].mxu0 %v878_v31 }
  0x99   : > { %3926 = vmatpush1.bf16.msra.mxu0 %v3925_v30  ;;  %990 = vmatprep.mubr.f32.mxu0 %v4586_v7 }
  0x9a   : > { %3928 = vmatprep.subr.bf16.mxu0 %v3927_v32 }
  0x9c   : > { %991 = vmatmul.mubr.f32.gmra.mrb[4].mxu0 %v879_v38 }
  0x9d   : > { %3930 = vmatpush1.bf16.msra.mxu0 %v3929_v37  ;;  %996 = vmatprep.mubr.f32.mxu0 %v4586_v7 }
  0x9e   : > { %3932 = vmatprep.subr.bf16.mxu0 %v3931_v39 }
  0xa0   : > { %997 = vmatmul.mubr.f32.gmra.mrb[6].mxu0 %v880_v45  ;;  %v1357_v45 = vld [vmem:[%s6608_s4 + $0x8] sm:$0xff] }
  0xa1   : > { %3934 = vmatpush1.bf16.msra.mxu0 %v3933_v44  ;;  %1112 = vmatprep.mubr.f32.mxu0 %v4586_v7  ;;  %v1356_v44 = vld [vmem:[%s6608_s4] sm:$0xff] }
  0xa2   : > { %3936 = vmatprep.subr.bf16.mxu0 %v3935_v46  ;;  %v1173_v46 = vld [vmem:[%s6607_s3] sm:$0xff]  ;;  %v3972_v49 = vpack.c.bf16 %v1357_v45, %v1356_v44 }
  0xa5   : > { %3938 = vmatpush1.bf16.msra.mxu0 %v3937_v51  ;;  %v1359_v51 = vld [vmem:[%s6608_s4 + $0x18] sm:$0xff] }
  0xa6   : > { %3940 = vmatprep.subr.bf16.mxu0 %v3939_v52  ;;  %v1174_v52 = vld [vmem:[%s6607_s3 + $0x8] sm:$0x3f]  ;;  %v3975_v54 = vpack.c.bf16 %v1359_v51, %v1358_v50 }
  0xa7   : > { %v3439_v50 = vld [vmem:[%s6608_s4 + $0x108] sm:$0xff] }
  0xa9   : > { %3942 = vmatpush1.bf16.msra.mxu0 %v3941_v57  ;;  %v3978_v57 = vpack.c.bf16 %v1361_v56, %v1360_v55  ;;  %v3442_v55 = vld [vmem:[%s6608_s4 + $0x120] sm:$0xff]  ;;  %v3443_v56 = vld [vmem:[%s6608_s4 + $0x128] sm:$0xff] }
  0xaa   : > { %3944 = vmatprep.subr.bf16.mxu0 %v3943_v58  ;;  %v1362_v58 = vld [vmem:[%s6608_s4 + $0x30] sm:$0xff] }
  0xab   : > { %v3981_v60 = vpack.c.bf16 %v1363_v59, %v1362_v58  ;;  %v3444_v58 = vld [vmem:[%s6608_s4 + $0x130] sm:$0xff]  ;;  %v3445_v59 = vld [vmem:[%s6608_s4 + $0x138] sm:$0xff] }
  0xad   : > { %3946 = vmatpush1.bf16.msra.mxu0 %v3945_v63  ;;  %v3984_v63 = vpack.c.bf16 %v1365_v62, %v1364_v61  ;;  %v3446_v61 = vld [vmem:[%s6608_s4 + $0x140] sm:$0xff]  ;;  %v3447_v62 = vld [vmem:[%s6608_s4 + $0x148] sm:$0xff] }
  0xae   : > { %3948 = vmatprep.subr.bf16.mxu0 %v3947_v0  ;;  %v1366_v0 = vld [vmem:[%s6608_s4 + $0x50] sm:$0xff] }
  0xaf   : > { %v3987_v2 = vpack.c.bf16 %v1367_v1, %v1366_v0  ;;  %v3448_v0 = vld [vmem:[%s6608_s4 + $0x150] sm:$0xff]  ;;  %v3449_v1 = vld [vmem:[%s6608_s4 + $0x158] sm:$0xff] }
  0xb1   : > { %3950 = vmatpush1.bf16.msra.mxu0 %v3949_v3  ;;  %v1368_v3 = vld [vmem:[%s6608_s4 + $0x60] sm:$0xff] }
  0xb4   : > { %1113 = vmatmul.mubr.f32.vlgmr.msra.gmra.mrb[0].mxu0 %v1011_v4  ;;  %v1369_v4 = vld [vmem:[%s6608_s4 + $0x68] sm:$0xff] }
  0xb5   : > { %1118 = vmatprep.mubr.f32.mxu0 %v4586_v7 }
  0xb8   : > { %1119 = vmatmul.mubr.f32.gmra.mrb[2].mxu0 %v1012_v5  ;;  %v3990_v5 = vpack.c.bf16 %v1369_v4, %v1368_v3  ;;  %v3450_v3 = vld [vmem:[%s6608_s4 + $0x160] sm:$0xff]  ;;  %v3451_v4 = vld [vmem:[%s6608_s4 + $0x168] sm:$0xff] }
  0xb9   : > { %1124 = vmatprep.mubr.f32.mxu0 %v4586_v7 }
  0xbc   : > { %1125 = vmatmul.mubr.f32.gmra.mrb[4].mxu0 %v1013_v6  ;;  %v1370_v6 = vld [vmem:[%s6608_s4 + $0x70] sm:$0xff] }
  0xbd   : > { %1130 = vmatprep.mubr.f32.mxu0 %v4586_v7 }
  0xc0   : > { %1131 = vmatmul.mubr.f32.gmra.mrb[6].mxu0 %v1014_v8  ;;  %v1371_v8 = vld [vmem:[%s6608_s4 + $0x78] sm:$0xff] }
  0xc1   : > { %1253 = vmatprep.mubr.f32.mxu0 %v4586_v7  ;;  %v3993_v9 = vpack.c.bf16 %v1371_v8, %v1370_v6  ;;  %v3452_v6 = vld [vmem:[%s6608_s4 + $0x170] sm:$0xff]  ;;  %v3453_v8 = vld [vmem:[%s6608_s4 + $0x178] sm:$0xff] }
 0x187   : > { %v1114_v15 = vpop.f32.mrb[0].mxu0 }
 0x188   : > { %v1116_v17 = vpop.f32.mrb[1].mxu0  ;;  %v1157_v18 = vadd.f32 %v1150_v14, %v1114_v15  ;;  %v1374_v15 = vld [vmem:[%s6608_s4 + $0x90] sm:$0xff] }
 0x189   : > { %v1158_v19 = vadd.f32 %v1154_v16, %v1116_v17 }
 0x18a   : > { %v1165_v24 = vmax.f32 %v1157_v18, 0.0  ;;  %v1376_v18 = vld [vmem:[%s6608_s4 + $0xa0] sm:$0xff] }
 0x18b   : > { %v1120_v20 = vpop.f32.mrb[2].mxu0  ;;  %v1166_v26 = vmax.f32 %v1158_v19, 0.0  ;;  %v1377_v19 = vld [vmem:[%s6608_s4 + $0xa8] sm:$0xff] }
 0x18c   : > { %v1159_v21 = vadd.f32 %v1150_v14, %v1120_v20  ;;  %v1122_v22 = vpop.f32.mrb[3].mxu0  ;;  %v4002_v20 = vpack.c.bf16 %v1377_v19, %v1376_v18  ;;  %v3458_v18 = vld [vmem:[%s6608_s4 + $0x1a0] sm:$0xff]  ;;  %v3459_v19 = vld [vmem:[%s6608_s4 + $0x1a8] sm:$0xff] }
 0x18d   : > { %v1160_v23 = vadd.f32 %v1154_v16, %v1122_v22  ;;  %v1379_v22 = vld [vmem:[%s6608_s4 + $0xb8] sm:$0xff] }
 0x18e   : > { %v1167_v25 = vmax.f32 %v1159_v21, 0.0  ;;  %v1378_v21 = vld [vmem:[%s6608_s4 + $0xb0] sm:$0xff] }
 0x18f   : > { %v1168_v27 = vmax.f32 %v1160_v23, 0.0  ;;  %v1126_v28 = vpop.f32.mrb[4].mxu0  ;;  %v4005_v23 = vpack.c.bf16 %v1379_v22, %v1378_v21  ;;  %v3460_v21 = vld [vmem:[%s6608_s4 + $0x1b0] sm:$0xff]  ;;  %v3461_v22 = vld [vmem:[%s6608_s4 + $0x1b8] sm:$0xff] }
 0x190   : > { %v3953_v29 = vpack.c.bf16 %v1167_v25, %v1165_v24  ;;  %v1128_v30 = vpop.f32.mrb[5].mxu0  ;;  %v1161_v32 = vadd.f32 %v1150_v14, %v1126_v28  ;;  %v1380_v24 = vld [vmem:[%s6608_s4 + $0xc0] sm:$0xff]  ;;  %v1381_v25 = vld [vmem:[%s6608_s4 + $0xc8] sm:$0xff]  ;;  %v1383_v28 = vld [vmem:[%s6608_s4 + $0xd8] sm:$0xff] }
 0x191   : > { %v3951_v31 = vpack.c.bf16 %v1168_v27, %v1166_v26  ;;  %v1162_v33 = vadd.f32 %v1154_v16, %v1128_v30  ;;  %v4008_v26 = vpack.c.bf16 %v1381_v25, %v1380_v24  ;;  %v1382_v27 = vld [vmem:[%s6608_s4 + $0xd0] sm:$0xff]  ;;  %v3434_v30 = vld [vmem:[%s6608_s4 + $0xe0] sm:$0xff]  ;;  %v3465_v24 = vld [vmem:[%s6609_s5 + $0xe8] sm:$0xff] }
 0x192   : > { %v1169_v38 = vmax.f32 %v1161_v32, 0.0  ;;  %v3467_v25 = vld [vmem:[%s6609_s5 + $0xf8] sm:$0xff] }
 0x193   : > { %v1132_v34 = vpop.f32.mrb[6].mxu0  ;;  %3952 = vmatprep.subr.bf16.mxu0 %v3951_v31  ;;  %3962 = vmatprep.subr.bf16.mxu1 %v3951_v31  ;;  %v1170_v40 = vmax.f32 %v1162_v33, 0.0  ;;  %v3435_v31 = vld [vmem:[%s6608_s4 + $0xe8] sm:$0xff] }
 0x194   : > { %v1163_v35 = vadd.f32 %v1150_v14, %v1132_v34  ;;  %v1134_v36 = vpop.f32.mrb[7].mxu0  ;;  %3954 = vmatpush1.bf16.msra.mxu0 %v3953_v29  ;;  %3964 = vmatpush1.bf16.msra.mxu1 %v3953_v29  ;;  %v3996_v14 = vpack.c.bf16 %v1373_v12, %v1372_v10  ;;  %v4011_v29 = vpack.c.bf16 %v1383_v28, %v1382_v27  ;;  %v3454_v10 = vld [vmem:[%s6608_s4 + $0x180] sm:$0xff]  ;;  %v3455_v12 = vld [vmem:[%s6608_s4 + $0x188] sm:$0xff]  ;;  %v3466_v28 = vld [vmem:[%s6609_s5 + $0xf0] sm:$0xff] }
 0x195   : > { %v1164_v37 = vadd.f32 %v1154_v16, %v1134_v36  ;;  %v1375_v16 = vld [vmem:[%s6608_s4 + $0x98] sm:$0xff]  ;;  %v4055_v27 = vpack.c.bf16 %v3467_v25, %v3465_v24  ;;  %v1582_v25 = vld [vmem:[%s6609_s5 + $0x20] sm:$0xff] }
 0x196   : > { %v1171_v39 = vmax.f32 %v1163_v35, 0.0  ;;  %v3999_v17 = vpack.c.bf16 %v1375_v16, %v1374_v15  ;;  %v3456_v15 = vld [vmem:[%s6608_s4 + $0x190] sm:$0xff]  ;;  %v3457_v16 = vld [vmem:[%s6608_s4 + $0x198] sm:$0xff] }
 0x197   : > { %v1172_v41 = vmax.f32 %v1164_v37, 0.0 }
 0x198   : > { %v3958_v42 = vpack.c.bf16 %v1171_v39, %v1169_v38  ;;  %v4014_v38 = vpack.c.bf16 %v3435_v31, %v3434_v30  ;;  %v3436_v39 = vld [vmem:[%s6608_s4 + $0xf0] sm:$0xff]  ;;  %v3471_v30 = vld [vmem:[%s6609_s5 + $0x118] sm:$0xff] }
 0x199   : > { %v3955_v43 = vpack.c.bf16 %v1172_v41, %v1170_v40  ;;  %v3437_v40 = vld [vmem:[%s6608_s4 + $0xf8] sm:$0xff] }
 0x19b   : > { %3957 = vmatprep.subr.msk.bf16.mxu0 %vm3956_vm2, %v3955_v43  ;;  %3967 = vmatprep.subr.msk.bf16.mxu1 %vm3956_vm2, %v3955_v43 }
 0x19c   : > { %3960 = vmatpush1.bf16.msk.msra.mxu0 %vm3956_vm2, %v3958_v42  ;;  %3970 = vmatpush1.bf16.msk.msra.mxu1 %vm3956_vm2, %v3958_v42 }
 0x19d   : > { %3971 = vmatprep.subr.bf16.mxu1 %v4588_v48 }
 0x19f   : > { %3424 = vmatmul.mubr.msk.f32.vlgmr.msra.gmra.mrb[8].mxu0 %vm1175_vm3, %v1173_v46  ;;  %3430 = vmatmul.mubr.msk.f32.vlgmr.msra.gmra.mrb[0].mxu1 %vm1175_vm3, %v3426_v47  ;;  %v4017_v47 = vpack.c.bf16 %v3437_v40, %v3436_v39  ;;  %v3472_v39 = vld [vmem:[%s6609_s5 + $0x120] sm:$0xff]  ;;  %v3474_v40 = vld [vmem:[%s6609_s5 + $0x130] sm:$0xff] }
 0x1a0   : > { %1259 = vmatprep.mubr.f32.mxu0 %v4586_v7  ;;  %1345 = vmatprep.mubr.f32.mxu1 %v4586_v7 }
 0x1a1   : > { %3973 = vmatpush1.bf16.msra.mxu1 %v3972_v49  ;;  %v3438_v49 = vld [vmem:[%s6608_s4 + $0x100] sm:$0xff] }
 0x1a2   : > { %3974 = vmatprep.subr.bf16.mxu1 %v4588_v48  ;;  %v4020_v51 = vpack.c.bf16 %v3439_v50, %v3438_v49  ;;  %v3481_v49 = vld [vmem:[%s6609_s5 + $0x168] sm:$0xff]  ;;  %v3483_v50 = vld [vmem:[%s6609_s5 + $0x178] sm:$0xff] }
 0x1a3   : > { %3425 = vmatmul.mubr.msk.f32.gmra.mrb[10].mxu0 %vm1175_vm3, %v1174_v52  ;;  %3431 = vmatmul.mubr.msk.f32.gmra.mrb[2].mxu1 %vm1175_vm3, %v3427_v53  ;;  %v3440_v52 = vld [vmem:[%s6608_s4 + $0x110] sm:$0xff]  ;;  %v3441_v53 = vld [vmem:[%s6608_s4 + $0x118] sm:$0xff] }
 0x1a4   : > { %2253 = vmatprep.mubr.f32.mxu0 %v4586_v7 }
 0x1a5   : > { %3976 = vmatpush1.bf16.msra.mxu1 %v3975_v54  ;;  %v4023_v54 = vpack.c.bf16 %v3441_v53, %v3440_v52  ;;  %v3480_v52 = vld [vmem:[%s6609_s5 + $0x160] sm:$0xff]  ;;  %v3482_v53 = vld [vmem:[%s6609_s5 + $0x170] sm:$0xff] }
 0x1a6   : > { %3977 = vmatprep.subr.bf16.mxu1 %v4588_v48 }
 0x1a9   : > { %3979 = vmatpush1.bf16.msra.mxu1 %v3978_v57  ;;  %v4026_v57 = vpack.c.bf16 %v3443_v56, %v3442_v55  ;;  %v3485_v55 = vld [vmem:[%s6609_s5 + $0x188] sm:$0xff]  ;;  %v3487_v56 = vld [vmem:[%s6609_s5 + $0x198] sm:$0xff] }
 0x1aa   : > { %3980 = vmatprep.subr.bf16.mxu1 %v4588_v48 }
 0x1ad   : > { %3982 = vmatpush1.bf16.msra.mxu1 %v3981_v60  ;;  %v4029_v60 = vpack.c.bf16 %v3445_v59, %v3444_v58  ;;  %v3484_v58 = vld [vmem:[%s6609_s5 + $0x180] sm:$0xff]  ;;  %v3486_v59 = vld [vmem:[%s6609_s5 + $0x190] sm:$0xff] }
 0x1ae   : > { %3983 = vmatprep.subr.bf16.mxu1 %v4588_v48 }
 0x1b1   : > { %3985 = vmatpush1.bf16.msra.mxu1 %v3984_v63  ;;  %v4032_v63 = vpack.c.bf16 %v3447_v62, %v3446_v61  ;;  %v3489_v61 = vld [vmem:[%s6609_s5 + $0x1a8] sm:$0xff]  ;;  %v3491_v62 = vld [vmem:[%s6609_s5 + $0x1b8] sm:$0xff] }
 0x1b2   : > { %3986 = vmatprep.subr.bf16.mxu1 %v4588_v48 }
 0x1b5   : > { %3988 = vmatpush1.bf16.msra.mxu1 %v3987_v2  ;;  %v4035_v2 = vpack.c.bf16 %v3449_v1, %v3448_v0  ;;  %v4079_v0 = vpack.c.bf16 %v3491_v62, %v3489_v61  ;;  %v3490_v1 = vld [vmem:[%s6609_s5 + $0x1b0] sm:$0xff]  ;;  %v3499_v61 = vld [vmem:[%s6609_s5 + $0x1d8] sm:$0xff] }
 0x1b6   : > { %3989 = vmatprep.subr.bf16.mxu1 %v4588_v48 }
 0x1b9   : > { %3991 = vmatpush1.bf16.msra.mxu1 %v3990_v5  ;;  %v4038_v5 = vpack.c.bf16 %v3451_v4, %v3450_v3  ;;  %v1581_v3 = vld [vmem:[%s6609_s5 + $0x18] sm:$0xff] }
 0x1ba   : > { %3992 = vmatprep.subr.bf16.mxu1 %v4588_v48 }
 0x1bd   : > { %3994 = vmatpush1.bf16.msra.mxu1 %v3993_v9  ;;  %v4041_v9 = vpack.c.bf16 %v3453_v8, %v3452_v6 }
 0x1be   : > { %3995 = vmatprep.subr.bf16.mxu1 %v4588_v48 }
 0x1c1   : > { %3997 = vmatpush1.bf16.msra.mxu1 %v3996_v14  ;;  %v4044_v14 = vpack.c.bf16 %v3455_v12, %v3454_v10 }
 0x1c2   : > { %3998 = vmatprep.subr.bf16.mxu1 %v4588_v48 }
 0x1c5   : > { %4000 = vmatpush1.bf16.msra.mxu1 %v3999_v17  ;;  %v4047_v17 = vpack.c.bf16 %v3457_v16, %v3456_v15 }
 0x1c6   : > { %4001 = vmatprep.subr.bf16.mxu1 %v4588_v48 }
 0x1c9   : > { %4003 = vmatpush1.bf16.msra.mxu1 %v4002_v20  ;;  %v4050_v20 = vpack.c.bf16 %v3459_v19, %v3458_v18  ;;  %v1578_v19 = vld [vmem:[%s6609_s5] sm:$0xff] }
 0x1ca   : > { %4004 = vmatprep.subr.bf16.mxu1 %v4588_v48 }
 0x1cd   : > { %4006 = vmatpush1.bf16.msra.mxu1 %v4005_v23  ;;  %v4053_v23 = vpack.c.bf16 %v3461_v22, %v3460_v21  ;;  %v1583_v21 = vld [vmem:[%s6609_s5 + $0x28] sm:$0xff]  ;;  %v1585_v22 = vld [vmem:[%s6609_s5 + $0x38] sm:$0xff] }
 0x1ce   : > { %4007 = vmatprep.subr.bf16.mxu1 %v4588_v48  ;;  %v4087_v24 = vpack.c.bf16 %v1585_v22, %v1583_v21 }
 0x1d1   : > { %4009 = vmatpush1.bf16.msra.mxu1 %v4008_v26  ;;  %v3464_v26 = vld [vmem:[%s6609_s5 + $0xe0] sm:$0xff] }
 0x1d2   : > { %4010 = vmatprep.subr.bf16.mxu1 %v4588_v48  ;;  %v4057_v31 = vpack.c.bf16 %v3466_v28, %v3464_v26  ;;  %v1584_v26 = vld [vmem:[%s6609_s5 + $0x30] sm:$0xff]  ;;  %v1587_v28 = vld [vmem:[%s6609_s5 + $0x48] sm:$0xff] }
 0x1d5   : > { %4012 = vmatpush1.bf16.msra.mxu1 %v4011_v29  ;;  %v3469_v29 = vld [vmem:[%s6609_s5 + $0x108] sm:$0xff] }
 0x1d6   : > { %4013 = vmatprep.subr.bf16.mxu1 %v4588_v48 }
 0x272   : > { %v1255_v32 = vpop.f32.mrb[8].mxu0  ;;  %v1341_v33 = vpop.f32.mrb[0].mxu1 }
 0x273   : > { %v5382_v34 = vmax.f32 %v1255_v32, %v1341_v33  ;;  %v1257_v35 = vpop.f32.mrb[9].mxu0  ;;  %v1343_v36 = vpop.f32.mrb[1].mxu1  ;;  %v4059_v32 = vpack.c.bf16 %v3471_v30, %v3469_v29  ;;  %v3468_v33 = vld [vmem:[%s6609_s5 + $0x100] sm:$0xff]  ;;  %v1589_v29 = vld [vmem:[%s6609_s5 + $0x58] sm:$0xff]  ;;  %v4089_v30 = vpack.c.bf16 %v1584_v26, %v1582_v25  ;;  %v3513_v25 = vld [vmem:[%s6609_s5 + $0x248] sm:$0xff] }
 0x274   : > { %v1353_v37 = vmax.f32 %v1257_v35, %v1343_v36  ;;  %v3473_v36 = vld [vmem:[%s6609_s5 + $0x128] sm:$0xff]  ;;  %v3515_v26 = vld [vmem:[%s6609_s5 + $0x258] sm:$0xff] }
 0x276   : > { %v1261_v41 = vpop.f32.mrb[10].mxu0  ;;  %v1347_v42 = vpop.f32.mrb[2].mxu1  ;;  %3432 = vmatprep.mubr.msk.f32.mxu1 %vm1384_vm4, %v1353_v37 }
 0x277   : > { %v5391_v43 = vmax.f32 %v1261_v41, %v1347_v42  ;;  %v1263_v44 = vpop.f32.mrb[11].mxu0  ;;  %v1349_v45 = vpop.f32.mrb[3].mxu1  ;;  %1456 = vmatmul.mubr.f32.vlgmr.msra.gmra.mrb[4].mxu1 %v5382_v34  ;;  %v3477_v41 = vld [vmem:[%s6609_s5 + $0x148] sm:$0xff]  ;;  %v3479_v42 = vld [vmem:[%s6609_s5 + $0x158] sm:$0xff] }
 0x278   : > { %v5394_v46 = vmax.f32 %v1263_v44, %v1349_v45  ;;  %4015 = vmatpush1.bf16.msra.mxu1 %v4014_v38  ;;  %v4067_v44 = vpack.c.bf16 %v3479_v42, %v3477_v41  ;;  %v3476_v45 = vld [vmem:[%s6609_s5 + $0x140] sm:$0xff]  ;;  %v1595_v41 = vld [vmem:[%s6609_s5 + $0x88] sm:$0xff]  ;;  %v1597_v42 = vld [vmem:[%s6609_s5 + $0x98] sm:$0xff] }
 0x279   : > { %4016 = vmatprep.subr.bf16.mxu1 %v4588_v48 }
 0x27a   : > { %3433 = vmatprep.mubr.msk.f32.mxu1 %vm1384_vm4, %v5394_v46 }
 0x27b   : > { %1461 = vmatmul.mubr.f32.gmra.mrb[6].mxu1 %v5391_v43 }
 0x27c   : > { %4018 = vmatpush1.bf16.msra.mxu1 %v4017_v47  ;;  %3462 = vmatprep.mubr.msk.f32.mxu1 %vm1384_vm4, %v1353_v37  ;;  %v3475_v37 = vld [vmem:[%s6609_s5 + $0x138] sm:$0xff] }
 0x27d   : > { %4019 = vmatprep.subr.bf16.mxu1 %v4588_v48  ;;  %v4063_v38 = vpack.c.bf16 %v3475_v37, %v3473_v36  ;;  %v1593_v36 = vld [vmem:[%s6609_s5 + $0x78] sm:$0xff] }
 0x280   : > { %4021 = vmatpush1.bf16.msra.mxu1 %v4020_v51  ;;  %v4071_v51 = vpack.c.bf16 %v3483_v50, %v3481_v49  ;;  %v1601_v49 = vld [vmem:[%s6609_s5 + $0xb8] sm:$0xff] }
 0x281   : > { %4022 = vmatprep.subr.bf16.mxu1 %v4588_v48 }
 0x284   : > { %4024 = vmatpush1.bf16.msra.mxu1 %v4023_v54  ;;  %v4073_v54 = vpack.c.bf16 %v3482_v53, %v3480_v52  ;;  %v1598_v52 = vld [vmem:[%s6609_s5 + $0xa0] sm:$0xff]  ;;  %v1600_v53 = vld [vmem:[%s6609_s5 + $0xb0] sm:$0xff] }
 0x285   : > { %4025 = vmatprep.subr.bf16.mxu1 %v4588_v48 }
 0x288   : > { %4027 = vmatpush1.bf16.msra.mxu1 %v4026_v57  ;;  %v4075_v57 = vpack.c.bf16 %v3487_v56, %v3485_v55  ;;  %v1605_v55 = vld [vmem:[%s6609_s5 + $0xd8] sm:$0xff]  ;;  %v4105_v56 = vpack.c.bf16 %v1600_v53, %v1598_v52 }
 0x289   : > { %4028 = vmatprep.subr.bf16.mxu1 %v4588_v48 }
 0x28c   : > { %4030 = vmatpush1.bf16.msra.mxu1 %v4029_v60  ;;  %v4077_v60 = vpack.c.bf16 %v3486_v59, %v3484_v58  ;;  %v1602_v58 = vld [vmem:[%s6609_s5 + $0xc0] sm:$0xff]  ;;  %v1604_v59 = vld [vmem:[%s6609_s5 + $0xd0] sm:$0xff] }
 0x28d   : > { %4031 = vmatprep.subr.bf16.mxu1 %v4588_v48  ;;  %v4109_v62 = vpack.c.bf16 %v1604_v59, %v1602_v58  ;;  %v3537_v58 = vld [vmem:[%s6609_s5 + $0x2f8] sm:$0xff] }
 0x290   : > { %4033 = vmatpush1.bf16.msra.mxu1 %v4032_v63  ;;  %v3488_v63 = vld [vmem:[%s6609_s5 + $0x1a0] sm:$0xff] }
 0x291   : > { %4034 = vmatprep.subr.bf16.mxu1 %v4588_v48  ;;  %v4081_v4 = vpack.c.bf16 %v3490_v1, %v3488_v63  ;;  %v3498_v1 = vld [vmem:[%s6609_s5 + $0x1d0] sm:$0xff] }
 0x294   : > { %4036 = vmatpush1.bf16.msra.mxu1 %v4035_v2  ;;  %v1579_v2 = vld [vmem:[%s6609_s5 + $0x8] sm:$0xff] }
 0x295   : > { %4037 = vmatprep.subr.bf16.mxu1 %v4588_v48 }
 0x298   : > { %4039 = vmatpush1.bf16.msra.mxu1 %v4038_v5  ;;  %v4083_v5 = vpack.c.bf16 %v1581_v3, %v1579_v2  ;;  %v3501_v2 = vld [vmem:[%s6609_s5 + $0x1e8] sm:$0xff]  ;;  %v3503_v3 = vld [vmem:[%s6609_s5 + $0x1f8] sm:$0xff] }
 0x299   : > { %4040 = vmatprep.subr.bf16.mxu1 %v4588_v48 }
 0x29c   : > { %4042 = vmatpush1.bf16.msra.mxu1 %v4041_v9 }
 0x29d   : > { %4043 = vmatprep.subr.bf16.mxu1 %v4588_v48 }
 0x2a0   : > { %4045 = vmatpush1.bf16.msra.mxu1 %v4044_v14 }
 0x2a1   : > { %4046 = vmatprep.subr.bf16.mxu1 %v4588_v48 }
 0x2a4   : > { %4048 = vmatpush1.bf16.msra.mxu1 %v4047_v17 }
 0x2a5   : > { %4049 = vmatprep.subr.bf16.mxu1 %v4588_v48 }
 0x2a8   : > { %4051 = vmatpush1.bf16.msra.mxu1 %v4050_v20  ;;  %v1580_v20 = vld [vmem:[%s6609_s5 + $0x10] sm:$0xff] }
 0x2a9   : > { %4052 = vmatprep.subr.bf16.mxu1 %v4588_v48 }
 0x2ac   : > { %4054 = vmatpush1.bf16.msra.mxu1 %v4053_v23  ;;  %v4085_v23 = vpack.c.bf16 %v1580_v20, %v1578_v19  ;;  %v3509_v19 = vld [vmem:[%s6609_s5 + $0x228] sm:$0xff]  ;;  %v3511_v20 = vld [vmem:[%s6609_s5 + $0x238] sm:$0xff] }
 0x2ad   : > { %4056 = vmatprep.subr.bf16.mxu1 %v4055_v27  ;;  %v4123_v22 = vpack.c.bf16 %v3511_v20, %v3509_v19  ;;  %v3546_v19 = vld [vmem:[%s6609_s5 + $0x340] sm:$0xff]  ;;  %v3548_v20 = vld [vmem:[%s6609_s5 + $0x350] sm:$0xff] }
 0x2af   : > { %1560 = vmatmul.mubr.f32.vlgmr.msra.gmra.mrb[8].mxu1 %v5382_v34  ;;  %v3470_v34 = vld [vmem:[%s6609_s5 + $0x110] sm:$0xff] }
 0x2b0   : > { %3463 = vmatprep.mubr.msk.f32.mxu1 %vm1384_vm4, %v5394_v46  ;;  %4058 = vmatpush1.bf16.msra.mxu1 %v4057_v31  ;;  %v4061_v35 = vpack.c.bf16 %v3470_v34, %v3468_v33  ;;  %v3478_v46 = vld [vmem:[%s6609_s5 + $0x150] sm:$0xff]  ;;  %v4091_v31 = vpack.c.bf16 %v1589_v29, %v1587_v28  ;;  %v4127_v28 = vpack.c.bf16 %v3515_v26, %v3513_v25  ;;  %v3512_v29 = vld [vmem:[%s6609_s5 + $0x240] sm:$0xff] }
 0x2b1   : > { %4060 = vmatprep.subr.bf16.mxu1 %v4059_v32  ;;  %v4069_v47 = vpack.c.bf16 %v3478_v46, %v3476_v45  ;;  %v1586_v32 = vld [vmem:[%s6609_s5 + $0x40] sm:$0xff]  ;;  %v1588_v33 = vld [vmem:[%s6609_s5 + $0x50] sm:$0xff] }
 0x2b2   : > { %v4093_v37 = vpack.c.bf16 %v1588_v33, %v1586_v32  ;;  %v1594_v45 = vld [vmem:[%s6609_s5 + $0x80] sm:$0xff]  ;;  %v1596_v46 = vld [vmem:[%s6609_s5 + $0x90] sm:$0xff]  ;;  %v3519_v32 = vld [vmem:[%s6609_s5 + $0x278] sm:$0xff] }
 0x2b3   : > { %1565 = vmatmul.mubr.f32.gmra.mrb[10].mxu1 %v5391_v43  ;;  %v4065_v43 = vpack.c.bf16 %v3474_v40, %v3472_v39  ;;  %v1590_v39 = vld [vmem:[%s6609_s5 + $0x60] sm:$0xff]  ;;  %v1592_v40 = vld [vmem:[%s6609_s5 + $0x70] sm:$0xff]  ;;  %v4101_v50 = vpack.c.bf16 %v1596_v46, %v1594_v45 }
 0x2b4   : > { %1707 = vmatprep.mubr.f32.mxu1 %v4586_v7  ;;  %4062 = vmatpush1.bf16.msra.mxu1 %v4061_v35  ;;  %v1591_v35 = vld [vmem:[%s6609_s5 + $0x68] sm:$0xff]  ;;  %v3550_v25 = vld [vmem:[%s6609_s5 + $0x360] sm:$0xff]  ;;  %v3552_v26 = vld [vmem:[%s6609_s5 + $0x370] sm:$0xff] }
 0x2b5   : > { %4064 = vmatprep.subr.bf16.mxu1 %v4063_v38  ;;  %v4095_v38 = vpack.c.bf16 %v1593_v36, %v1591_v35  ;;  %v3516_v35 = vld [vmem:[%s6609_s5 + $0x260] sm:$0xff]  ;;  %v3518_v36 = vld [vmem:[%s6609_s5 + $0x270] sm:$0xff] }
 0x2b8   : > { %4066 = vmatpush1.bf16.msra.mxu1 %v4065_v43  ;;  %v4097_v43 = vpack.c.bf16 %v1592_v40, %v1590_v39  ;;  %v4133_v39 = vpack.c.bf16 %v3518_v36, %v3516_v35 }
 0x2b9   : > { %4068 = vmatprep.subr.bf16.mxu1 %v4067_v44  ;;  %v4099_v44 = vpack.c.bf16 %v1597_v42, %v1595_v41  ;;  %v3520_v41 = vld [vmem:[%s6609_s5 + $0x280] sm:$0xff]  ;;  %v3522_v42 = vld [vmem:[%s6609_s5 + $0x290] sm:$0xff] }
 0x2ba   : > { %v4137_v45 = vpack.c.bf16 %v3522_v42, %v3520_v41  ;;  %v3567_v41 = vld [vmem:[%s6609_s5 + $0x3d8] sm:$0xff] }
 0x2bc   : > { %4070 = vmatpush1.bf16.msra.mxu1 %v4069_v47  ;;  %v1599_v47 = vld [vmem:[%s6609_s5 + $0xa8] sm:$0xff] }
 0x2bd   : > { %4072 = vmatprep.subr.bf16.mxu1 %v4071_v51  ;;  %v4103_v51 = vpack.c.bf16 %v1601_v49, %v1599_v47  ;;  %v3526_v47 = vld [vmem:[%s6609_s5 + $0x2a0] sm:$0xff]  ;;  %v3528_v49 = vld [vmem:[%s6609_s5 + $0x2b0] sm:$0xff] }
 0x2be   : > { %v4141_v52 = vpack.c.bf16 %v3528_v49, %v3526_v47  ;;  %v3569_v47 = vld [vmem:[%s6609_s5 + $0x3e8] sm:$0xff]  ;;  %v3571_v49 = vld [vmem:[%s6609_s5 + $0x3f8] sm:$0xff] }
 0x2c0   : > { %4074 = vmatpush1.bf16.msra.mxu1 %v4073_v54  ;;  %v1603_v54 = vld [vmem:[%s6609_s5 + $0xc8] sm:$0xff] }
 0x2c1   : > { %4076 = vmatprep.subr.bf16.mxu1 %v4075_v57  ;;  %v4107_v57 = vpack.c.bf16 %v1605_v55, %v1603_v54  ;;  %v3530_v54 = vld [vmem:[%s6609_s5 + $0x2c0] sm:$0xff]  ;;  %v3532_v55 = vld [vmem:[%s6609_s5 + $0x2d0] sm:$0xff] }
 0x2c2   : > { %v4145_v59 = vpack.c.bf16 %v3532_v55, %v3530_v54  ;;  %v3573_v54 = vld [vmem:[%s6609_s5 + $0x408] sm:$0xff]  ;;  %v3575_v55 = vld [vmem:[%s6609_s5 + $0x418] sm:$0xff] }
 0x2c4   : > { %4078 = vmatpush1.bf16.msra.mxu1 %v4077_v60  ;;  %v3497_v60 = vld [vmem:[%s6609_s5 + $0x1c8] sm:$0xff] }
 0x2c5   : > { %4080 = vmatprep.subr.bf16.mxu1 %v4079_v0  ;;  %v4111_v63 = vpack.c.bf16 %v3499_v61, %v3497_v60  ;;  %v3496_v0 = vld [vmem:[%s6609_s5 + $0x1c0] sm:$0xff] }
 0x2c6   : > { %v3534_v61 = vld [vmem:[%s6609_s5 + $0x2e0] sm:$0xff] }
 0x2c8   : > { %4082 = vmatpush1.bf16.msra.mxu1 %v4081_v4  ;;  %v4113_v4 = vpack.c.bf16 %v3498_v1, %v3496_v0  ;;  %v3539_v0 = vld [vmem:[%s6609_s5 + $0x308] sm:$0xff]  ;;  %v3541_v1 = vld [vmem:[%s6609_s5 + $0x318] sm:$0xff] }
 0x2c9   : > { %4084 = vmatprep.subr.bf16.mxu1 %v4083_v5  ;;  %v4115_v5 = vpack.c.bf16 %v3503_v3, %v3501_v2  ;;  %v4151_v3 = vpack.c.bf16 %v3541_v1, %v3539_v0  ;;  %v3576_v0 = vld [vmem:[%s6609_s5 + $0x420] sm:$0xff]  ;;  %v3578_v1 = vld [vmem:[%s6609_s5 + $0x430] sm:$0xff] }
 0x34a   : > { %v1457_v6 = vpop.f32.mrb[4].mxu1 }
 0x34b   : > { %v1459_v8 = vpop.f32.mrb[5].mxu1 }
 0x34c   : > { %v3502_v8 = vld [vmem:[%s6609_s5 + $0x1f0] sm:$0xff] }
 0x34e   : > { %v1462_v9 = vpop.f32.mrb[6].mxu1 }
 0x34f   : > { %v1464_v10 = vpop.f32.mrb[7].mxu1 }
 0x350   : > { %v3505_v10 = vld [vmem:[%s6609_s5 + $0x208] sm:$0xff] }
 0x382   : > { %v1561_v12 = vpop.f32.mrb[8].mxu1 }
 0x383   : > { %v1570_v14 = vmax.f32 %v1457_v6, %v1561_v12  ;;  %v1563_v15 = vpop.f32.mrb[9].mxu1  ;;  %v3500_v6 = vld [vmem:[%s6609_s5 + $0x1e0] sm:$0xff]  ;;  %v3507_v12 = vld [vmem:[%s6609_s5 + $0x218] sm:$0xff] }
 0x384   : > { %v4119_v15 = vpack.c.bf16 %v3507_v12, %v3505_v10  ;;  %v3542_v12 = vld [vmem:[%s6609_s5 + $0x320] sm:$0xff] }
 0x385   : > { %1573 = vst.msk [vmem:[#allocation2] sm:$0xff] %vm1572_vm5, %v1570_v14  ;;  %v4117_v14 = vpack.c.bf16 %v3502_v8, %v3500_v6  ;;  %v3543_v6 = vld [vmem:[%s6609_s5 + $0x328] sm:$0xff]  ;;  %v3545_v8 = vld [vmem:[%s6609_s5 + $0x338] sm:$0xff] }
 0x386   : > { %v1566_v16 = vpop.f32.mrb[10].mxu1  ;;  %v4155_v10 = vpack.c.bf16 %v3545_v8, %v3543_v6  ;;  %v3580_v6 = vld [vmem:[%s6609_s5 + $0x440] sm:$0xff]  ;;  %v3582_v8 = vld [vmem:[%s6609_s5 + $0x450] sm:$0xff] }
 0x387   : > { %v1571_v17 = vmax.f32 %v1462_v9, %v1566_v16  ;;  %v1568_v18 = vpop.f32.mrb[11].mxu1  ;;  %v3504_v16 = vld [vmem:[%s6609_s5 + $0x200] sm:$0xff] }
 0x389   : > { %1575 = vst.msk [vmem:[#allocation2 + $0x8] sm:$0x3f] %vm1574_vm6, %v1571_v17  ;;  %v3506_v17 = vld [vmem:[%s6609_s5 + $0x210] sm:$0xff] }
 0x38a   : > { %v4121_v21 = vpack.c.bf16 %v3506_v17, %v3504_v16  ;;  %v3549_v16 = vld [vmem:[%s6609_s5 + $0x358] sm:$0xff] }
 0x38c   : > { %v1576_v9 = vld [vmem:[#allocation2] sm:$0xff] }
 0x390   : > { %v1606_v27 = vld [vmem:[#allocation2 + $0x1] sm:$0xff]  ;;  %v1607_v34 = vld [vmem:[#allocation2 + $0x9] sm:$0x3] }
 0x391   : > { %3492 = vmatmul.mubr.msk.f32.vlgmr.msra.gmra.mrb[12].mxu1 %vm1572_vm5, %v1606_v27  ;;  %v1577_v18 = vld [vmem:[#allocation2 + $0x8] sm:$0x3] }
 0x392   : > { %4086 = vmatpush1.bf16.msra.mxu1 %v4085_v23  ;;  %1713 = vmatprep.mubr.f32.mxu1 %v4586_v7  ;;  %v3508_v23 = vld [vmem:[%s6609_s5 + $0x220] sm:$0xff] }
 0x393   : > { %4088 = vmatprep.subr.bf16.mxu1 %v4087_v24  ;;  %v3510_v24 = vld [vmem:[%s6609_s5 + $0x230] sm:$0xff] }
 0x394   : > { %v4125_v27 = vpack.c.bf16 %v3510_v24, %v3508_v23  ;;  %v4161_v23 = vpack.c.bf16 %v3548_v20, %v3546_v19 }
 0x395   : > { %3493 = vmatmul.mubr.msk.f32.gmra.mrb[14].mxu1 %vm1572_vm5, %v1607_v34 }
 0x396   : > { %4090 = vmatpush1.bf16.msra.mxu1 %v4089_v30  ;;  %1790 = vmatprep.mubr.f32.mxu1 %v4586_v7  ;;  %v3514_v30 = vld [vmem:[%s6609_s5 + $0x250] sm:$0xff] }
 0x397   : > { %4092 = vmatprep.subr.bf16.mxu1 %v4091_v31  ;;  %v3517_v31 = vld [vmem:[%s6609_s5 + $0x268] sm:$0xff]  ;;  %v4129_v33 = vpack.c.bf16 %v3514_v30, %v3512_v29  ;;  %v4165_v29 = vpack.c.bf16 %v3552_v26, %v3550_v25 }
 0x398   : > { %v4131_v34 = vpack.c.bf16 %v3519_v32, %v3517_v31  ;;  %v3556_v31 = vld [vmem:[%s6609_s5 + $0x380] sm:$0xff]  ;;  %v3558_v32 = vld [vmem:[%s6609_s5 + $0x390] sm:$0xff] }
 0x399   : > { %v4169_v35 = vpack.c.bf16 %v3558_v32, %v3556_v31  ;;  %v2177_v31 = vld [vmem:[%s6611_s7] sm:$0x1f] }
 0x39a   : > { %4094 = vmatpush1.bf16.msra.mxu1 %v4093_v37  ;;  %v3521_v37 = vld [vmem:[%s6609_s5 + $0x288] sm:$0xff]  ;;  %v2338_v32 = vld [vmem:[%s6612_s8] sm:$0xff] }
 0x39b   : > { %4096 = vmatprep.subr.bf16.mxu1 %v4095_v38  ;;  %v3523_v38 = vld [vmem:[%s6609_s5 + $0x298] sm:$0xff] }
 0x39c   : > { %v4135_v40 = vpack.c.bf16 %v3523_v38, %v3521_v37  ;;  %v3560_v37 = vld [vmem:[%s6609_s5 + $0x3a0] sm:$0xff]  ;;  %v3562_v38 = vld [vmem:[%s6609_s5 + $0x3b0] sm:$0xff] }
 0x39d   : > { %v4173_v42 = vpack.c.bf16 %v3562_v38, %v3560_v37  ;;  %v2341_v37 = vld [vmem:[%s6612_s8 + $0x18] sm:$0xff] }
 0x39e   : > { %4098 = vmatpush1.bf16.msra.mxu1 %v4097_v43  ;;  %v3527_v43 = vld [vmem:[%s6609_s5 + $0x2a8] sm:$0xff] }
 0x39f   : > { %4100 = vmatprep.subr.bf16.mxu1 %v4099_v44  ;;  %v3529_v44 = vld [vmem:[%s6609_s5 + $0x2b8] sm:$0xff] }
 0x3a0   : > { %v4139_v46 = vpack.c.bf16 %v3529_v44, %v3527_v43  ;;  %v3564_v44 = vld [vmem:[%s6609_s5 + $0x3c0] sm:$0xff] }
 0x3a2   : > { %4102 = vmatpush1.bf16.msra.mxu1 %v4101_v50  ;;  %v3531_v50 = vld [vmem:[%s6609_s5 + $0x2c8] sm:$0xff] }
 0x3a3   : > { %4104 = vmatprep.subr.bf16.mxu1 %v4103_v51  ;;  %v3533_v51 = vld [vmem:[%s6609_s5 + $0x2d8] sm:$0xff] }
 0x3a4   : > { %v4143_v53 = vpack.c.bf16 %v3533_v51, %v3531_v50  ;;  %v4179_v51 = vpack.c.bf16 %v3571_v49, %v3569_v47  ;;  %v2348_v49 = vld [vmem:[%s6612_s8 + $0x50] sm:$0xff] }
 0x3a6   : > { %4106 = vmatpush1.bf16.msra.mxu1 %v4105_v56  ;;  %v1803_v56 = vld [vmem:[#allocation2 + $0x2] sm:$0xff] }
 0x3a7   : > { %4108 = vmatprep.subr.bf16.mxu1 %v4107_v57  ;;  %v3535_v57 = vld [vmem:[%s6609_s5 + $0x2e8] sm:$0xff] }
 0x3a8   : > { %v4147_v60 = vpack.c.bf16 %v3537_v58, %v3535_v57  ;;  %v4183_v57 = vpack.c.bf16 %v3575_v55, %v3573_v54  ;;  %v3572_v58 = vld [vmem:[%s6609_s5 + $0x400] sm:$0xff]  ;;  %v2352_v55 = vld [vmem:[%s6612_s8 + $0x70] sm:$0xff] }
 0x3aa   : > { %4110 = vmatpush1.bf16.msra.mxu1 %v4109_v62  ;;  %v3536_v62 = vld [vmem:[%s6609_s5 + $0x2f0] sm:$0xff] }
 0x3ab   : > { %4112 = vmatprep.subr.bf16.mxu1 %v4111_v63  ;;  %v1804_v63 = vld [vmem:[#allocation2 + $0xa] sm:$0x3]  ;;  %v4149_v2 = vpack.c.bf16 %v3536_v62, %v3534_v61  ;;  %v3579_v61 = vld [vmem:[%s6609_s5 + $0x438] sm:$0xff] }
 0x3ad   : > { %3494 = vmatmul.mubr.msk.f32.vlgmr.msra.gmra.mrb[12].mxu1 %vm1572_vm5, %v1576_v9 }
 0x3ae   : > { %4114 = vmatpush1.bf16.msra.mxu1 %v4113_v4  ;;  %1796 = vmatprep.mubr.f32.mxu1 %v4586_v7  ;;  %v3538_v4 = vld [vmem:[%s6609_s5 + $0x300] sm:$0xff] }
 0x3af   : > { %4116 = vmatprep.subr.bf16.mxu1 %v4115_v5  ;;  %v3540_v5 = vld [vmem:[%s6609_s5 + $0x310] sm:$0xff] }
 0x3b0   : > { %v4153_v9 = vpack.c.bf16 %v3540_v5, %v3538_v4  ;;  %v4189_v4 = vpack.c.bf16 %v3578_v1, %v3576_v0 }
 0x3b1   : > { %3495 = vmatmul.mubr.msk.f32.gmra.mrb[14].mxu1 %vm1572_vm5, %v1577_v18 }
 0x3b2   : > { %4118 = vmatpush1.bf16.msra.mxu1 %v4117_v14  ;;  %1904 = vmatprep.mubr.f32.mxu1 %v4586_v7  ;;  %v3544_v14 = vld [vmem:[%s6609_s5 + $0x330] sm:$0xff] }
 0x3b3   : > { %4120 = vmatprep.subr.bf16.mxu1 %v4119_v15  ;;  %v3547_v15 = vld [vmem:[%s6609_s5 + $0x348] sm:$0xff]  ;;  %v4157_v17 = vpack.c.bf16 %v3544_v14, %v3542_v12  ;;  %v2157_v14 = vld [vmem:[%s6610_s6] sm:$0x3] }
 0x3b4   : > { %v4159_v18 = vpack.c.bf16 %v3549_v16, %v3547_v15  ;;  %v2040_v12 = vld [vmem:[#allocation2 + $0xc] sm:$0x3]  ;;  %v2162_v15 = vrot.slane %v2157_v14, %v5248_v11 }
 0x3b6   : > { %4122 = vmatpush1.bf16.msra.mxu1 %v4121_v21  ;;  %v3551_v21 = vld [vmem:[%s6609_s5 + $0x368] sm:$0xff] }
 0x3b7   : > { %4124 = vmatprep.subr.bf16.mxu1 %v4123_v22  ;;  %v3553_v22 = vld [vmem:[%s6609_s5 + $0x378] sm:$0xff] }
 0x3b8   : > { %v4163_v24 = vpack.c.bf16 %v3553_v22, %v3551_v21 }
 0x3ba   : > { %4126 = vmatpush1.bf16.msra.mxu1 %v4125_v27  ;;  %v3557_v27 = vld [vmem:[%s6609_s5 + $0x388] sm:$0xff] }
 0x3bb   : > { %4128 = vmatprep.subr.bf16.mxu1 %v4127_v28  ;;  %v3559_v28 = vld [vmem:[%s6609_s5 + $0x398] sm:$0xff] }
 0x3bc   : > { %v4167_v30 = vpack.c.bf16 %v3559_v28, %v3557_v27 }
 0x3be   : > { %4130 = vmatpush1.bf16.msra.mxu1 %v4129_v33  ;;  %v3561_v33 = vld [vmem:[%s6609_s5 + $0x3a8] sm:$0xff] }
 0x3bf   : > { %4132 = vmatprep.subr.bf16.mxu1 %v4131_v34  ;;  %v3563_v34 = vld [vmem:[%s6609_s5 + $0x3b8] sm:$0xff] }
 0x3c0   : > { %v4171_v36 = vpack.c.bf16 %v3563_v34, %v3561_v33  ;;  %v2339_v33 = vld [vmem:[%s6612_s8 + $0x8] sm:$0xff] }
 0x3c1   : > { %v3589_v34 = vld [vmem:[%s6611_s7 + $0x8] sm:$0x1f] }
 0x3c2   : > { %4134 = vmatpush1.bf16.msra.mxu1 %v4133_v39  ;;  %v1921_v39 = vld [vmem:[#allocation2 + $0x3] sm:$0xff] }
 0x3c3   : > { %4136 = vmatprep.subr.bf16.mxu1 %v4135_v40  ;;  %v3565_v40 = vld [vmem:[%s6609_s5 + $0x3c8] sm:$0xff] }
 0x3c4   : > { %v4175_v43 = vpack.c.bf16 %v3567_v41, %v3565_v40  ;;  %v2343_v40 = vld [vmem:[%s6612_s8 + $0x28] sm:$0xff] }
 0x3c6   : > { %4138 = vmatpush1.bf16.msra.mxu1 %v4137_v45  ;;  %v3566_v45 = vld [vmem:[%s6609_s5 + $0x3d0] sm:$0xff] }
 0x3c7   : > { %4140 = vmatprep.subr.bf16.mxu1 %v4139_v46  ;;  %v1922_v46 = vld [vmem:[#allocation2 + $0xb] sm:$0x3]  ;;  %v4177_v50 = vpack.c.bf16 %v3566_v45, %v3564_v44  ;;  %v2346_v45 = vld [vmem:[%s6612_s8 + $0x40] sm:$0xff] }
 0x3c9   : > { %3524 = vmatmul.mubr.msk.f32.vlgmr.msra.gmra.mrb[12].mxu1 %vm1572_vm5, %v1803_v56 }
 0x3ca   : > { %4142 = vmatpush1.bf16.msra.mxu1 %v4141_v52  ;;  %1910 = vmatprep.mubr.f32.mxu1 %v4586_v7  ;;  %v3568_v52 = vld [vmem:[%s6609_s5 + $0x3e0] sm:$0xff] }
 0x3cb   : > { %4144 = vmatprep.subr.bf16.mxu1 %v4143_v53  ;;  %v3570_v53 = vld [vmem:[%s6609_s5 + $0x3f0] sm:$0xff] }
 0x3cc   : > { %v4181_v56 = vpack.c.bf16 %v3570_v53, %v3568_v52  ;;  %v2350_v52 = vld [vmem:[%s6612_s8 + $0x60] sm:$0xff]  ;;  %v2351_v53 = vld [vmem:[%s6612_s8 + $0x68] sm:$0xff] }
 0x3cd   : > { %3525 = vmatmul.mubr.msk.f32.gmra.mrb[14].mxu1 %vm1572_vm5, %v1804_v63  ;;  %v4226_v54 = vpack.c.bf16 %v2351_v53, %v2350_v52  ;;  %v2534_v53 = vld [vmem:[%s6613_s9 + $0x38] sm:$0xff] }
 0x3ce   : > { %4146 = vmatpush1.bf16.msra.mxu1 %v4145_v59  ;;  %2022 = vmatprep.mubr.f32.mxu1 %v4586_v7  ;;  %v3574_v59 = vld [vmem:[%s6609_s5 + $0x410] sm:$0xff] }
 0x3cf   : > { %4148 = vmatprep.subr.bf16.mxu1 %v4147_v60  ;;  %v3577_v60 = vld [vmem:[%s6609_s5 + $0x428] sm:$0xff]  ;;  %v4185_v62 = vpack.c.bf16 %v3574_v59, %v3572_v58  ;;  %v2354_v58 = vld [vmem:[%s6612_s8 + $0x80] sm:$0xff] }
 0x3d0   : > { %v4187_v63 = vpack.c.bf16 %v3579_v61, %v3577_v60  ;;  %v2355_v59 = vld [vmem:[%s6612_s8 + $0x88] sm:$0xff]  ;;  %v2356_v61 = vld [vmem:[%s6612_s8 + $0x90] sm:$0xff] }
 0x3d1   : > { %v4232_v60 = vpack.c.bf16 %v2355_v59, %v2354_v58  ;;  %v2531_v58 = vld [vmem:[%s6613_s9 + $0x20] sm:$0xff]  ;;  %v2533_v59 = vld [vmem:[%s6613_s9 + $0x30] sm:$0xff] }
 0x3d2   : > { %4150 = vmatpush1.bf16.msra.mxu1 %v4149_v2  ;;  %v3581_v2 = vld [vmem:[%s6609_s5 + $0x448] sm:$0xff] }
 0x3d3   : > { %4152 = vmatprep.subr.bf16.mxu1 %v4151_v3  ;;  %v3583_v3 = vld [vmem:[%s6609_s5 + $0x458] sm:$0xff] }
 0x3d4   : > { %v4191_v5 = vpack.c.bf16 %v3583_v3, %v3581_v2  ;;  %v3594_v2 = vld [vmem:[%s6612_s8 + $0xa0] sm:$0xff]  ;;  %v3595_v3 = vld [vmem:[%s6612_s8 + $0xa8] sm:$0xff] }
 0x3d6   : > { %4154 = vmatpush1.bf16.msra.mxu1 %v4153_v9  ;;  %v4193_v9 = vpack.c.bf16 %v3582_v8, %v3580_v6 }
 0x3d7   : > { %4156 = vmatprep.subr.bf16.mxu1 %v4155_v10  ;;  %v2039_v10 = vld [vmem:[#allocation2 + $0x4] sm:$0xff] }
 0x3da   : > { %4158 = vmatpush1.bf16.msra.mxu1 %v4157_v17  ;;  %v2166_v17 = vrot.slane %v2157_v14, %v5253_v13 }
 0x3db   : > { %4160 = vmatprep.subr.bf16.mxu1 %v4159_v18 }
 0x3de   : > { %4162 = vmatpush1.bf16.msra.mxu1 %v4161_v23 }
 0x3df   : > { %4164 = vmatprep.subr.bf16.mxu1 %v4163_v24 }
 0x3e2   : > { %4166 = vmatpush1.bf16.msra.mxu1 %v4165_v29 }
 0x3e3   : > { %4168 = vmatprep.subr.bf16.mxu1 %v4167_v30 }
 0x3e5   : > { %3554 = vmatmul.mubr.msk.f32.vlgmr.msra.gmra.mrb[12].mxu1 %vm1572_vm5, %v1921_v39  ;;  %v2342_v39 = vld [vmem:[%s6612_s8 + $0x20] sm:$0xff] }
 0x3e6   : > { %4170 = vmatpush1.bf16.msra.mxu1 %v4169_v35  ;;  %2028 = vmatprep.mubr.f32.mxu1 %v4586_v7  ;;  %v4208_v35 = vpack.c.bf16 %v2339_v33, %v2338_v32  ;;  %v4214_v41 = vpack.c.bf16 %v2343_v40, %v2342_v39  ;;  %v3610_v33 = vld [vmem:[%s6612_s8 + $0x120] sm:$0xff]  ;;  %v2528_v39 = vld [vmem:[%s6613_s9 + $0x8] sm:$0xff]  ;;  %v2530_v40 = vld [vmem:[%s6613_s9 + $0x18] sm:$0xff] }
 0x3e7   : > { %4172 = vmatprep.subr.bf16.mxu1 %v4171_v36  ;;  %v2340_v36 = vld [vmem:[%s6612_s8 + $0x10] sm:$0xff] }
 0x3e8   : > { %v4211_v38 = vpack.c.bf16 %v2341_v37, %v2340_v36  ;;  %v3612_v36 = vld [vmem:[%s6612_s8 + $0x130] sm:$0xff]  ;;  %v3613_v37 = vld [vmem:[%s6612_s8 + $0x138] sm:$0xff] }
 0x3e9   : > { %3555 = vmatmul.mubr.msk.f32.gmra.mrb[14].mxu1 %vm1572_vm5, %v1922_v46  ;;  %v2347_v46 = vld [vmem:[%s6612_s8 + $0x48] sm:$0xff] }
 0x3ea   : > { %4174 = vmatpush1.bf16.msra.mxu1 %v4173_v42  ;;  %2140 = vmatprep.mubr.f32.mxu1 %v4586_v7  ;;  %v2344_v42 = vld [vmem:[%s6612_s8 + $0x30] sm:$0xff]  ;;  %v4220_v47 = vpack.c.bf16 %v2347_v46, %v2346_v45 }
 0x3eb   : > { %4176 = vmatprep.subr.bf16.mxu1 %v4175_v43  ;;  %v2345_v43 = vld [vmem:[%s6612_s8 + $0x38] sm:$0xff]  ;;  %v2529_v45 = vld [vmem:[%s6613_s9 + $0x10] sm:$0xff] }
 0x3ec   : > { %v4217_v44 = vpack.c.bf16 %v2345_v43, %v2344_v42  ;;  %v4287_v42 = vpack.c.bf16 %v2530_v40, %v2528_v39  ;;  %v3618_v43 = vld [vmem:[%s6613_s9 + $0xb8] sm:$0xff] }
 0x3ed   : > { %v3640_v40 = vld [vmem:[%s6613_s9 + $0x158] sm:$0xff] }
 0x3ee   : > { %4178 = vmatpush1.bf16.msra.mxu1 %v4177_v50  ;;  %v2349_v50 = vld [vmem:[%s6612_s8 + $0x58] sm:$0xff] }
 0x3ef   : > { %4180 = vmatprep.subr.bf16.mxu1 %v4179_v51  ;;  %v4223_v51 = vpack.c.bf16 %v2349_v50, %v2348_v49  ;;  %v3615_v49 = vld [vmem:[%s6613_s9 + $0xa0] sm:$0xff]  ;;  %v3617_v50 = vld [vmem:[%s6613_s9 + $0xb0] sm:$0xff] }
 0x3f0   : > { %v4269_v52 = vpack.c.bf16 %v3617_v50, %v3615_v49  ;;  %v3639_v49 = vld [vmem:[%s6613_s9 + $0x150] sm:$0xff]  ;;  %v3642_v50 = vld [vmem:[%s6613_s9 + $0x168] sm:$0xff] }
 0x3f2   : > { %4182 = vmatpush1.bf16.msra.mxu1 %v4181_v56  ;;  %v2353_v56 = vld [vmem:[%s6612_s8 + $0x78] sm:$0xff] }
 0x3f3   : > { %4184 = vmatprep.subr.bf16.mxu1 %v4183_v57  ;;  %v4229_v57 = vpack.c.bf16 %v2353_v56, %v2352_v55  ;;  %v3622_v55 = vld [vmem:[%s6613_s9 + $0xd8] sm:$0xff] }
 0x3f6   : > { %4186 = vmatpush1.bf16.msra.mxu1 %v4185_v62  ;;  %v2357_v62 = vld [vmem:[%s6612_s8 + $0x98] sm:$0xff] }
 0x3f7   : > { %4188 = vmatprep.subr.bf16.mxu1 %v4187_v63  ;;  %v4235_v63 = vpack.c.bf16 %v2357_v62, %v2356_v61  ;;  %v4293_v61 = vpack.c.bf16 %v2533_v59, %v2531_v58  ;;  %v3621_v62 = vld [vmem:[%s6613_s9 + $0xd0] sm:$0xff]  ;;  %v3648_v59 = vld [vmem:[%s6613_s9 + $0x198] sm:$0xff] }
 0x3fa   : > { %4190 = vmatpush1.bf16.msra.mxu1 %v4189_v4 }
 0x3fb   : > { %4192 = vmatprep.subr.bf16.mxu1 %v4191_v5 }
 0x3fe   : > { %4194 = vmatpush1.bf16.msra.mxu1 %v4193_v9  ;;  %v4238_v9 = vpack.c.bf16 %v3595_v3, %v3594_v2  ;;  %v3624_v3 = vld [vmem:[%s6613_s9 + $0xe8] sm:$0xff] }
 0x401   : > { %3584 = vmatmul.mubr.msk.f32.vlgmr.msra.gmra.mrb[12].mxu1 %vm1572_vm5, %v2039_v10  ;;  %v3596_v10 = vld [vmem:[%s6612_s8 + $0xb0] sm:$0xff] }
 0x402   : > { %2146 = vmatprep.mubr.f32.mxu1 %v4586_v7 }
 0x405   : > { %3585 = vmatmul.mubr.msk.f32.gmra.mrb[14].mxu1 %vm1572_vm5, %v2040_v12  ;;  %v3597_v12 = vld [vmem:[%s6612_s8 + $0xb8] sm:$0xff] }
 0x406   : > { %2637 = vmatprep.mubr.f32.mxu1 %v4586_v7  ;;  %v4241_v14 = vpack.c.bf16 %v3597_v12, %v3596_v10  ;;  %v3623_v10 = vld [vmem:[%s6613_s9 + $0xe0] sm:$0xff]  ;;  %v3625_v12 = vld [vmem:[%s6613_s9 + $0xf0] sm:$0xff] }
 0x4d4   : > { %v2142_v16 = vpop.f32.mrb[12].mxu1 }
 0x4d5   : > { %v2144_v18 = vpop.f32.mrb[13].mxu1  ;;  %v2169_v19 = vadd.f32 %v2162_v15, %v2142_v16  ;;  %v3599_v16 = vld [vmem:[%s6612_s8 + $0xc8] sm:$0xff] }
 0x4d6   : > { %v2170_v20 = vadd.f32 %v2166_v17, %v2144_v18  ;;  %v3600_v18 = vld [vmem:[%s6612_s8 + $0xd0] sm:$0xff] }
 0x4d7   : > { %v2173_v25 = vmax.f32 %v2169_v19, 0.0  ;;  %v3601_v19 = vld [vmem:[%s6612_s8 + $0xd8] sm:$0xff] }
 0x4d8   : > { %v2148_v21 = vpop.f32.mrb[14].mxu1  ;;  %v2174_v27 = vmax.f32 %v2170_v20, 0.0  ;;  %v4247_v20 = vpack.c.bf16 %v3601_v19, %v3600_v18  ;;  %v3628_v18 = vld [vmem:[%s6613_s9 + $0x108] sm:$0xff]  ;;  %v3630_v19 = vld [vmem:[%s6613_s9 + $0x118] sm:$0xff] }
 0x4d9   : > { %v2171_v22 = vadd.f32 %v2162_v15, %v2148_v21  ;;  %v2150_v23 = vpop.f32.mrb[15].mxu1  ;;  %v3598_v15 = vld [vmem:[%s6612_s8 + $0xc0] sm:$0xff] }
 0x4da   : > { %v2172_v24 = vadd.f32 %v2166_v17, %v2150_v23  ;;  %v4244_v17 = vpack.c.bf16 %v3599_v16, %v3598_v15  ;;  %v3602_v21 = vld [vmem:[%s6612_s8 + $0xe0] sm:$0xff]  ;;  %v2540_v15 = vld [vmem:[%s6613_s9 + $0x68] sm:$0xff]  ;;  %v2542_v16 = vld [vmem:[%s6613_s9 + $0x78] sm:$0xff] }
 0x4db   : > { %v2175_v26 = vmax.f32 %v2171_v22, 0.0  ;;  %v3603_v22 = vld [vmem:[%s6612_s8 + $0xe8] sm:$0xff] }
 0x4dc   : > { %v2176_v28 = vmax.f32 %v2172_v24, 0.0  ;;  %v4250_v23 = vpack.c.bf16 %v3603_v22, %v3602_v21  ;;  %v3604_v24 = vld [vmem:[%s6612_s8 + $0xf0] sm:$0xff]  ;;  %v4279_v21 = vpack.c.bf16 %v3630_v19, %v3628_v18  ;;  %v3658_v19 = vld [vmem:[%s6613_s9 + $0x1e0] sm:$0xff] }
 0x4dd   : > { %v4198_v29 = vpack.c.bf16 %v2175_v26, %v2173_v25  ;;  %v3605_v25 = vld [vmem:[%s6612_s8 + $0xf8] sm:$0xff]  ;;  %v2541_v22 = vld [vmem:[%s6613_s9 + $0x70] sm:$0xff] }
 0x4de   : > { %v4195_v30 = vpack.c.bf16 %v2176_v28, %v2174_v27  ;;  %v4253_v26 = vpack.c.bf16 %v3605_v25, %v3604_v24  ;;  %v3606_v27 = vld [vmem:[%s6612_s8 + $0x100] sm:$0xff]  ;;  %v3607_v28 = vld [vmem:[%s6612_s8 + $0x108] sm:$0xff]  ;;  %v3629_v24 = vld [vmem:[%s6613_s9 + $0x110] sm:$0xff] }
 0x4e0   : > { %4197 = vmatprep.subr.msk.bf16.mxu0 %vm4196_vm8, %v4195_v30 }
 0x4e1   : > { %4200 = vmatpush1.bf16.msk.msra.mxu0 %vm4196_vm8, %v4198_v29 }
 0x4e2   : > { %4203 = vmatprep.subr.msk.bf16.mxu0 %vm4196_vm8, %v4195_v30  ;;  %v3608_v30 = vld [vmem:[%s6612_s8 + $0x110] sm:$0xff] }
 0x4e4   : > { %3588 = vmatmul.mubr.msk.f32.vlgmr.msra.gmra.mrb[12].mxu0 %vm2178_vm9, %v2177_v31  ;;  %v3609_v31 = vld [vmem:[%s6612_s8 + $0x118] sm:$0xff] }
 0x4e5   : > { %4206 = vmatpush1.bf16.msk.msra.mxu0 %vm4196_vm8, %v4198_v29  ;;  %2329 = vmatprep.mubr.f32.mxu0 %v4586_v7  ;;  %v4256_v29 = vpack.c.bf16 %v3607_v28, %v3606_v27  ;;  %v4259_v32 = vpack.c.bf16 %v3609_v31, %v3608_v30  ;;  %v2544_v27 = vld [vmem:[%s6613_s9 + $0x88] sm:$0xff]  ;;  %v2546_v28 = vld [vmem:[%s6613_s9 + $0x98] sm:$0xff] }
 0x4e6   : > { %4207 = vmatprep.subr.bf16.mxu0 %v4588_v48  ;;  %v4303_v30 = vpack.c.bf16 %v2546_v28, %v2544_v27  ;;  %v3634_v31 = vld [vmem:[%s6613_s9 + $0x138] sm:$0xff]  ;;  %v3667_v28 = vld [vmem:[%s6613_s9 + $0x228] sm:$0xff] }
 0x4e8   : > { %3592 = vmatmul.mubr.msk.f32.vlgmr.msra.gmra.mrb[14].mxu0 %vm2178_vm9, %v3589_v34  ;;  %v3611_v34 = vld [vmem:[%s6612_s8 + $0x128] sm:$0xff] }
 0x4e9   : > { %4209 = vmatpush1.bf16.msra.mxu0 %v4208_v35  ;;  %v4262_v35 = vpack.c.bf16 %v3611_v34, %v3610_v33  ;;  %v2545_v33 = vld [vmem:[%s6613_s9 + $0x90] sm:$0xff] }
 0x4ea   : > { %4210 = vmatprep.subr.bf16.mxu0 %v4588_v48 }
 0x4ed   : > { %4212 = vmatpush1.bf16.msra.mxu0 %v4211_v38  ;;  %v4265_v38 = vpack.c.bf16 %v3613_v37, %v3612_v36  ;;  %v3631_v36 = vld [vmem:[%s6613_s9 + $0x120] sm:$0xff]  ;;  %v3633_v37 = vld [vmem:[%s6613_s9 + $0x130] sm:$0xff] }
 0x4ee   : > { %4213 = vmatprep.subr.bf16.mxu0 %v4588_v48  ;;  %v4285_v39 = vpack.c.bf16 %v3633_v37, %v3631_v36 }
 0x4f1   : > { %4215 = vmatpush1.bf16.msra.mxu0 %v4214_v41  ;;  %v3616_v41 = vld [vmem:[%s6613_s9 + $0xa8] sm:$0xff] }
 0x4f2   : > { %4216 = vmatprep.subr.bf16.mxu0 %v4588_v48  ;;  %v4267_v46 = vpack.c.bf16 %v3618_v43, %v3616_v41 }
 0x4f4   : > { %4268 = vmatprep.subr.bf16.mxu1 %v4267_v46 }
 0x4f5   : > { %4218 = vmatpush1.bf16.msra.mxu0 %v4217_v44  ;;  %v2527_v44 = vld [vmem:[%s6613_s9] sm:$0xff]  ;;  %4270 = vmatpush1.bf16.msra.mxu1 %v4269_v52 }
 0x4f6   : > { %4219 = vmatprep.subr.bf16.mxu0 %v4588_v48 }
 0x4f9   : > { %4221 = vmatpush1.bf16.msra.mxu0 %v4220_v47  ;;  %v4289_v47 = vpack.c.bf16 %v2529_v45, %v2527_v44 }
 0x4fa   : > { %4222 = vmatprep.subr.bf16.mxu0 %v4588_v48 }
 0x4fd   : > { %4224 = vmatpush1.bf16.msra.mxu0 %v4223_v51  ;;  %v2532_v51 = vld [vmem:[%s6613_s9 + $0x28] sm:$0xff] }
 0x4fe   : > { %4225 = vmatprep.subr.bf16.mxu0 %v4588_v48  ;;  %v4291_v56 = vpack.c.bf16 %v2534_v53, %v2532_v51  ;;  %v3644_v51 = vld [vmem:[%s6613_s9 + $0x178] sm:$0xff] }
 0x4ff   : > { %v4311_v53 = vpack.c.bf16 %v3644_v51, %v3642_v50  ;;  %v3679_v51 = vld [vmem:[%s6613_s9 + $0x280] sm:$0xff] }
 0x501   : > { %4227 = vmatpush1.bf16.msra.mxu0 %v4226_v54  ;;  %v3620_v54 = vld [vmem:[%s6613_s9 + $0xc8] sm:$0xff] }
 0x502   : > { %4228 = vmatprep.subr.bf16.mxu0 %v4588_v48 }
 0x505   : > { %4230 = vmatpush1.bf16.msra.mxu0 %v4229_v57  ;;  %v4271_v57 = vpack.c.bf16 %v3622_v55, %v3620_v54  ;;  %v3641_v54 = vld [vmem:[%s6613_s9 + $0x160] sm:$0xff]  ;;  %v3643_v55 = vld [vmem:[%s6613_s9 + $0x170] sm:$0xff] }
 0x506   : > { %4231 = vmatprep.subr.bf16.mxu0 %v4588_v48 }
 0x507   : > { %4272 = vmatprep.subr.bf16.mxu1 %v4271_v57 }
 0x509   : > { %4233 = vmatpush1.bf16.msra.mxu0 %v4232_v60  ;;  %v3619_v60 = vld [vmem:[%s6613_s9 + $0xc0] sm:$0xff] }
 0x50a   : > { %4234 = vmatprep.subr.bf16.mxu0 %v4588_v48 }
 0x50d   : > { %4236 = vmatpush1.bf16.msra.mxu0 %v4235_v63  ;;  %v2536_v63 = vld [vmem:[%s6613_s9 + $0x48] sm:$0xff] }
 0x50e   : > { %4237 = vmatprep.subr.bf16.mxu0 %v4588_v48 }
 0x5b7   : > { %v2255_v0 = vpop.f32.mrb[12].mxu0 }
 0x5b8   : > { %v2257_v1 = vpop.f32.mrb[13].mxu0 }
 0x5bb   : > { %v2331_v4 = vpop.f32.mrb[14].mxu0 }
 0x5bc   : > { %v2336_v5 = vmax.f32 %v2255_v0, %v2331_v4  ;;  %v2333_v6 = vpop.f32.mrb[15].mxu0  ;;  %v2538_v0 = vld [vmem:[%s6613_s9 + $0x58] sm:$0xff] }
 0x5bd   : > { %v2337_v8 = vmax.f32 %v2257_v1, %v2333_v6  ;;  %v4273_v1 = vpack.c.bf16 %v3621_v62, %v3619_v60  ;;  %v4295_v2 = vpack.c.bf16 %v2538_v0, %v2536_v63  ;;  %v3626_v4 = vld [vmem:[%s6613_s9 + $0xf8] sm:$0xff]  ;;  %v4313_v60 = vpack.c.bf16 %v3643_v55, %v3641_v54  ;;  %v3645_v62 = vld [vmem:[%s6613_s9 + $0x180] sm:$0xff]  ;;  %v3647_v63 = vld [vmem:[%s6613_s9 + $0x190] sm:$0xff] }
 0x5be   : > { %v4275_v6 = vpack.c.bf16 %v3626_v4, %v3624_v3  ;;  %v3650_v0 = vld [vmem:[%s6613_s9 + $0x1a8] sm:$0xff]  ;;  %v3649_v4 = vld [vmem:[%s6613_s9 + $0x1a0] sm:$0xff]  ;;  %v3686_v54 = vld [vmem:[%s6613_s9 + $0x2b8] sm:$0xff] }
 0x5bf   : > { %3593 = vmatprep.mubr.msk.f32.mxu0 %vm2358_vm10, %v2337_v8  ;;  %4274 = vmatpush1.bf16.msra.mxu1 %v4273_v1  ;;  %v3652_v1 = vld [vmem:[%s6613_s9 + $0x1b8] sm:$0xff] }
 0x5c0   : > { %2427 = vmatmul.mubr.f32.vlgmr.msra.gmra.mrb[16].mxu0 %v2336_v5  ;;  %4276 = vmatprep.subr.bf16.mxu1 %v4275_v6  ;;  %v4319_v3 = vpack.c.bf16 %v3652_v1, %v3650_v0  ;;  %v3654_v6 = vld [vmem:[%s6613_s9 + $0x1c8] sm:$0xff]  ;;  %v3687_v0 = vld [vmem:[%s6613_s9 + $0x2c0] sm:$0xff]  ;;  %v3689_v1 = vld [vmem:[%s6613_s9 + $0x2d0] sm:$0xff] }
 0x5c1   : > { %4239 = vmatpush1.bf16.msra.mxu0 %v4238_v9  ;;  %3614 = vmatprep.mubr.msk.f32.mxu0 %vm2358_vm10, %v2337_v8  ;;  %v2537_v8 = vld [vmem:[%s6613_s9 + $0x50] sm:$0xff] }
 0x5c2   : > { %4240 = vmatprep.subr.bf16.mxu0 %v4588_v48 }
 0x5c5   : > { %4242 = vmatpush1.bf16.msra.mxu0 %v4241_v14  ;;  %v4277_v14 = vpack.c.bf16 %v3625_v12, %v3623_v10  ;;  %v3653_v12 = vld [vmem:[%s6613_s9 + $0x1c0] sm:$0xff] }
 0x5c6   : > { %4243 = vmatprep.subr.bf16.mxu0 %v4588_v48 }
 0x5c7   : > { %4278 = vmatpush1.bf16.msra.mxu1 %v4277_v14  ;;  %v3655_v14 = vld [vmem:[%s6613_s9 + $0x1d0] sm:$0xff] }
 0x5c8   : > { %4280 = vmatprep.subr.bf16.mxu1 %v4279_v21  ;;  %v3663_v21 = vld [vmem:[%s6613_s9 + $0x208] sm:$0xff] }
 0x5c9   : > { %4245 = vmatpush1.bf16.msra.mxu0 %v4244_v17  ;;  %v4299_v17 = vpack.c.bf16 %v2542_v16, %v2540_v15  ;;  %v3659_v15 = vld [vmem:[%s6613_s9 + $0x1e8] sm:$0xff]  ;;  %v3661_v16 = vld [vmem:[%s6613_s9 + $0x1f8] sm:$0xff] }
 0x5ca   : > { %4246 = vmatprep.subr.bf16.mxu0 %v4588_v48  ;;  %v4327_v18 = vpack.c.bf16 %v3661_v16, %v3659_v15  ;;  %v3695_v15 = vld [vmem:[%s6613_s9 + $0x300] sm:$0xff]  ;;  %v3697_v16 = vld [vmem:[%s6613_s9 + $0x310] sm:$0xff] }
 0x5cd   : > { %4248 = vmatpush1.bf16.msra.mxu0 %v4247_v20  ;;  %v2539_v20 = vld [vmem:[%s6613_s9 + $0x60] sm:$0xff] }
 0x5ce   : > { %4249 = vmatprep.subr.bf16.mxu0 %v4588_v48  ;;  %v4301_v25 = vpack.c.bf16 %v2541_v22, %v2539_v20  ;;  %v3660_v20 = vld [vmem:[%s6613_s9 + $0x1f0] sm:$0xff]  ;;  %v3665_v22 = vld [vmem:[%s6613_s9 + $0x218] sm:$0xff] }
 0x5d1   : > { %4251 = vmatpush1.bf16.msra.mxu0 %v4250_v23  ;;  %v3627_v23 = vld [vmem:[%s6613_s9 + $0x100] sm:$0xff] }
 0x5d2   : > { %4252 = vmatprep.subr.bf16.mxu0 %v4588_v48 }
 0x5d5   : > { %4254 = vmatpush1.bf16.msra.mxu0 %v4253_v26  ;;  %v4281_v26 = vpack.c.bf16 %v3629_v24, %v3627_v23  ;;  %v4329_v23 = vpack.c.bf16 %v3660_v20, %v3658_v19  ;;  %v4331_v24 = vpack.c.bf16 %v3665_v22, %v3663_v21  ;;  %v3044_v19 = vld [vmem:[%s6615_s11 + $0x80] sm:$0xff]  ;;  %v3045_v20 = vld [vmem:[%s6615_s11 + $0x88] sm:$0xff] }
 0x5d6   : > { %4255 = vmatprep.subr.bf16.mxu0 %v4588_v48  ;;  %v3028_v21 = vld [vmem:[%s6615_s11] sm:$0xff]  ;;  %v4367_v22 = vpack.c.bf16 %v3045_v20, %v3044_v19 }
 0x5d7   : > { %4282 = vmatpush1.bf16.msra.mxu1 %v4281_v26  ;;  %v3664_v26 = vld [vmem:[%s6613_s9 + $0x210] sm:$0xff] }
 0x5d9   : > { %4257 = vmatpush1.bf16.msra.mxu0 %v4256_v29  ;;  %v3632_v29 = vld [vmem:[%s6613_s9 + $0x128] sm:$0xff] }
 0x5da   : > { %4258 = vmatprep.subr.bf16.mxu0 %v4588_v48  ;;  %v4283_v34 = vpack.c.bf16 %v3634_v31, %v3632_v29  ;;  %v3669_v29 = vld [vmem:[%s6613_s9 + $0x238] sm:$0xff] }
 0x5db   : > { %v4335_v31 = vpack.c.bf16 %v3669_v29, %v3667_v28  ;;  %v3030_v28 = vld [vmem:[%s6615_s11 + $0x10] sm:$0xff]  ;;  %v3031_v29 = vld [vmem:[%s6615_s11 + $0x18] sm:$0xff] }
 0x5dc   : > { %4284 = vmatprep.subr.bf16.mxu1 %v4283_v34  ;;  %v3671_v34 = vld [vmem:[%s6613_s9 + $0x248] sm:$0xff] }
 0x5dd   : > { %4260 = vmatpush1.bf16.msra.mxu0 %v4259_v32  ;;  %v2543_v32 = vld [vmem:[%s6613_s9 + $0x80] sm:$0xff]  ;;  %4286 = vmatpush1.bf16.msra.mxu1 %v4285_v39  ;;  %v3672_v39 = vld [vmem:[%s6613_s9 + $0x250] sm:$0xff] }
 0x5de   : > { %4261 = vmatprep.subr.bf16.mxu0 %v4588_v48  ;;  %4368 = vmatprep.subr.bf16.mxu1 %v4367_v22 }
 0x5e1   : > { %4263 = vmatpush1.bf16.msra.mxu0 %v4262_v35  ;;  %v4305_v35 = vpack.c.bf16 %v2545_v33, %v2543_v32  ;;  %v3666_v32 = vld [vmem:[%s6613_s9 + $0x220] sm:$0xff]  ;;  %v3668_v33 = vld [vmem:[%s6613_s9 + $0x230] sm:$0xff] }
 0x5e2   : > { %4264 = vmatprep.subr.bf16.mxu0 %v4588_v48  ;;  %v4337_v36 = vpack.c.bf16 %v3668_v33, %v3666_v32  ;;  %v4373_v32 = vpack.c.bf16 %v3031_v29, %v3030_v28  ;;  %v3139_v28 = vld [vmem:[%s6617_s13 + $0x38] sm:$0xff] }
 0x5e5   : > { %4266 = vmatpush1.bf16.msra.mxu0 %v4265_v38  ;;  %v3638_v38 = vld [vmem:[%s6613_s9 + $0x148] sm:$0xff] }
 0x5e6   : > { %4288 = vmatprep.subr.bf16.mxu0 %v4287_v42  ;;  %v4307_v41 = vpack.c.bf16 %v3640_v40, %v3638_v38  ;;  %v3670_v38 = vld [vmem:[%s6613_s9 + $0x240] sm:$0xff]  ;;  %v3675_v40 = vld [vmem:[%s6613_s9 + $0x268] sm:$0xff] }
 0x5e8   : > { %2518 = vmatmul.mubr.f32.vlgmr.msra.gmra.mrb[18].mxu0 %v2336_v5  ;;  %v2535_v5 = vld [vmem:[%s6613_s9 + $0x40] sm:$0xff] }
 0x5e9   : > { %2711 = vmatprep.mubr.f32.mxu0 %v4586_v7  ;;  %4290 = vmatpush1.bf16.msra.mxu0 %v4289_v47  ;;  %v4297_v9 = vpack.c.bf16 %v2537_v8, %v2535_v5  ;;  %v3637_v47 = vld [vmem:[%s6613_s9 + $0x140] sm:$0xff]  ;;  %v3651_v5 = vld [vmem:[%s6613_s9 + $0x1b0] sm:$0xff]  ;;  %v3656_v8 = vld [vmem:[%s6613_s9 + $0x1d8] sm:$0xff] }
 0x5ea   : > { %4292 = vmatprep.subr.bf16.mxu0 %v4291_v56  ;;  %v4309_v52 = vpack.c.bf16 %v3639_v49, %v3637_v47  ;;  %v3646_v56 = vld [vmem:[%s6613_s9 + $0x188] sm:$0xff]  ;;  %v4323_v10 = vpack.c.bf16 %v3656_v8, %v3654_v6  ;;  %v3682_v47 = vld [vmem:[%s6613_s9 + $0x298] sm:$0xff]  ;;  %v3691_v6 = vld [vmem:[%s6613_s9 + $0x2e0] sm:$0xff] }
 0x5eb   : > { %v3693_v8 = vld [vmem:[%s6613_s9 + $0x2f0] sm:$0xff] }
 0x5ed   : > { %4294 = vmatpush1.bf16.msra.mxu0 %v4293_v61  ;;  %v4315_v61 = vpack.c.bf16 %v3648_v59, %v3646_v56 }
 0x5ee   : > { %4296 = vmatprep.subr.bf16.mxu0 %v4295_v2  ;;  %v4317_v2 = vpack.c.bf16 %v3647_v63, %v3645_v62 }
 0x5f1   : > { %4298 = vmatpush1.bf16.msra.mxu0 %v4297_v9  ;;  %v4321_v9 = vpack.c.bf16 %v3651_v5, %v3649_v4  ;;  %v4357_v4 = vpack.c.bf16 %v3689_v1, %v3687_v0  ;;  %v3042_v1 = vld [vmem:[%s6615_s11 + $0x70] sm:$0xff] }
 0x5f2   : > { %4300 = vmatprep.subr.bf16.mxu0 %v4299_v17  ;;  %v4325_v17 = vpack.c.bf16 %v3655_v14, %v3653_v12  ;;  %v4361_v12 = vpack.c.bf16 %v3693_v8, %v3691_v6  ;;  %v3012_v6 = vld [vmem:[%s6614_s10] sm:$0x3] }
 0x5f3   : > { %v3017_v8 = vrot.slane %v3012_v6, %v5248_v11  ;;  %v3134_v11 = vld [vmem:[%s6617_s13 + $0x10] sm:$0xff] }
 0x5f5   : > { %4302 = vmatpush1.bf16.msra.mxu0 %v4301_v25  ;;  %v3662_v25 = vld [vmem:[%s6613_s9 + $0x200] sm:$0xff] }
 0x5f6   : > { %4304 = vmatprep.subr.bf16.mxu0 %v4303_v30  ;;  %v4333_v30 = vpack.c.bf16 %v3664_v26, %v3662_v25  ;;  %v3047_v25 = vld [vmem:[%s6615_s11 + $0x98] sm:$0xff] }
 0x5f9   : > { %4306 = vmatpush1.bf16.msra.mxu0 %v4305_v35  ;;  %v3673_v35 = vld [vmem:[%s6613_s9 + $0x258] sm:$0xff] }
 0x5fa   : > { %4308 = vmatprep.subr.bf16.mxu0 %v4307_v41  ;;  %v4339_v37 = vpack.c.bf16 %v3673_v35, %v3671_v34  ;;  %v3677_v41 = vld [vmem:[%s6613_s9 + $0x278] sm:$0xff]  ;;  %v3032_v34 = vld [vmem:[%s6615_s11 + $0x20] sm:$0xff]  ;;  %v3033_v35 = vld [vmem:[%s6615_s11 + $0x28] sm:$0xff] }
 0x693   : > { %v2428_v42 = vpop.f32.mrb[16].mxu0 }
 0x694   : > { %v2430_v43 = vpop.f32.mrb[17].mxu0 }
 0x695   : > { %v4343_v43 = vpack.c.bf16 %v3677_v41, %v3675_v40  ;;  %v3034_v40 = vld [vmem:[%s6615_s11 + $0x30] sm:$0xff]  ;;  %v3035_v41 = vld [vmem:[%s6615_s11 + $0x38] sm:$0xff] }
 0x6bb   : > { %v2519_v44 = vpop.f32.mrb[18].mxu0 }
 0x6bc   : > { %v2523_v45 = vmax.f32 %v2428_v42, %v2519_v44  ;;  %v2521_v46 = vpop.f32.mrb[19].mxu0  ;;  %v4341_v42 = vpack.c.bf16 %v3672_v39, %v3670_v38  ;;  %v3674_v44 = vld [vmem:[%s6613_s9 + $0x260] sm:$0xff]  ;;  %v4377_v38 = vpack.c.bf16 %v3033_v35, %v3032_v34  ;;  %v3143_v34 = vld [vmem:[%s6617_s13 + $0x58] sm:$0xff] }
 0x6bd   : > { %v3680_v46 = vld [vmem:[%s6613_s9 + $0x288] sm:$0xff] }
 0x6be   : > { %2525 = vst.msk [vmem:[#allocation3] sm:$0x1f] %vm2524_vm11, %v2523_v45  ;;  %v3676_v45 = vld [vmem:[%s6613_s9 + $0x270] sm:$0xff]  ;;  %v4347_v50 = vpack.c.bf16 %v3682_v47, %v3680_v46  ;;  %v3036_v46 = vld [vmem:[%s6615_s11 + $0x40] sm:$0xff]  ;;  %v3037_v47 = vld [vmem:[%s6615_s11 + $0x48] sm:$0xff] }
 0x6bf   : > { %v4345_v49 = vpack.c.bf16 %v3676_v45, %v3674_v44  ;;  %v4381_v44 = vpack.c.bf16 %v3035_v41, %v3034_v40  ;;  %v3147_v40 = vld [vmem:[%s6617_s13 + $0x78] sm:$0xff] }
 0x6c5   : > { %v2547_v57 = vld [vmem:[#allocation3 + $0x1] sm:$0x1]  ;;  %v2526_v58 = vld [vmem:[#allocation3] sm:$0x1]  ;;  %v2718_v27 = vld [vmem:[#allocation3 + $0x2] sm:$0x1] }
 0x6c6   : > { %3635 = vmatmul.mubr.msk.f32.vlgmr.msra.gmra.mrb[16].mxu1 %vm2569_vm12, %v2547_v57  ;;  %3636 = vmatmul.mubr.msk.f32.vlgmr.msra.gmra.mrb[20].mxu0 %vm2569_vm12, %v2526_v58  ;;  %v3683_v57 = vld [vmem:[%s6613_s9 + $0x2a0] sm:$0xff]  ;;  %v3685_v58 = vld [vmem:[%s6613_s9 + $0x2b0] sm:$0xff] }
 0x6c7   : > { %4310 = vmatpush1.bf16.msra.mxu0 %v4309_v52  ;;  %2807 = vmatprep.mubr.f32.mxu0 %v4586_v7  ;;  %v3681_v52 = vld [vmem:[%s6613_s9 + $0x290] sm:$0xff]  ;;  %v4353_v62 = vpack.c.bf16 %v3685_v58, %v3683_v57  ;;  %v3057_v57 = vld [vmem:[%s6615_s11 + $0xe8] sm:$0xff] }
 0x6c8   : > { %4312 = vmatprep.subr.bf16.mxu0 %v4311_v53  ;;  %v3684_v53 = vld [vmem:[%s6613_s9 + $0x2a8] sm:$0xff]  ;;  %v4349_v55 = vpack.c.bf16 %v3681_v52, %v3679_v51  ;;  %v2816_v59 = vld [vmem:[#allocation3 + $0x3] sm:$0x1]  ;;  %v4385_v51 = vpack.c.bf16 %v3037_v47, %v3036_v46  ;;  %v3148_v47 = vld [vmem:[%s6618_s14] sm:$0x1] }
 0x6c9   : > { %v4351_v56 = vpack.c.bf16 %v3686_v54, %v3684_v53  ;;  %v3038_v53 = vld [vmem:[%s6615_s11 + $0x50] sm:$0xff]  ;;  %v3039_v54 = vld [vmem:[%s6615_s11 + $0x58] sm:$0xff] }
 0x6cb   : > { %4314 = vmatpush1.bf16.msra.mxu0 %v4313_v60  ;;  %v3688_v60 = vld [vmem:[%s6613_s9 + $0x2c8] sm:$0xff] }
 0x6cc   : > { %4316 = vmatprep.subr.bf16.mxu0 %v4315_v61  ;;  %v3690_v61 = vld [vmem:[%s6613_s9 + $0x2d8] sm:$0xff] }
 0x6cd   : > { %v4355_v63 = vpack.c.bf16 %v3690_v61, %v3688_v60  ;;  %v3041_v60 = vld [vmem:[%s6615_s11 + $0x68] sm:$0xff] }
 0x6cf   : > { %4318 = vmatpush1.bf16.msra.mxu0 %v4317_v2  ;;  %v3692_v2 = vld [vmem:[%s6613_s9 + $0x2e8] sm:$0xff] }
 0x6d0   : > { %4320 = vmatprep.subr.bf16.mxu0 %v4319_v3  ;;  %v3694_v3 = vld [vmem:[%s6613_s9 + $0x2f8] sm:$0xff] }
 0x6d1   : > { %v4359_v5 = vpack.c.bf16 %v3694_v3, %v3692_v2  ;;  %v3043_v2 = vld [vmem:[%s6615_s11 + $0x78] sm:$0xff] }
 0x6d2   : > { %v4397_v3 = vpack.c.bf16 %v3043_v2, %v3042_v1 }
 0x6d3   : > { %4322 = vmatpush1.bf16.msra.mxu0 %v4321_v9  ;;  %v3696_v9 = vld [vmem:[%s6613_s9 + $0x308] sm:$0xff] }
 0x6d4   : > { %4324 = vmatprep.subr.bf16.mxu0 %v4323_v10  ;;  %v3698_v10 = vld [vmem:[%s6613_s9 + $0x318] sm:$0xff] }
 0x6d5   : > { %v4363_v14 = vpack.c.bf16 %v3698_v10, %v3696_v9  ;;  %v3021_v10 = vrot.slane %v3012_v6, %v5253_v13  ;;  %v3135_v13 = vld [vmem:[%s6617_s13 + $0x18] sm:$0xff] }
 0x6d7   : > { %4326 = vmatpush1.bf16.msra.mxu0 %v4325_v17  ;;  %v4365_v17 = vpack.c.bf16 %v3697_v16, %v3695_v15 }
 0x6d8   : > { %4328 = vmatprep.subr.bf16.mxu0 %v4327_v18  ;;  %v2914_v18 = vld [vmem:[#allocation3 + $0x4] sm:$0x1] }
 0x6da   : > { %3657 = vmatmul.mubr.msk.f32.vlgmr.msra.gmra.mrb[20].mxu0 %vm2569_vm12, %v2718_v27 }
 0x6db   : > { %4330 = vmatpush1.bf16.msra.mxu0 %v4329_v23  ;;  %2905 = vmatprep.mubr.f32.mxu0 %v4586_v7  ;;  %v3029_v23 = vld [vmem:[%s6615_s11 + $0x8] sm:$0xff] }
 0x6dc   : > { %4332 = vmatprep.subr.bf16.mxu0 %v4331_v24  ;;  %v3046_v24 = vld [vmem:[%s6615_s11 + $0x90] sm:$0xff]  ;;  %v4369_v26 = vpack.c.bf16 %v3029_v23, %v3028_v21  ;;  %v4403_v23 = vpack.c.bf16 %v3135_v13, %v3134_v11 }
 0x6dd   : > { %v4371_v27 = vpack.c.bf16 %v3047_v25, %v3046_v24  ;;  %v3136_v24 = vld [vmem:[%s6617_s13 + $0x20] sm:$0xff]  ;;  %v3137_v25 = vld [vmem:[%s6617_s13 + $0x28] sm:$0xff] }
 0x6de   : > { %4370 = vmatpush3.bf16.msra.mxu1 %v4369_v26  ;;  %v4406_v26 = vpack.c.bf16 %v3137_v25, %v3136_v24 }
 0x6df   : > { %4334 = vmatpush1.bf16.msra.mxu0 %v4333_v30  ;;  %v3048_v30 = vld [vmem:[%s6615_s11 + $0xa0] sm:$0xff]  ;;  %4372 = vmatprep.subr.bf16.mxu1 %v4371_v27  ;;  %v3138_v27 = vld [vmem:[%s6617_s13 + $0x30] sm:$0xff] }
 0x6e0   : > { %4336 = vmatprep.subr.bf16.mxu0 %v4335_v31  ;;  %v3049_v31 = vld [vmem:[%s6615_s11 + $0xa8] sm:$0xff]  ;;  %v4409_v29 = vpack.c.bf16 %v3139_v28, %v3138_v27 }
 0x6e1   : > { %v4375_v33 = vpack.c.bf16 %v3049_v31, %v3048_v30  ;;  %v3140_v30 = vld [vmem:[%s6617_s13 + $0x40] sm:$0xff]  ;;  %v3141_v31 = vld [vmem:[%s6617_s13 + $0x48] sm:$0xff] }
 0x6e2   : > { %4374 = vmatpush3.bf16.msra.mxu1 %v4373_v32  ;;  %v4412_v32 = vpack.c.bf16 %v3141_v31, %v3140_v30 }
 0x6e3   : > { %4338 = vmatpush1.bf16.msra.mxu0 %v4337_v36  ;;  %v3050_v36 = vld [vmem:[%s6615_s11 + $0xb0] sm:$0xff]  ;;  %4376 = vmatprep.subr.bf16.mxu1 %v4375_v33 }
 0x6e4   : > { %4340 = vmatprep.subr.bf16.mxu0 %v4339_v37  ;;  %v3051_v37 = vld [vmem:[%s6615_s11 + $0xb8] sm:$0xff]  ;;  %v3142_v33 = vld [vmem:[%s6617_s13 + $0x50] sm:$0xff] }
 0x6e5   : > { %v4379_v39 = vpack.c.bf16 %v3051_v37, %v3050_v36  ;;  %v4415_v35 = vpack.c.bf16 %v3143_v34, %v3142_v33  ;;  %v3144_v36 = vld [vmem:[%s6617_s13 + $0x60] sm:$0xff]  ;;  %v3145_v37 = vld [vmem:[%s6617_s13 + $0x68] sm:$0xff] }
 0x6e6   : > { %4378 = vmatpush3.bf16.msra.mxu1 %v4377_v38  ;;  %v4418_v38 = vpack.c.bf16 %v3145_v37, %v3144_v36 }
 0x6e7   : > { %4342 = vmatpush1.bf16.msra.mxu0 %v4341_v42  ;;  %v3052_v42 = vld [vmem:[%s6615_s11 + $0xc0] sm:$0xff]  ;;  %4380 = vmatprep.subr.bf16.mxu1 %v4379_v39  ;;  %v3146_v39 = vld [vmem:[%s6617_s13 + $0x70] sm:$0xff] }
 0x6e8   : > { %4344 = vmatprep.subr.bf16.mxu0 %v4343_v43  ;;  %v3053_v43 = vld [vmem:[%s6615_s11 + $0xc8] sm:$0xff]  ;;  %v4421_v41 = vpack.c.bf16 %v3147_v40, %v3146_v39 }
 0x6e9   : > { %v4383_v45 = vpack.c.bf16 %v3053_v43, %v3052_v42  ;;  %v3060_v43 = vld [vmem:[%s6616_s12] sm:$0x1] }
 0x6ea   : > { %4382 = vmatpush3.bf16.msra.mxu1 %v4381_v44 }
 0x6eb   : > { %4346 = vmatpush1.bf16.msra.mxu0 %v4345_v49  ;;  %v3054_v49 = vld [vmem:[%s6615_s11 + $0xd0] sm:$0xff]  ;;  %4384 = vmatprep.subr.bf16.mxu1 %v4383_v45 }
 0x6ec   : > { %4348 = vmatprep.subr.bf16.mxu0 %v4347_v50  ;;  %v3055_v50 = vld [vmem:[%s6615_s11 + $0xd8] sm:$0xff] }
 0x6ed   : > { %v4387_v52 = vpack.c.bf16 %v3055_v50, %v3054_v49 }
 0x6ee   : > { %3678 = vmatmul.mubr.msk.f32.vlgmr.msra.gmra.mrb[20].mxu0 %vm2569_vm12, %v2816_v59  ;;  %4386 = vmatpush3.bf16.msra.mxu1 %v4385_v51  ;;  %v3040_v59 = vld [vmem:[%s6615_s11 + $0x60] sm:$0xff] }
 0x6ef   : > { %4350 = vmatpush1.bf16.msra.mxu0 %v4349_v55  ;;  %3003 = vmatprep.mubr.f32.mxu0 %v4586_v7  ;;  %v4389_v55 = vpack.c.bf16 %v3039_v54, %v3038_v53  ;;  %v4393_v61 = vpack.c.bf16 %v3041_v60, %v3040_v59 }
 0x6f0   : > { %4352 = vmatprep.subr.bf16.mxu0 %v4351_v56  ;;  %4388 = vmatprep.subr.bf16.mxu1 %v4387_v52  ;;  %v3056_v56 = vld [vmem:[%s6615_s11 + $0xe0] sm:$0xff] }
 0x6f1   : > { %v4391_v58 = vpack.c.bf16 %v3057_v57, %v3056_v56 }
 0x6f2   : > { %4390 = vmatpush3.bf16.msra.mxu1 %v4389_v55 }
 0x6f3   : > { %4354 = vmatpush1.bf16.msra.mxu0 %v4353_v62  ;;  %4392 = vmatprep.subr.bf16.mxu1 %v4391_v58  ;;  %v3058_v62 = vld [vmem:[%s6615_s11 + $0xf0] sm:$0xff] }
 0x6f4   : > { %4356 = vmatprep.subr.bf16.mxu0 %v4355_v63  ;;  %v3059_v63 = vld [vmem:[%s6615_s11 + $0xf8] sm:$0xff] }
 0x6f5   : > { %v4395_v0 = vpack.c.bf16 %v3059_v63, %v3058_v62 }
 0x6f6   : > { %4394 = vmatpush3.bf16.msra.mxu1 %v4393_v61 }
 0x6f7   : > { %4358 = vmatpush1.bf16.msra.mxu0 %v4357_v4  ;;  %4396 = vmatprep.subr.bf16.mxu1 %v4395_v0 }
 0x6f8   : > { %4360 = vmatprep.subr.bf16.mxu0 %v4359_v5 }
 0x6fa   : > { %4398 = vmatpush3.bf16.msra.mxu1 %v4397_v3 }
 0x6fb   : > { %4362 = vmatpush1.bf16.msra.mxu0 %v4361_v12  ;;  %4399 = vmatprep.subr.bf16.mxu1 %v4588_v48 }
 0x6fc   : > { %4364 = vmatprep.subr.bf16.mxu0 %v4363_v14 }
 0x6ff   : > { %4366 = vmatpush1.bf16.msra.mxu0 %v4365_v17  ;;  %v3132_v17 = vld [vmem:[%s6617_s13] sm:$0xff] }
 0x702   : > { %3699 = vmatmul.mubr.msk.f32.vlgmr.msra.gmra.mrb[20].mxu0 %vm2569_vm12, %v2914_v18  ;;  %v3133_v18 = vld [vmem:[%s6617_s13 + $0x8] sm:$0xff] }
 0x703   : > { %v4400_v21 = vpack.c.bf16 %v3133_v18, %v3132_v17 }
 0x799   : > { %v2639_v4 = vpop.f32.mrb[16].mxu1 }
 0x79a   : > { %v2641_v5 = vpop.f32.mrb[17].mxu1 }
 0x7d5   : > { %v3005_v9 = vpop.f32.mrb[20].mxu0 }
 0x7d6   : > { %v4423_v12 = vadd.f32 %v3005_v9, %v2639_v4  ;;  %v3007_v14 = vpop.f32.mrb[21].mxu0 }
 0x7d7   : > { %v4424_v15 = vadd.f32 %v3007_v14, %v2641_v5 }
 0x7d8   : > { %v3024_v16 = vadd.f32 %v4423_v12, %v3017_v8 }
 0x7d9   : > { %v3025_v19 = vadd.f32 %v4424_v15, %v3021_v10 }
 0x7da   : > { %v3026_v22 = vmax.f32 %v3024_v16, 0.0 }
 0x7db   : > { %v3027_v20 = vmax.f32 %v3025_v19, 0.0 }
 0x7dd   : > { %3125 = vmatprep.mubr.f32.mxu1 %v3027_v20 }
 0x7de   : > { %3126 = vmatmul.mubr.f32.vlgmr.msra.gmra.mrb[18].mxu1 %v3026_v22 }
 0x7df   : > { %4401 = vmatpush3.bf16.msra.mxu1 %v4400_v21  ;;  %3788 = vmatprep.mubr.msk.f32.mxu1 %vm4589_vm13, %v4586_v7 }
 0x7e0   : > { %4402 = vmatprep.subr.bf16.mxu1 %v4588_v48 }
 0x7e3   : > { %4404 = vmatpush3.bf16.msra.mxu1 %v4403_v23 }
 0x7e4   : > { %4405 = vmatprep.subr.bf16.mxu1 %v4588_v48 }
 0x7e7   : > { %4407 = vmatpush3.bf16.msra.mxu1 %v4406_v26 }
 0x7e8   : > { %4408 = vmatprep.subr.bf16.mxu1 %v4588_v48 }
 0x7eb   : > { %4410 = vmatpush3.bf16.msra.mxu1 %v4409_v29 }
 0x7ec   : > { %4411 = vmatprep.subr.bf16.mxu1 %v4588_v48 }
 0x7ef   : > { %4413 = vmatpush3.bf16.msra.mxu1 %v4412_v32 }
 0x7f0   : > { %4414 = vmatprep.subr.bf16.mxu1 %v4588_v48 }
 0x7f3   : > { %4416 = vmatpush3.bf16.msra.mxu1 %v4415_v35 }
 0x7f4   : > { %4417 = vmatprep.subr.bf16.mxu1 %v4588_v48 }
 0x7f7   : > { %4419 = vmatpush3.bf16.msra.mxu1 %v4418_v38 }
 0x7f8   : > { %4420 = vmatprep.subr.bf16.mxu1 %v4588_v48 }
 0x7fb   : > { %4422 = vmatpush3.bf16.msra.mxu1 %v4421_v41 }
 0x8b1   : > { %v3736_v42 = vpop.f32.mrb[18].mxu1 }
 0x8b2   : > { %v3737_v48 = vpop.f32.mrb[19].mxu1 }
 0x8b3   : > { %v3738_v44 = vadd.f32 %v3737_v48, %v3736_v42 }
 0x8b5   : > { %v3128_v45 = vadd.f32 %v3738_v44, %v3060_v43 }
 0x8b7   : > { %v3131_v46 = vmax.f32 %v3128_v45, 0.0 }
 0x8b9   : > { %3789 = vmatmul.mubr.f32.vlgmr.msra.gmra.mrb[20].mxu1 %v3131_v46 }
 0x98c   : > { %v3215_v7 = vpop.f32.mrb[20].mxu1 }
 0x98d   : > { %v3216_v49 = vadd.f32 %v3215_v7, %v3148_v47  ;;  %v3790_v50 = vpop.f32.mrb[21].mxu1 }
 0x98f   : > { %3219 = vst [vmem:[%s486_s29] sm:$0x1] %v3216_v49 }
 0x990   : > { %4535 = shalt.err (!%p4532_p3)
}
 0x991   : > { %s4536_s24 = scalar_lea.hbm %s6562_s26, 16  ;;  %s4540_s29 = scalar_lea.hbm %s6619_s15, 32 }
 0x992   : > { %p4537_p4 = scmp.ne.s32.totalorder %s6562_s26, %s4536_s24  ;;  %p4541_p9 = scmp.lt.u32.totalorder %s6562_s26, %s6619_s15 }
 0x993   : > { %p4542_p10 = scmp.lt.u32.totalorder %s4540_s29, %s4536_s24  ;;  %p4544_p12 = scmp.lt.u32.totalorder %s4536_s24, %s6562_s26 }
 0x994   : > { %p4538_p7 = pnand %p4537_p4, %p4709_p5 }
 0x995   : > { %p4543_p11 = por %p4542_p10, %p4541_p9 }
 0x996   : > { %p4539_p8 = pneg %p4538_p7 }
 0x997   : > { %p4545_p13 = por %p4544_p12, %p4543_p11 }
 0x999   : > { %p4546_p0 = pnand %p4545_p13, %p4539_p8 }
 0x99b   : > { %4549 = shalt.err (!%p4546_p0)
}
 0x99c   : > { %4479 = dma.vmem_to_hbm [thread:$0]  (%p4709_p5), %s6564_s23, 16, %s6562_s26, %s3221_s30  }
 0x99d PF: > { %s6634_s21 = sld [smem:[#allocation9_spill]]  ;;  %s6635_s22 = sld [smem:[#allocation7_spill]] }
 0x9a3   : > { %p4485_p1 = scmp.ge.s32.totalorder %s6634_s21, 2  ;;  %s3245_s17 = sand.u32 1, %s6635_s22  }
 0x9a4   : > { %s3246_s20 = scalar_lea.sflag [#allocation5], %s3245_s17 }
 0x9a5   : > { %p4482_p2 = pnand %p4485_p1, %p4713_p6 }
 0x9a7   : > { %4567 = dma.done.wait (!%p4482_p2), %s3246_s20, 16  }
 0x9a8   : > { %4569 = vsyncadd (!%p4482_p2), %s3246_s20, 4294967280  ;;  %s6637_s21 = sld [smem:[#allocation10_spill]]  ;;  %s6638_s24 = sld [smem:[#allocation8_spill]] }
 0x9a9   : > { %s6639_s20 = sld [smem:[#allocation11_spill]]  ;;  %s6640_s18 = smov %s4576_s19 }
 0x9ae   : > { %p25_p3 = scmp.ge.s32.totalorder %s6637_s21, 4   ;;  %s6641_s19 = smov %s6638_s24 }
 0x9b0   :  { %27 = sbr.rel (!%p25_p3) target bundleno = 3 (0x3), region = 131 }
 0x9b7   :  { %3250 = vsyncpa [#allocation5], 1 }
 0x9b8   :  { %3252 = vsyncpa [#allocation5 + $0x1], 1 }

</bundles_post_ra>
